<compile_context>
chip_gen: v7x
topology: tpu7x:2x2x1
jax: 0.10.0
libtpu: 0.0.40
codegen_flags: <defaults>
</compile_context>

<pallas_src>
import functools

import jax
import jax.numpy as jnp
from jax.experimental import pallas as pl
from jax.experimental.pallas import tpu as pltpu


# ----------------------------------------------------------------------------
# Generation / tiling helpers
# ----------------------------------------------------------------------------
def _num_tensorcores():
    """>=2 when grid 'parallel' axes are sharded across cores (v7x / megacore)."""
    try:
        kind = jax.devices()[0].device_kind.lower()
        if "v7" in kind or "7x" in kind or "v4" in kind or "v5p" in kind:
            return 2
    except Exception:
        pass
    return 1


_NUM_TC = _num_tensorcores()
_VMEM_BUDGET = 12 * 1024 * 1024      # per-call tile budget, safe on v5e/v6e/v7x
_VMEM_LIMIT = 32 * 1024 * 1024       # explicit scoped-VMEM request


def _round_up(x, m):
    return (x + m - 1) // m * m


def _pick_tk(k):
    if k % 128 != 0:
        return k                      # full-dim block, single reduction step
    for t in range(min(k, 1024), 0, -128):
        if k % t == 0:
            return t
    return k


def _pick_tn(n):
    for t in (512, 256, 128):
        if n % t == 0:
            return t
    return n                          # full-dim block (e.g. 64, 32)


def _pick_tiles(mp, n, k, has_res, out_bytes):
    """Largest tm under a VMEM budget; v7x-aware split so both TCs get work."""
    tk = _pick_tk(k)
    tn = _pick_tn(n)

    def vmem(tm_, tn_):
        b = (2 * tm_ * tk * 2            # double-buffered bf16 LHS
             + 2 * tk * tn_ * 2          # double-buffered bf16 RHS
             + tm_ * tn_ * 4             # f32 accumulator scratch
             + 2 * tm_ * tn_ * out_bytes # double-buffered output
             + 2 * tn_ * 4)              # bias
        if has_res:
            b += 2 * tm_ * tn_ * 2       # double-buffered bf16 residual
        return b

    tm = 8
    for t in (2048, 1024, 512, 256, 128, 64, 32, 16, 8):
        if mp % t == 0 and vmem(t, tn) <= _VMEM_BUDGET:
            tm = t
            break

    # v7x (2 TensorCores): ensure parallel grid volume >= 2 when possible.
    if _NUM_TC > 1 and (mp // tm) * (n // tn) == 1:
        if n >= 256 and (n // 2) % 128 == 0:
            tn = n // 2
        elif mp >= 16 and (mp // 2) % 8 == 0:
            tm = mp // 2
    return tm, tn, tk


# ----------------------------------------------------------------------------
# Pallas kernel: tiled matmul with fused bias (+ residual) (+ ReLU) epilogue
# ----------------------------------------------------------------------------
def _mm_kernel(*refs, relu, has_res):
    if has_res:
        x_ref, w_ref, b_ref, r_ref, o_ref, acc_ref = refs
    else:
        x_ref, w_ref, b_ref, o_ref, acc_ref = refs
        r_ref = None

    @pl.when(pl.program_id(2) == 0)
    def _():
        acc_ref[...] = jnp.zeros_like(acc_ref)

    acc_ref[...] += jnp.dot(x_ref[...], w_ref[...],
                            preferred_element_type=jnp.float32)

    @pl.when(pl.program_id(2) == pl.num_programs(2) - 1)
    def _():
        y = acc_ref[...] + b_ref[...]
        if has_res:
            y = y + r_ref[...].astype(jnp.float32)
        if relu:
            y = jnp.maximum(y, 0.0)
        o_ref[...] = y.astype(o_ref.dtype)


def matmul_fused(x, w, bias, residual=None, relu=False, out_dtype=jnp.bfloat16):
    """out = [relu]((x @ w) + bias [+ residual]), bf16 MXU, f32 accumulation."""
    M, K = x.shape
    K2, N = w.shape
    assert K == K2 and bias.shape == (1, N)

    m_align = 16 if out_dtype == jnp.bfloat16 else 8
    Mp = _round_up(M, m_align)
    if Mp != M:                                  # never hit in this model
        x = jnp.pad(x, ((0, Mp - M), (0, 0)))
        if residual is not None:
            residual = jnp.pad(residual, ((0, Mp - M), (0, 0)))

    has_res = residual is not None
    out_bytes = jnp.dtype(out_dtype).itemsize
    tm, tn, tk = _pick_tiles(Mp, N, K, has_res, out_bytes)
    grid = (Mp // tm, N // tn, K // tk)

    in_specs = [
        pl.BlockSpec((tm, tk), lambda i, j, k: (i, k)),
        pl.BlockSpec((tk, tn), lambda i, j, k: (k, j)),
        pl.BlockSpec((1, tn), lambda i, j, k: (0, j)),
    ]
    args = [x, w, bias]
    if has_res:
        in_specs.append(pl.BlockSpec((tm, tn), lambda i, j, k: (i, j)))
        args.append(residual)

    out = pl.pallas_call(
        functools.partial(_mm_kernel, relu=relu, has_res=has_res),
        out_shape=jax.ShapeDtypeStruct((Mp, N), out_dtype),
        grid_spec=pltpu.PrefetchScalarGridSpec(
            num_scalar_prefetch=0,
            grid=grid,
            in_specs=in_specs,
            out_specs=pl.BlockSpec((tm, tn), lambda i, j, k: (i, j)),
            scratch_shapes=[pltpu.VMEM((tm, tn), jnp.float32)],
        ),
        compiler_params=pltpu.CompilerParams(
            dimension_semantics=("parallel", "parallel", "arbitrary"),
            vmem_limit_bytes=_VMEM_LIMIT),
    )(*args)
    return out[:M] if Mp != M else out


# ----------------------------------------------------------------------------
# Pallas kernel: 3x3 stride-1 conv as 9 row-shifted tap matmuls (no im2col)
# ----------------------------------------------------------------------------
def _conv3x3_kernel(x_ref, w_ref, b_ref, o_ref, acc_ref, *,
                    tap_offsets, mf, relu):
    acc_ref[...] = jnp.zeros_like(acc_ref)
    for t, off in enumerate(tap_offsets):        # static, unrolled 9 taps
        acc_ref[...] += jnp.dot(x_ref[pl.ds(off, mf), :], w_ref[t],
                                preferred_element_type=jnp.float32)
    y = acc_ref[...] + b_ref[...]
    if relu:
        y = jnp.maximum(y, 0.0)
    o_ref[...] = y.astype(o_ref.dtype)


def conv3x3_s1(x, layer, relu):
    """3x3 / stride-1 / pad-1 conv without HBM im2col.

    The padded activation is flattened to (N*Hp*Wp, C); for valid output rows,
    tap (di, dj) is exactly the row-slab starting at offset di*Wp + dj of that
    matrix (with a (Wp+1)-row zero guard at both ends), so the conv is 9
    row-shifted MXU matmuls accumulated in VMEM.  Invalid (frame) rows are
    cropped afterwards.
    """
    N, H, W, C = x.shape
    cout = layer['w'].shape[1]
    Hp, Wp = H + 2, W + 2
    mf = N * Hp * Wp
    guard = Wp + 1

    xp = jnp.pad(x, ((0, 0), (1, 1), (1, 1), (0, 0)))
    xg = jnp.pad(xp.reshape(mf, C), ((guard, guard), (0, 0)))
    w3 = layer['w'].reshape(9, C, cout)
    tap_offsets = tuple(di * Wp + dj for di in range(3) for dj in range(3))

    if cout % 256 == 0:
        tn = 256
    elif cout % 128 == 0:
        tn = 128
    else:
        tn = cout
    # v7x: keep both TensorCores busy (only when the split stays lane-dense).
    if _NUM_TC > 1 and cout // tn < 2 and tn % 256 == 0:
        tn //= 2
    grid = (cout // tn,)

    out = pl.pallas_call(
        functools.partial(_conv3x3_kernel, tap_offsets=tap_offsets,
                          mf=mf, relu=relu),
        out_shape=jax.ShapeDtypeStruct((mf, cout), jnp.bfloat16),
        grid_spec=pltpu.PrefetchScalarGridSpec(
            num_scalar_prefetch=0,
            grid=grid,
            in_specs=[
                pl.BlockSpec((mf + 2 * guard, C), lambda j: (0, 0)),
                pl.BlockSpec((9, C, tn), lambda j: (0, 0, j)),
                pl.BlockSpec((1, tn), lambda j: (0, j)),
            ],
            out_specs=pl.BlockSpec((mf, tn), lambda j: (0, j)),
            scratch_shapes=[pltpu.VMEM((mf, tn), jnp.float32)],
        ),
        compiler_params=pltpu.CompilerParams(
            dimension_semantics=("parallel",),
            vmem_limit_bytes=_VMEM_LIMIT),
    )(xg, w3, layer['b'])

    return out.reshape(N, Hp, Wp, cout)[:, 1:1 + H, 1:1 + W, :]


# ----------------------------------------------------------------------------
# Plain-JAX glue (layout plumbing only; the compute is in the Pallas kernels)
# ----------------------------------------------------------------------------
def _im2col(x, kh, kw, stride, pad):
    """(N,H,W,C) -> (N*Ho*Wo, kh*kw*C) patches (stem + stride-2 convs only)."""
    N, H, W, C = x.shape
    if pad:
        x = jnp.pad(x, ((0, 0), (pad, pad), (pad, pad), (0, 0)))
    Ho = (H + 2 * pad - kh) // stride + 1
    Wo = (W + 2 * pad - kw) // stride + 1
    cols = []
    for i in range(kh):
        for j in range(kw):
            cols.append(x[:, i:i + stride * (Ho - 1) + 1:stride,
                          j:j + stride * (Wo - 1) + 1:stride, :])
    patches = jnp.concatenate(cols, axis=-1)
    return patches.reshape(N * Ho * Wo, kh * kw * C), (N, Ho, Wo)


def conv2d(x, layer, stride, pad, relu, residual=None):
    """Conv (bias-free) with eval-mode BN folded into `layer` (+relu/+residual)."""
    kh, kw = layer['kh'], layer['kw']
    k_dim, cout = layer['w'].shape

    if kh == 1 and kw == 1 and pad == 0:
        if stride > 1:
            x = x[:, ::stride, ::stride, :]
        n, ho, wo, _ = x.shape
        patches = x.reshape(n * ho * wo, k_dim)
        res = None if residual is None else residual.reshape(n * ho * wo, cout)
        y = matmul_fused(patches, layer['w'], layer['b'], residual=res, relu=relu)
        return y.reshape(n, ho, wo, cout)

    if kh == 3 and kw == 3 and stride == 1 and pad == 1 and residual is None:
        return conv3x3_s1(x, layer, relu)

    # Stem 7x7/s2 and the three 3x3/s2 convs: im2col fallback (small tensors).
    patches, (n, ho, wo) = _im2col(x, kh, kw, stride, pad)
    res = None if residual is None else residual.reshape(n * ho * wo, cout)
    y = matmul_fused(patches, layer['w'], layer['b'], residual=res, relu=relu)
    return y.reshape(n, ho, wo, cout)


def maxpool_3x3_s2(x):
    # Plain-JAX glue (stem only; XLA fuses the 9-way max).
    # TODO(synk): one-pass Pallas maxpool (or fuse into the stem conv writeback).
    N, H, W, C = x.shape
    k, s, pad = 3, 2, 1
    xp = jnp.pad(x, ((0, 0), (pad, pad), (pad, pad), (0, 0)),
                 constant_values=-jnp.inf)
    Ho = (H + 2 * pad - k) // s + 1
    Wo = (W + 2 * pad - k) // s + 1
    out = None
    for i in range(k):
        for j in range(k):
            sl = xp[:, i:i + s * (Ho - 1) + 1:s, j:j + s * (Wo - 1) + 1:s, :]
            out = sl if out is None else jnp.maximum(out, sl)
    return out


# ----------------------------------------------------------------------------
# Deterministic synthetic ResNet50 parameters (BN folded, bf16 weights)
# ----------------------------------------------------------------------------
def _bn_params(key, c, eps=1e-5):
    k1, k2, k3, k4 = jax.random.split(key, 4)
    gamma = 1.0 + 0.1 * jax.random.normal(k1, (c,), jnp.float32)
    beta = 0.1 * jax.random.normal(k2, (c,), jnp.float32)
    mean = 0.1 * jax.random.normal(k3, (c,), jnp.float32)
    var = 1.0 + 0.1 * jnp.abs(jax.random.normal(k4, (c,), jnp.float32))
    scale = gamma / jnp.sqrt(var + eps)
    bias = beta - mean * scale
    return scale, bias


def _conv_bn_folded(kw_key, bn_key, cout, cin, kh, kw):
    """He-init conv as a (kh*kw*cin, cout) bf16 matrix, BN scale folded in."""
    std = (2.0 / (cin * kh * kw)) ** 0.5
    w = std * jax.random.normal(kw_key, (cout, cin, kh, kw), jnp.float32)
    scale, bias = _bn_params(bn_key, cout)
    wmat = jnp.transpose(w, (2, 3, 1, 0)).reshape(kh * kw * cin, cout)
    wmat = wmat * scale[None, :]                     # fold BN scale (eval mode)
    return dict(w=wmat.astype(jnp.bfloat16),
                b=bias.reshape(1, cout).astype(jnp.float32),
                kh=kh, kw=kw)


def init_resnet50_params(key, embedding_dim, num_channels=3):
    keys = iter(jax.random.split(key, 512))
    nk = lambda: next(keys)
    params = {'conv1': _conv_bn_folded(nk(), nk(), 64, num_channels, 7, 7)}
    stage_cfg = [(3, 64, 1), (4, 128, 2), (6, 256, 2), (3, 512, 2)]
    in_c = 64
    layers = []
    for nblocks, width, stride in stage_cfg:
        blocks = []
        for b in range(nblocks):
            s = stride if b == 0 else 1
            out_c = width * 4
            blk = dict(
                stride=s,
                conv1=_conv_bn_folded(nk(), nk(), width, in_c, 1, 1),
                conv2=_conv_bn_folded(nk(), nk(), width, width, 3, 3),
                conv3=_conv_bn_folded(nk(), nk(), out_c, width, 1, 1),
            )
            if b == 0:
                blk['down'] = _conv_bn_folded(nk(), nk(), out_c, in_c, 1, 1)
            blocks.append(blk)
            in_c = out_c
        layers.append(blocks)
    params['layers'] = layers
    params['fc'] = dict(
        w=(0.01 * jax.random.normal(nk(), (2048, embedding_dim), jnp.float32)
           ).astype(jnp.bfloat16),
        b=jnp.zeros((1, embedding_dim), jnp.float32),
    )
    return params


# ----------------------------------------------------------------------------
# Forward pass
# ----------------------------------------------------------------------------
def _bottleneck(x, blk):
    s = blk['stride']
    out = conv2d(x, blk['conv1'], stride=1, pad=0, relu=True)
    out = conv2d(out, blk['conv2'], stride=s, pad=1, relu=True)
    identity = x
    if 'down' in blk:
        identity = conv2d(x, blk['down'], stride=s, pad=0, relu=False)
    # residual add + ReLU fused into the conv3 matmul epilogue
    return conv2d(out, blk['conv3'], stride=1, pad=0, relu=True,
                  residual=identity)


def resnet50_forward(x_nchw, params):
    x = jnp.transpose(x_nchw, (0, 2, 3, 1)).astype(jnp.bfloat16)  # NCHW -> NHWC
    x = conv2d(x, params['conv1'], stride=2, pad=3, relu=True)
    x = maxpool_3x3_s2(x)
    for blocks in params['layers']:
        for blk in blocks:
            x = _bottleneck(x, blk)
    feat = jnp.mean(x.astype(jnp.float32), axis=(1, 2))   # global avg pool
    return matmul_fused(feat.astype(jnp.bfloat16), params['fc']['w'],
                        params['fc']['b'], relu=False, out_dtype=jnp.float32)


def image_embedding_forward(images, params, embedding_dim, num_channels=3,
                            image_size=64, use_fullimage=False):
    """images: (B, S, C, H, W) if not use_fullimage else (N, C, H, W)."""
    if use_fullimage:
        # Dropout(0.1) is identity at inference.
        return resnet50_forward(images, params)
    B, S = images.shape[0], images.shape[1]
    flat = images.reshape(-1, num_channels, image_size, image_size)
    feats = resnet50_forward(flat, params)
    # Dropout(0.1) is identity in eval mode.
    return feats.reshape(B, S, embedding_dim)


# ----------------------------------------------------------------------------
if __name__ == "__main__":
    key = jax.random.PRNGKey(0)
    kp, kx = jax.random.split(key)

    embedding_dim = 32
    B, S, C, H, W = 2, 4, 3, 64, 64   # (batch, seq of patches, channels, H, W)

    params = init_resnet50_params(kp, embedding_dim, num_channels=C)
    images = jax.random.normal(kx, (B, S, C, H, W), jnp.float32)

    out = image_embedding_forward(images, params, embedding_dim,
                                  num_channels=C, image_size=H)
    out = jax.block_until_ready(out)

    assert out.shape == (B, S, embedding_dim), out.shape
    assert bool(jnp.all(jnp.isfinite(out)))
    print("KERNEL_OK")
</pallas_src>

<mosaic_0001>
module attributes {stable_mosaic.version = 11 : i64} {
  func.func @_mm_kernel(%arg0: i32, %arg1: i32, %arg2: i32, %arg3: memref<2048x147xbf16, #tpu.memory_space<vmem>>, %arg4: memref<147x64xbf16, #tpu.memory_space<vmem>>, %arg5: memref<1x64xf32, #tpu.memory_space<vmem>>, %arg6: memref<2048x64xbf16, #tpu.memory_space<vmem>>, %arg7: memref<2048x64xf32, #tpu.memory_space<vmem>>) attributes {dimension_semantics = [#tpu.dimension_semantics<parallel>, #tpu.dimension_semantics<parallel>, #tpu.dimension_semantics<arbitrary>], iteration_bounds = array<i64: 4, 1, 1>, scalar_prefetch = 0 : i64, scratch_operands = 1 : i64, tpu.core_type = #tpu.core_type<tc>, window_params = [{transform_indices = @transform_0, window_bounds = array<i64: 2048, 147>}, {transform_indices = @transform_1, window_bounds = array<i64: 147, 64>}, {transform_indices = @transform_2, window_bounds = array<i64: 1, 64>}, {transform_indices = @transform_3, window_bounds = array<i64: 2048, 64>}]} {
    %c0_i32 = arith.constant 0 : i32
    %0 = arith.cmpi eq, %arg2, %c0_i32 : i32
    %1 = arith.extui %0 : i1 to i32
    %c0_i32_0 = arith.constant 0 : i32
    %2 = arith.cmpi ne, %1, %c0_i32_0 : i32
    scf.if %2 {
      %cst_10 = arith.constant 0.000000e+00 : f32
      %12 = vector.broadcast %cst_10 : f32 to vector<2048x64xf32>
      %c0_11 = arith.constant 0 : index
      %c0_12 = arith.constant 0 : index
      %13 = vector.load %arg7[%c0_11, %c0_12] : memref<2048x64xf32, #tpu.memory_space<vmem>>, vector<2048x64xf32>
      tpu.vector_store %arg7[%c0_11, %c0_12], %12 {strides = array<i32>} : memref<2048x64xf32, #tpu.memory_space<vmem>>, vector<2048x64xf32>,
    } else {
    }
    %c0 = arith.constant 0 : index
    %c0_1 = arith.constant 0 : index
    %3 = vector.load %arg7[%c0, %c0_1] : memref<2048x64xf32, #tpu.memory_space<vmem>>, vector<2048x64xf32>
    %c0_2 = arith.constant 0 : index
    %c0_3 = arith.constant 0 : index
    %4 = vector.load %arg3[%c0_2, %c0_3] : memref<2048x147xbf16, #tpu.memory_space<vmem>>, vector<2048x147xbf16>
    %c0_4 = arith.constant 0 : index
    %c0_5 = arith.constant 0 : index
    %5 = vector.load %arg4[%c0_4, %c0_5] : memref<147x64xbf16, #tpu.memory_space<vmem>>, vector<147x64xbf16>
    %cst = arith.constant dense<0.000000e+00> : vector<2048x64xf32>
    %6 = tpu.matmul %4, %5, %cst {dimension_numbers = #tpu.dot_dimension_numbers<[1], [0], [0], [1], [0, 0, 1, 1], [], []>} : vector<2048x147xbf16>, vector<147x64xbf16>, vector<2048x64xf32> -> vector<2048x64xf32>
    %7 = arith.addf %3, %6 : vector<2048x64xf32>
    %c0_6 = arith.constant 0 : index
    %c0_7 = arith.constant 0 : index
    %8 = vector.load %arg7[%c0_6, %c0_7] : memref<2048x64xf32, #tpu.memory_space<vmem>>, vector<2048x64xf32>
    tpu.vector_store %arg7[%c0_6, %c0_7], %7 {strides = array<i32>} : memref<2048x64xf32, #tpu.memory_space<vmem>>, vector<2048x64xf32>,
    %c0_i32_8 = arith.constant 0 : i32
    %9 = arith.cmpi eq, %arg2, %c0_i32_8 : i32
    %10 = arith.extui %9 : i1 to i32
    %c0_i32_9 = arith.constant 0 : i32
    %11 = arith.cmpi ne, %10, %c0_i32_9 : i32
    scf.if %11 {
      %c0_10 = arith.constant 0 : index
      %c0_11 = arith.constant 0 : index
      %12 = vector.load %arg7[%c0_10, %c0_11] : memref<2048x64xf32, #tpu.memory_space<vmem>>, vector<2048x64xf32>
      %c0_12 = arith.constant 0 : index
      %c0_13 = arith.constant 0 : index
      %13 = vector.load %arg5[%c0_12, %c0_13] : memref<1x64xf32, #tpu.memory_space<vmem>>, vector<1x64xf32>
      %14 = vector.broadcast %13 : vector<1x64xf32> to vector<2048x64xf32>
      %15 = arith.addf %12, %14 : vector<2048x64xf32>
      %cst_14 = arith.constant 0.000000e+00 : f32
      %16 = vector.broadcast %cst_14 : f32 to vector<2048x64xf32>
      %17 = arith.maximumf %15, %16 : vector<2048x64xf32>
      %18 = arith.truncf %17 : vector<2048x64xf32> to vector<2048x64xbf16>
      %c0_15 = arith.constant 0 : index
      %c0_16 = arith.constant 0 : index
      %19 = vector.load %arg6[%c0_15, %c0_16] : memref<2048x64xbf16, #tpu.memory_space<vmem>>, vector<2048x64xbf16>
      tpu.vector_store %arg6[%c0_15, %c0_16], %18 {strides = array<i32>} : memref<2048x64xbf16, #tpu.memory_space<vmem>>, vector<2048x64xbf16>,
    } else {
    }
    return
  }
  func.func @transform_0(%arg0: i32, %arg1: i32, %arg2: i32) -> (i32, i32) {
    %c0_i32 = arith.constant 0 : i32
    return %arg0, %arg2 : i32, i32
  }
  func.func @transform_1(%arg0: i32, %arg1: i32, %arg2: i32) -> (i32, i32) {
    %c0_i32 = arith.constant 0 : i32
    return %arg2, %arg1 : i32, i32
  }
  func.func @transform_2(%arg0: i32, %arg1: i32, %arg2: i32) -> (i32, i32) {
    %c0_i32 = arith.constant 0 : i32
    %c0_i32_0 = arith.constant 0 : i32
    return %c0_i32, %arg1 : i32, i32
  }
  func.func @transform_3(%arg0: i32, %arg1: i32, %arg2: i32) -> (i32, i32) {
    %c0_i32 = arith.constant 0 : i32
    return %arg0, %arg1 : i32, i32
  }
}

</mosaic_0001>

<bundles_post_ra>
// kernel: tpu_custom_call.1
= control target key start
LH: loop header
LB: loop body
LE: loop exit
PB: predicated region body
PF: predicated region fallthrough
CT: control target
= control target key end

     0   :  { %s7819_s12 = smov 0   ;;  %s7821_s13 = smov 0   ;;  %s9852_s0 = inlined_call_operand.vmem [shape: bf16[8192,147], index: 0, kind: input, shape index: {}]   ;;  %s9853_s1 = inlined_call_operand.vmem [shape: bf16[147,64], index: 1, kind: input, shape index: {}]   ;;  %s9854_s2 = inlined_call_operand.vmem [shape: f32[1,64], index: 2, kind: input, shape index: {}]   ;;  %s9855_s3 = inlined_call_operand.vmem [shape: bf16[8192,64], index: 3, kind: output, shape index: {}]  }
   0x1   :  { %s7823_s14 = smov 0  }
   0x2 LB: > { %s32_s15 = sadd.s32 1, %s7790_s13  ;;  %p6410_p0 = scmp.ge.s32.totalorder %s7794_s14, 1  ;;  %s7794_s14 = sphi %s7823_s14, %s13_s14   ;;  %s7790_s13 = sphi %s7821_s13, %s9857_s13   ;;  %s7786_s12 = sphi %s7819_s12, %s9856_s12  }
   0x3   : > { %p34_p1 = scmp.ge.s32.totalorder %s32_s15, 4  ;;  %p191_p2 = scmp.lt.s32.totalorder %s7794_s14, 5 }
   0x5   : > { %s9859_s15 = smov (%p34_p1, %s32_s15), 0  ;;  %p192_p3 = pnand %p6410_p0, %p191_p2 }
   0x6   : > { %v7373_v0 = vld [vmem:[%s9853_s1] sm:$0xff] (!%p192_p3)   ;;  %v7796_v1 = vmov (!%p192_p3), 0   ;;  %v7374_v2 = vld [vmem:[%s9853_s1 + $0x8] sm:$0xff] (!%p192_p3)   ;;  %v7375_v3 = vld [vmem:[%s9853_s1 + $0x10] sm:$0xff] (!%p192_p3)   ;;  %s6411_s22 = sshll.u32 (!%p192_p3), %s7786_s12, 8  ;;  %vm2269_vm0 = vcmask (!%p192_p3), 154624  }
   0x7   : > { %195 = sbr.rel (%p192_p3) target bundleno = 785 (0x311), region = 32  ;;  %2661 = vmatprep.subr.bf16.mxu0 (!%p192_p3), %v7796_v1  ;;  %7326 = vmatprep.subr.bf16.mxu1 (!%p192_p3), %v7796_v1  ;;  %p236_p4 = scmp.lt.s32.totalorder (!%p192_p3), %s6411_s22, 1023  ;;  %v7376_v4 = vld [vmem:[%s9853_s1 + $0x18] sm:$0xff] (!%p192_p3)   ;;  %v7377_v5 = vld [vmem:[%s9853_s1 + $0x20] sm:$0xff] (!%p192_p3)   ;;  %v7378_v8 = vld [vmem:[%s9853_s1 + $0x28] sm:$0xff] (!%p192_p3)   ;;  %vm2654_vm1 = vcmask (!%p192_p3), 1040384  }
   0x8   : > { %2662 = vmatpush1.bf16.msra.mxu0 (!%p192_p3), %v7373_v0  ;;  %7336 = vmatpush1.bf16.msra.mxu1 (!%p192_p3), %v7373_v0  ;;  %v7379_v9 = vld [vmem:[%s9853_s1 + $0x30] sm:$0xff] (!%p192_p3)   ;;  %v7380_v10 = vld [vmem:[%s9853_s1 + $0x38] sm:$0xff] (!%p192_p3)   ;;  %vm2655_vm2 = vcmask (!%p192_p3), 1041408   ;;  %v7797_v11 = vmov (!%p192_p3), 65535   ;;  %v7381_v13 = vld [vmem:[%s9853_s1 + $0x40] sm:$0xff] (!%p192_p3)   ;;  %vm272_vm3 = vcmask (!%p192_p3), 523264  }
   0x9   : > { %2663 = vmatprep.subr.bf16.mxu0 (!%p192_p3), %v7796_v1  ;;  %7327 = vmatprep.subr.bf16.mxu1 (!%p192_p3), %v7796_v1  ;;  %v2656_v12 = vsel (!%p192_p3), %vm2654_vm1, 4294967295, %v7797_v11  ;;  %v7382_v14 = vld [vmem:[%s9853_s1 + $0x48] ss:$0 sps:$4 sm:$0x33] (!%p192_p3)   ;;  %v7798_v61 = vmov (!%p192_p3), 0.0   ;;  %vm6033_vm4 = vcmask (!%p192_p3), 519168  }
   0xa   : > { %v2657_v15 = vsel (!%p192_p3), %vm2655_vm2, %v2656_v12, 0  ;;  %273 = vst.msk [vmem:[#allocation2] sm:$0xff] (!%p192_p3), %vm272_vm3, %v7798_v61  ;;  %274 = vst.msk [vmem:[#allocation2 + $0x8] sm:$0xff] (!%p192_p3), %vm272_vm3, %v7798_v61 }
   0xb   : > { %v2659_v16 = vand.u32 (!%p192_p3), %v7382_v14, %v2657_v15  ;;  %275 = vst.msk [vmem:[#allocation2 + $0x10] sm:$0xff] (!%p192_p3), %vm272_vm3, %v7798_v61  ;;  %276 = vst.msk [vmem:[#allocation2 + $0x18] sm:$0xff] (!%p192_p3), %vm272_vm3, %v7798_v61 }
   0xc   : > { %2664 = vmatpush1.bf16.msra.mxu0 (!%p192_p3), %v7374_v2  ;;  %7337 = vmatpush1.bf16.msra.mxu1 (!%p192_p3), %v7374_v2  ;;  %277 = vst.msk [vmem:[#allocation2 + $0x20] sm:$0xff] (!%p192_p3), %vm272_vm3, %v7798_v61  ;;  %278 = vst.msk [vmem:[#allocation2 + $0x28] sm:$0xff] (!%p192_p3), %vm272_vm3, %v7798_v61 }
   0xd   : > { %2665 = vmatprep.subr.bf16.mxu0 (!%p192_p3), %v7796_v1  ;;  %7328 = vmatprep.subr.bf16.mxu1 (!%p192_p3), %v7796_v1  ;;  %279 = vst.msk [vmem:[#allocation2 + $0x30] sm:$0xff] (!%p192_p3), %vm272_vm3, %v7798_v61  ;;  %280 = vst.msk [vmem:[#allocation2 + $0x38] sm:$0xff] (!%p192_p3), %vm272_vm3, %v7798_v61 }
   0xe   : > { %s9861_s22 = smov (!%p236_p4, %s6411_s22), 1023  ;;  %281 = vst.msk [vmem:[#allocation2 + $0x40] sm:$0xff] %vm272_vm3, %v7798_v61  ;;  %282 = vst.msk [vmem:[#allocation2 + $0x48] sm:$0xff] %vm272_vm3, %v7798_v61 }
   0xf   : > { %s7069_s25 = sshll.u32 %s9861_s22, 3  ;;  %283 = vst.msk [vmem:[#allocation2 + $0x50] sm:$0xff] %vm272_vm3, %v7798_v61  ;;  %284 = vst.msk [vmem:[#allocation2 + $0x58] sm:$0xff] %vm272_vm3, %v7798_v61  ;;  %s6415_s19 = sshll.u32 %s9861_s22, 2 }
  0x10   : > { %2666 = vmatpush1.bf16.msra.mxu0 %v7375_v3  ;;  %7338 = vmatpush1.bf16.msra.mxu1 %v7375_v3  ;;  %s7855_s28 = scalar_lea.vmem %s9852_s0, %s7069_s25  ;;  %285 = vst.msk [vmem:[#allocation2 + $0x60] sm:$0xff] %vm272_vm3, %v7798_v61  ;;  %286 = vst.msk [vmem:[#allocation2 + $0x68] sm:$0xff] %vm272_vm3, %v7798_v61  ;;  %s8596_s22 = scalar_lea.vmem %s9855_s3, %s6415_s19 }
  0x11   : > { %2667 = vmatprep.subr.bf16.mxu0 %v7796_v1  ;;  %7329 = vmatprep.subr.bf16.mxu1 %v7796_v1  ;;  %v7385_v6 = vld [vmem:[%s7855_s28 + $0x4] ss:$8 sps:$4 sm:$0xff]   ;;  %v7383_v17 = vld [vmem:[%s7855_s28] ss:$8 sps:$4 sm:$0xff]   ;;  %v7389_v19 = vld [vmem:[%s7855_s28 + $0x14] ss:$8 sps:$4 sm:$0xff]  }
  0x12   : > { %v7388_v7 = vld [vmem:[%s7855_s28 + $0x404] ss:$8 sps:$4 sm:$0xff]   ;;  %6682 = vmatprep.mubr.msk.bf16.mxu0 %vm2269_vm0, %v7385_v6  ;;  %v7386_v18 = vld [vmem:[%s7855_s28 + $0x400] ss:$8 sps:$4 sm:$0xff]   ;;  %v7391_v20 = vld [vmem:[%s7855_s28 + $0x414] ss:$8 sps:$4 sm:$0xff]  }
  0x13   : > { %6746 = vmatprep.mubr.msk.bf16.mxu1 %vm2269_vm0, %v7388_v7  ;;  %v7393_v21 = vld [vmem:[%s7855_s28 + $0x10] ss:$8 sps:$4 sm:$0xff]   ;;  %v7395_v23 = vld [vmem:[%s7855_s28 + $0x24] ss:$8 sps:$4 sm:$0xff]   ;;  %v7399_v25 = vld [vmem:[%s7855_s28 + $0x20] ss:$8 sps:$4 sm:$0xff]  }
  0x14   : > { %2668 = vmatpush1.bf16.msra.mxu0 %v7376_v4  ;;  %7339 = vmatpush1.bf16.msra.mxu1 %v7376_v4  ;;  %v7394_v22 = vld [vmem:[%s7855_s28 + $0x410] ss:$8 sps:$4 sm:$0xff]   ;;  %v7397_v24 = vld [vmem:[%s7855_s28 + $0x424] ss:$8 sps:$4 sm:$0xff]   ;;  %v7400_v26 = vld [vmem:[%s7855_s28 + $0x420] ss:$8 sps:$4 sm:$0xff]  }
  0x15   : > { %2669 = vmatprep.subr.bf16.mxu0 %v7796_v1  ;;  %7330 = vmatprep.subr.bf16.mxu1 %v7796_v1  ;;  %v7401_v27 = vld [vmem:[%s7855_s28 + $0x34] ss:$8 sps:$4 sm:$0xff]   ;;  %v7405_v29 = vld [vmem:[%s7855_s28 + $0x30] ss:$8 sps:$4 sm:$0xff]   ;;  %v7407_v31 = vld [vmem:[%s7855_s28 + $0x44] ss:$8 sps:$4 sm:$0xff]  }
  0x16   : > { %v7403_v28 = vld [vmem:[%s7855_s28 + $0x434] ss:$8 sps:$4 sm:$0xff]   ;;  %v7406_v30 = vld [vmem:[%s7855_s28 + $0x430] ss:$8 sps:$4 sm:$0xff]   ;;  %v7409_v32 = vld [vmem:[%s7855_s28 + $0x444] ss:$8 sps:$4 sm:$0xff]  }
  0x17   : > { %v7411_v33 = vld [vmem:[%s7855_s28 + $0x40] ss:$8 sps:$4 sm:$0xff]   ;;  %v7413_v35 = vld [vmem:[%s7855_s28 + $0x54] ss:$8 sps:$4 sm:$0xff]   ;;  %v7417_v37 = vld [vmem:[%s7855_s28 + $0x50] ss:$8 sps:$4 sm:$0xff]  }
  0x18   : > { %2670 = vmatpush1.bf16.msra.mxu0 %v7377_v5  ;;  %7340 = vmatpush1.bf16.msra.mxu1 %v7377_v5  ;;  %v7412_v34 = vld [vmem:[%s7855_s28 + $0x440] ss:$8 sps:$4 sm:$0xff]   ;;  %v7415_v36 = vld [vmem:[%s7855_s28 + $0x454] ss:$8 sps:$4 sm:$0xff]   ;;  %v7418_v38 = vld [vmem:[%s7855_s28 + $0x450] ss:$8 sps:$4 sm:$0xff]  }
  0x19   : > { %2671 = vmatprep.subr.bf16.mxu0 %v7796_v1  ;;  %7331 = vmatprep.subr.bf16.mxu1 %v7796_v1  ;;  %v7419_v39 = vld [vmem:[%s7855_s28 + $0x64] ss:$8 sps:$4 sm:$0xff]   ;;  %v7423_v41 = vld [vmem:[%s7855_s28 + $0x60] ss:$8 sps:$4 sm:$0xff]   ;;  %v7425_v43 = vld [vmem:[%s7855_s28 + $0x74] ss:$8 sps:$4 sm:$0xff]  }
  0x1a   : > { %v7421_v40 = vld [vmem:[%s7855_s28 + $0x464] ss:$8 sps:$4 sm:$0xff]   ;;  %v7424_v42 = vld [vmem:[%s7855_s28 + $0x460] ss:$8 sps:$4 sm:$0xff]   ;;  %v7427_v44 = vld [vmem:[%s7855_s28 + $0x474] ss:$8 sps:$4 sm:$0xff]  }
  0x1b   : > { %v7429_v45 = vld [vmem:[%s7855_s28 + $0x70] ss:$8 sps:$4 sm:$0xff]   ;;  %v7431_v47 = vld [vmem:[%s7855_s28 + $0x84] ss:$8 sps:$4 sm:$0xff]   ;;  %v7435_v49 = vld [vmem:[%s7855_s28 + $0x80] ss:$8 sps:$4 sm:$0xff]  }
  0x1c   : > { %2672 = vmatpush1.bf16.msra.mxu0 %v7378_v8  ;;  %7341 = vmatpush1.bf16.msra.mxu1 %v7378_v8  ;;  %v7430_v46 = vld [vmem:[%s7855_s28 + $0x470] ss:$8 sps:$4 sm:$0xff]   ;;  %v7433_v48 = vld [vmem:[%s7855_s28 + $0x484] ss:$8 sps:$4 sm:$0xff]   ;;  %v7436_v50 = vld [vmem:[%s7855_s28 + $0x480] ss:$8 sps:$4 sm:$0xff]  }
  0x1d   : > { %2673 = vmatprep.subr.bf16.mxu0 %v7796_v1  ;;  %7332 = vmatprep.subr.bf16.mxu1 %v7796_v1  ;;  %v7437_v51 = vld [vmem:[%s7855_s28 + $0x94] ss:$8 sps:$4 sm:$0xff]   ;;  %v7441_v53 = vld [vmem:[%s7855_s28 + $0x90] ss:$8 sps:$4 sm:$0xff]   ;;  %v7443_v55 = vld [vmem:[%s7855_s28 + $0xa4] ss:$8 sps:$4 sm:$0xff]  }
  0x1e   : > { %v7439_v52 = vld [vmem:[%s7855_s28 + $0x494] ss:$8 sps:$4 sm:$0xff]   ;;  %v7442_v54 = vld [vmem:[%s7855_s28 + $0x490] ss:$8 sps:$4 sm:$0xff]   ;;  %v7445_v56 = vld [vmem:[%s7855_s28 + $0x4a4] ss:$8 sps:$4 sm:$0xff]  }
  0x1f   : > { %v7940_v57 = vld [vmem:[%s7855_s28 + $0xa0] ss:$8 sps:$4 sm:$0xff]   ;;  %v7946_v59 = vld [vmem:[%s7855_s28 + $0xb4] ss:$8 sps:$4 sm:$0xff]   ;;  %287 = vst.msk [vmem:[#allocation2 + $0x70] sm:$0xff] %vm272_vm3, %v7798_v61  ;;  %288 = vst.msk [vmem:[#allocation2 + $0x78] sm:$0xff] %vm272_vm3, %v7798_v61 }
  0x20   : > { %2674 = vmatpush1.bf16.msra.mxu0 %v7379_v9  ;;  %7342 = vmatpush1.bf16.msra.mxu1 %v7379_v9  ;;  %v7943_v58 = vld [vmem:[%s7855_s28 + $0x4a0] ss:$8 sps:$4 sm:$0xff]   ;;  %v7949_v60 = vld [vmem:[%s7855_s28 + $0x4b4] ss:$8 sps:$4 sm:$0xff]   ;;  %289 = vst.msk [vmem:[#allocation2 + $0x80] sm:$0xff] %vm272_vm3, %v7798_v61  ;;  %290 = vst.msk [vmem:[#allocation2 + $0x88] sm:$0xff] %vm272_vm3, %v7798_v61 }
  0x21   : > { %2675 = vmatprep.subr.bf16.mxu0 %v7796_v1  ;;  %7333 = vmatprep.subr.bf16.mxu1 %v7796_v1  ;;  %291 = vst.msk [vmem:[#allocation2 + $0x90] sm:$0xff] %vm272_vm3, %v7798_v61  ;;  %292 = vst.msk [vmem:[#allocation2 + $0x98] sm:$0xff] %vm272_vm3, %v7798_v61  ;;  %v7453_v62 = vld [vmem:[%s7855_s28 + $0xb0] ss:$8 sps:$4 sm:$0xff]   ;;  %v7455_v0 = vld [vmem:[%s7855_s28 + $0xc4] ss:$8 sps:$4 sm:$0xff]  }
  0x22   : > { %293 = vst.msk [vmem:[#allocation2 + $0xa0] sm:$0xff] %vm272_vm3, %v7798_v61  ;;  %294 = vst.msk [vmem:[#allocation2 + $0xa8] sm:$0xff] %vm272_vm3, %v7798_v61  ;;  %v7454_v63 = vld [vmem:[%s7855_s28 + $0x4b0] ss:$8 sps:$4 sm:$0xff]   ;;  %v7459_v2 = vld [vmem:[%s7855_s28 + $0xc0] ss:$8 sps:$4 sm:$0xff]  }
  0x23   : > { %295 = vst.msk [vmem:[#allocation2 + $0xb0] sm:$0xff] %vm272_vm3, %v7798_v61  ;;  %296 = vst.msk [vmem:[#allocation2 + $0xb8] sm:$0xff] %vm272_vm3, %v7798_v61  ;;  %v7460_v3 = vld [vmem:[%s7855_s28 + $0x4c0] ss:$8 sps:$4 sm:$0xff]   ;;  %v7461_v4 = vld [vmem:[%s7855_s28 + $0xd4] ss:$8 sps:$4 sm:$0xff]  }
  0x24   : > { %2676 = vmatpush1.bf16.msra.mxu0 %v7380_v10  ;;  %7343 = vmatpush1.bf16.msra.mxu1 %v7380_v10  ;;  %297 = vst.msk [vmem:[#allocation2 + $0xc0] sm:$0xff] %vm272_vm3, %v7798_v61  ;;  %298 = vst.msk [vmem:[#allocation2 + $0xc8] sm:$0xff] %vm272_vm3, %v7798_v61  ;;  %v7463_v5 = vld [vmem:[%s7855_s28 + $0x4d4] ss:$8 sps:$4 sm:$0xff]   ;;  %v7465_v6 = vld [vmem:[%s7855_s28 + $0xd0] ss:$8 sps:$4 sm:$0xff]  }
  0x25   : > { %2677 = vmatprep.subr.bf16.mxu0 %v7796_v1  ;;  %7334 = vmatprep.subr.bf16.mxu1 %v7796_v1  ;;  %299 = vst.msk [vmem:[#allocation2 + $0xd0] sm:$0xff] %vm272_vm3, %v7798_v61  ;;  %300 = vst.msk [vmem:[#allocation2 + $0xd8] sm:$0xff] %vm272_vm3, %v7798_v61  ;;  %v7466_v7 = vld [vmem:[%s7855_s28 + $0x4d0] ss:$8 sps:$4 sm:$0xff]   ;;  %v7467_v8 = vld [vmem:[%s7855_s28 + $0xe4] ss:$8 sps:$4 sm:$0xff]  }
  0x26   : > { %301 = vst.msk [vmem:[#allocation2 + $0xe0] sm:$0xff] %vm272_vm3, %v7798_v61  ;;  %302 = vst.msk [vmem:[#allocation2 + $0xe8] sm:$0xff] %vm272_vm3, %v7798_v61  ;;  %v7469_v9 = vld [vmem:[%s7855_s28 + $0x4e4] ss:$8 sps:$4 sm:$0xff]   ;;  %v7471_v10 = vld [vmem:[%s7855_s28 + $0xe0] ss:$8 sps:$4 sm:$0xff]  }
  0x27   : > { %303 = vst.msk [vmem:[#allocation2 + $0xf0] sm:$0xff] %vm272_vm3, %v7798_v61  ;;  %304 = vst.msk [vmem:[#allocation2 + $0xf8] sm:$0xff] %vm272_vm3, %v7798_v61  ;;  %v7472_v11 = vld [vmem:[%s7855_s28 + $0x4e0] ss:$8 sps:$4 sm:$0xff]   ;;  %v7473_v12 = vld [vmem:[%s7855_s28 + $0xf4] ss:$8 sps:$4 sm:$0xff]  }
  0x28   : > { %2678 = vmatpush1.bf16.msra.mxu0 %v7381_v13  ;;  %7344 = vmatpush1.bf16.msra.mxu1 %v7381_v13  ;;  %305 = vst.msk [vmem:[#allocation2 + $0x100] sm:$0xff] %vm272_vm3, %v7798_v61  ;;  %306 = vst.msk [vmem:[#allocation2 + $0x108] sm:$0xff] %vm272_vm3, %v7798_v61  ;;  %v7475_v13 = vld [vmem:[%s7855_s28 + $0x4f4] ss:$8 sps:$4 sm:$0xff]   ;;  %v7477_v14 = vld [vmem:[%s7855_s28 + $0xf0] ss:$8 sps:$4 sm:$0xff]  }
  0x29   : > { %2679 = vmatprep.subr.bf16.mxu0 %v7796_v1  ;;  %7335 = vmatprep.subr.bf16.mxu1 %v7796_v1  ;;  %307 = vst.msk [vmem:[#allocation2 + $0x110] sm:$0xff] %vm272_vm3, %v7798_v61  ;;  %308 = vst.msk [vmem:[#allocation2 + $0x118] sm:$0xff] %vm272_vm3, %v7798_v61  ;;  %v7457_v1 = vld [vmem:[%s7855_s28 + $0x4c4] ss:$8 sps:$4 sm:$0xff]   ;;  %v7478_v15 = vld [vmem:[%s7855_s28 + $0x4f0] ss:$8 sps:$4 sm:$0xff]  }
  0x2a   : > { %309 = vst.msk [vmem:[#allocation2 + $0x120] sm:$0xff] %vm272_vm3, %v7798_v61  ;;  %310 = vst.msk [vmem:[#allocation2 + $0x128] sm:$0xff] %vm272_vm3, %v7798_v61 }
  0x2b   : > { %311 = vst.msk [vmem:[#allocation2 + $0x130] sm:$0xff] %vm272_vm3, %v7798_v61  ;;  %312 = vst.msk [vmem:[#allocation2 + $0x138] sm:$0xff] %vm272_vm3, %v7798_v61 }
  0x2c   : > { %2680 = vmatpush1.bf16.msra.mxu0 %v2659_v16  ;;  %7345 = vmatpush1.bf16.msra.mxu1 %v2659_v16  ;;  %313 = vst.msk [vmem:[#allocation2 + $0x140] sm:$0xff] %vm272_vm3, %v7798_v61  ;;  %314 = vst.msk [vmem:[#allocation2 + $0x148] sm:$0xff] %vm272_vm3, %v7798_v61  ;;  %v7479_v16 = vld [vmem:[%s7855_s28 + $0x104] ss:$8 sps:$4 sm:$0xff]  }
  0x2d   : > { %315 = vst.msk [vmem:[#allocation2 + $0x150] sm:$0xff] %vm272_vm3, %v7798_v61  ;;  %316 = vst.msk [vmem:[#allocation2 + $0x158] sm:$0xff] %vm272_vm3, %v7798_v61 }
  0x2e   : > { %317 = vst.msk [vmem:[#allocation2 + $0x160] sm:$0xff] %vm272_vm3, %v7798_v61  ;;  %318 = vst.msk [vmem:[#allocation2 + $0x168] sm:$0xff] %vm272_vm3, %v7798_v61 }
  0x2f   : > { %2694 = vmatmul.mubr.bf16.vlgmr.msra.gmra.mrb[0].mxu0 %v7383_v17  ;;  %3206 = vmatmul.mubr.bf16.vlgmr.msra.gmra.mrb[0].mxu1 %v7386_v18  ;;  %319 = vst.msk [vmem:[#allocation2 + $0x170] sm:$0xff] %vm272_vm3, %v7798_v61  ;;  %320 = vst.msk [vmem:[#allocation2 + $0x178] sm:$0xff] %vm272_vm3, %v7798_v61  ;;  %v7481_v17 = vld [vmem:[%s7855_s28 + $0x504] ss:$8 sps:$4 sm:$0xff]   ;;  %v7483_v18 = vld [vmem:[%s7855_s28 + $0x100] ss:$8 sps:$4 sm:$0xff]  }
  0x30   : > { %6683 = vmatprep.mubr.msk.bf16.mxu0 %vm2269_vm0, %v7389_v19  ;;  %6747 = vmatprep.mubr.msk.bf16.mxu1 %vm2269_vm0, %v7391_v20  ;;  %321 = vst.msk [vmem:[#allocation2 + $0x180] sm:$0xff] %vm272_vm3, %v7798_v61  ;;  %322 = vst.msk [vmem:[#allocation2 + $0x188] sm:$0xff] %vm272_vm3, %v7798_v61  ;;  %v7484_v19 = vld [vmem:[%s7855_s28 + $0x500] ss:$8 sps:$4 sm:$0xff]   ;;  %v7485_v20 = vld [vmem:[%s7855_s28 + $0x114] ss:$8 sps:$4 sm:$0xff]  }
  0x31   : > { %323 = vst.msk [vmem:[#allocation2 + $0x190] sm:$0xff] %vm272_vm3, %v7798_v61  ;;  %324 = vst.msk [vmem:[#allocation2 + $0x198] sm:$0xff] %vm272_vm3, %v7798_v61 }
  0x32   : > { %325 = vst.msk [vmem:[#allocation2 + $0x1a0] sm:$0xff] %vm272_vm3, %v7798_v61  ;;  %326 = vst.msk [vmem:[#allocation2 + $0x1a8] sm:$0xff] %vm272_vm3, %v7798_v61 }
  0x33   : > { %327 = vst.msk [vmem:[#allocation2 + $0x1b0] sm:$0xff] %vm272_vm3, %v7798_v61  ;;  %328 = vst.msk [vmem:[#allocation2 + $0x1b8] sm:$0xff] %vm272_vm3, %v7798_v61 }
  0x34   : > { %329 = vst.msk [vmem:[#allocation2 + $0x1c0] sm:$0xff] %vm272_vm3, %v7798_v61  ;;  %330 = vst.msk [vmem:[#allocation2 + $0x1c8] sm:$0xff] %vm272_vm3, %v7798_v61 }
  0x35   : > { %331 = vst.msk [vmem:[#allocation2 + $0x1d0] sm:$0xff] %vm272_vm3, %v7798_v61  ;;  %332 = vst.msk [vmem:[#allocation2 + $0x1d8] sm:$0xff] %vm272_vm3, %v7798_v61 }
  0x36   : > { %333 = vst.msk [vmem:[#allocation2 + $0x1e0] sm:$0xff] %vm272_vm3, %v7798_v61  ;;  %334 = vst.msk [vmem:[#allocation2 + $0x1e8] sm:$0xff] %vm272_vm3, %v7798_v61 }
  0x37   : > { %2702 = vmatmul.mubr.bf16.gmra.mrb[4].mxu0 %v7393_v21  ;;  %3214 = vmatmul.mubr.bf16.gmra.mrb[4].mxu1 %v7394_v22  ;;  %335 = vst.msk [vmem:[#allocation2 + $0x1f0] sm:$0xff] %vm272_vm3, %v7798_v61  ;;  %336 = vst.msk [vmem:[#allocation2 + $0x1f8] sm:$0xff] %vm272_vm3, %v7798_v61  ;;  %v7487_v21 = vld [vmem:[%s7855_s28 + $0x514] ss:$8 sps:$4 sm:$0xff]   ;;  %v7489_v22 = vld [vmem:[%s7855_s28 + $0x110] ss:$8 sps:$4 sm:$0xff]  }
  0x38   : > { %6684 = vmatprep.mubr.msk.bf16.mxu0 %vm2269_vm0, %v7395_v23  ;;  %6748 = vmatprep.mubr.msk.bf16.mxu1 %vm2269_vm0, %v7397_v24  ;;  %337 = vst.msk [vmem:[#allocation2 + $0x200] sm:$0xff] %vm272_vm3, %v7798_v61  ;;  %338 = vst.msk [vmem:[#allocation2 + $0x208] sm:$0xff] %vm272_vm3, %v7798_v61  ;;  %v7490_v23 = vld [vmem:[%s7855_s28 + $0x510] ss:$8 sps:$4 sm:$0xff]   ;;  %v7491_v24 = vld [vmem:[%s7855_s28 + $0x124] ss:$8 sps:$4 sm:$0xff]  }
  0x39   : > { %339 = vst.msk [vmem:[#allocation2 + $0x210] sm:$0xff] %vm272_vm3, %v7798_v61  ;;  %340 = vst.msk [vmem:[#allocation2 + $0x218] sm:$0xff] %vm272_vm3, %v7798_v61 }
  0x3a   : > { %341 = vst.msk [vmem:[#allocation2 + $0x220] sm:$0xff] %vm272_vm3, %v7798_v61  ;;  %342 = vst.msk [vmem:[#allocation2 + $0x228] sm:$0xff] %vm272_vm3, %v7798_v61 }
  0x3b   : > { %343 = vst.msk [vmem:[#allocation2 + $0x230] sm:$0xff] %vm272_vm3, %v7798_v61  ;;  %344 = vst.msk [vmem:[#allocation2 + $0x238] sm:$0xff] %vm272_vm3, %v7798_v61 }
  0x3c   : > { %345 = vst.msk [vmem:[#allocation2 + $0x240] sm:$0xff] %vm272_vm3, %v7798_v61  ;;  %346 = vst.msk [vmem:[#allocation2 + $0x248] sm:$0xff] %vm272_vm3, %v7798_v61 }
  0x3d   : > { %347 = vst.msk [vmem:[#allocation2 + $0x250] sm:$0xff] %vm272_vm3, %v7798_v61  ;;  %348 = vst.msk [vmem:[#allocation2 + $0x258] sm:$0xff] %vm272_vm3, %v7798_v61 }
  0x3e   : > { %349 = vst.msk [vmem:[#allocation2 + $0x260] sm:$0xff] %vm272_vm3, %v7798_v61  ;;  %350 = vst.msk [vmem:[#allocation2 + $0x268] sm:$0xff] %vm272_vm3, %v7798_v61 }
  0x3f   : > { %2710 = vmatmul.mubr.bf16.gmra.mrb[8].mxu0 %v7399_v25  ;;  %3222 = vmatmul.mubr.bf16.gmra.mrb[8].mxu1 %v7400_v26  ;;  %351 = vst.msk [vmem:[#allocation2 + $0x270] sm:$0xff] %vm272_vm3, %v7798_v61  ;;  %352 = vst.msk [vmem:[#allocation2 + $0x278] sm:$0xff] %vm272_vm3, %v7798_v61  ;;  %v7493_v25 = vld [vmem:[%s7855_s28 + $0x524] ss:$8 sps:$4 sm:$0xff]   ;;  %v7495_v26 = vld [vmem:[%s7855_s28 + $0x120] ss:$8 sps:$4 sm:$0xff]  }
  0x40   : > { %6685 = vmatprep.mubr.msk.bf16.mxu0 %vm2269_vm0, %v7401_v27  ;;  %6749 = vmatprep.mubr.msk.bf16.mxu1 %vm2269_vm0, %v7403_v28  ;;  %353 = vst.msk [vmem:[#allocation2 + $0x280] sm:$0xff] %vm272_vm3, %v7798_v61  ;;  %354 = vst.msk [vmem:[#allocation2 + $0x288] sm:$0xff] %vm272_vm3, %v7798_v61  ;;  %v7496_v27 = vld [vmem:[%s7855_s28 + $0x520] ss:$8 sps:$4 sm:$0xff]   ;;  %v7497_v28 = vld [vmem:[%s7855_s28 + $0x134] ss:$8 sps:$4 sm:$0xff]  }
  0x41   : > { %355 = vst.msk [vmem:[#allocation2 + $0x290] sm:$0xff] %vm272_vm3, %v7798_v61  ;;  %356 = vst.msk [vmem:[#allocation2 + $0x298] sm:$0xff] %vm272_vm3, %v7798_v61 }
  0x42   : > { %357 = vst.msk [vmem:[#allocation2 + $0x2a0] sm:$0xff] %vm272_vm3, %v7798_v61  ;;  %358 = vst.msk [vmem:[#allocation2 + $0x2a8] sm:$0xff] %vm272_vm3, %v7798_v61 }
  0x43   : > { %359 = vst.msk [vmem:[#allocation2 + $0x2b0] sm:$0xff] %vm272_vm3, %v7798_v61  ;;  %360 = vst.msk [vmem:[#allocation2 + $0x2b8] sm:$0xff] %vm272_vm3, %v7798_v61 }
  0x44   : > { %361 = vst.msk [vmem:[#allocation2 + $0x2c0] sm:$0xff] %vm272_vm3, %v7798_v61  ;;  %362 = vst.msk [vmem:[#allocation2 + $0x2c8] sm:$0xff] %vm272_vm3, %v7798_v61 }
  0x45   : > { %363 = vst.msk [vmem:[#allocation2 + $0x2d0] sm:$0xff] %vm272_vm3, %v7798_v61  ;;  %364 = vst.msk [vmem:[#allocation2 + $0x2d8] sm:$0xff] %vm272_vm3, %v7798_v61 }
  0x46   : > { %365 = vst.msk [vmem:[#allocation2 + $0x2e0] sm:$0xff] %vm272_vm3, %v7798_v61  ;;  %366 = vst.msk [vmem:[#allocation2 + $0x2e8] sm:$0xff] %vm272_vm3, %v7798_v61 }
  0x47   : > { %2718 = vmatmul.mubr.bf16.gmra.mrb[12].mxu0 %v7405_v29  ;;  %3230 = vmatmul.mubr.bf16.gmra.mrb[12].mxu1 %v7406_v30  ;;  %367 = vst.msk [vmem:[#allocation2 + $0x2f0] sm:$0xff] %vm272_vm3, %v7798_v61  ;;  %368 = vst.msk [vmem:[#allocation2 + $0x2f8] sm:$0xff] %vm272_vm3, %v7798_v61  ;;  %v7499_v29 = vld [vmem:[%s7855_s28 + $0x534] ss:$8 sps:$4 sm:$0xff]   ;;  %v7501_v30 = vld [vmem:[%s7855_s28 + $0x130] ss:$8 sps:$4 sm:$0xff]  }
  0x48   : > { %6686 = vmatprep.mubr.msk.bf16.mxu0 %vm2269_vm0, %v7407_v31  ;;  %6750 = vmatprep.mubr.msk.bf16.mxu1 %vm2269_vm0, %v7409_v32  ;;  %369 = vst.msk [vmem:[#allocation2 + $0x300] sm:$0xff] %vm272_vm3, %v7798_v61  ;;  %370 = vst.msk [vmem:[#allocation2 + $0x308] sm:$0xff] %vm272_vm3, %v7798_v61  ;;  %v7502_v31 = vld [vmem:[%s7855_s28 + $0x530] ss:$8 sps:$4 sm:$0xff]   ;;  %v7503_v32 = vld [vmem:[%s7855_s28 + $0x144] ss:$8 sps:$4 sm:$0xff]  }
  0x49   : > { %371 = vst.msk [vmem:[#allocation2 + $0x310] sm:$0xff] %vm272_vm3, %v7798_v61  ;;  %372 = vst.msk [vmem:[#allocation2 + $0x318] sm:$0xff] %vm272_vm3, %v7798_v61 }
  0x4a   : > { %373 = vst.msk [vmem:[#allocation2 + $0x320] sm:$0xff] %vm272_vm3, %v7798_v61  ;;  %374 = vst.msk [vmem:[#allocation2 + $0x328] sm:$0xff] %vm272_vm3, %v7798_v61 }
  0x4b   : > { %375 = vst.msk [vmem:[#allocation2 + $0x330] sm:$0xff] %vm272_vm3, %v7798_v61  ;;  %376 = vst.msk [vmem:[#allocation2 + $0x338] sm:$0xff] %vm272_vm3, %v7798_v61 }
  0x4c   : > { %377 = vst.msk [vmem:[#allocation2 + $0x340] sm:$0xff] %vm272_vm3, %v7798_v61  ;;  %378 = vst.msk [vmem:[#allocation2 + $0x348] sm:$0xff] %vm272_vm3, %v7798_v61 }
  0x4d   : > { %379 = vst.msk [vmem:[#allocation2 + $0x350] sm:$0xff] %vm272_vm3, %v7798_v61  ;;  %380 = vst.msk [vmem:[#allocation2 + $0x358] sm:$0xff] %vm272_vm3, %v7798_v61 }
  0x4e   : > { %381 = vst.msk [vmem:[#allocation2 + $0x360] sm:$0xff] %vm272_vm3, %v7798_v61  ;;  %382 = vst.msk [vmem:[#allocation2 + $0x368] sm:$0xff] %vm272_vm3, %v7798_v61 }
  0x4f   : > { %2726 = vmatmul.mubr.bf16.gmra.mrb[16].mxu0 %v7411_v33  ;;  %3238 = vmatmul.mubr.bf16.gmra.mrb[16].mxu1 %v7412_v34  ;;  %383 = vst.msk [vmem:[#allocation2 + $0x370] sm:$0xff] %vm272_vm3, %v7798_v61  ;;  %384 = vst.msk [vmem:[#allocation2 + $0x378] sm:$0xff] %vm272_vm3, %v7798_v61  ;;  %v7505_v33 = vld [vmem:[%s7855_s28 + $0x544] ss:$8 sps:$4 sm:$0xff]   ;;  %v7507_v34 = vld [vmem:[%s7855_s28 + $0x140] ss:$8 sps:$4 sm:$0xff]  }
  0x50   : > { %6687 = vmatprep.mubr.msk.bf16.mxu0 %vm2269_vm0, %v7413_v35  ;;  %6751 = vmatprep.mubr.msk.bf16.mxu1 %vm2269_vm0, %v7415_v36  ;;  %385 = vst.msk [vmem:[#allocation2 + $0x380] sm:$0xff] %vm272_vm3, %v7798_v61  ;;  %386 = vst.msk [vmem:[#allocation2 + $0x388] sm:$0xff] %vm272_vm3, %v7798_v61  ;;  %v7508_v35 = vld [vmem:[%s7855_s28 + $0x540] ss:$8 sps:$4 sm:$0xff]   ;;  %v7509_v36 = vld [vmem:[%s7855_s28 + $0x154] ss:$8 sps:$4 sm:$0xff]  }
  0x51   : > { %387 = vst.msk [vmem:[#allocation2 + $0x390] sm:$0xff] %vm272_vm3, %v7798_v61  ;;  %388 = vst.msk [vmem:[#allocation2 + $0x398] sm:$0xff] %vm272_vm3, %v7798_v61 }
  0x52   : > { %389 = vst.msk [vmem:[#allocation2 + $0x3a0] sm:$0xff] %vm272_vm3, %v7798_v61  ;;  %390 = vst.msk [vmem:[#allocation2 + $0x3a8] sm:$0xff] %vm272_vm3, %v7798_v61 }
  0x53   : > { %391 = vst.msk [vmem:[#allocation2 + $0x3b0] sm:$0xff] %vm272_vm3, %v7798_v61  ;;  %392 = vst.msk [vmem:[#allocation2 + $0x3b8] sm:$0xff] %vm272_vm3, %v7798_v61 }
  0x54   : > { %393 = vst.msk [vmem:[#allocation2 + $0x3c0] sm:$0xff] %vm272_vm3, %v7798_v61  ;;  %394 = vst.msk [vmem:[#allocation2 + $0x3c8] sm:$0xff] %vm272_vm3, %v7798_v61 }
  0x55   : > { %395 = vst.msk [vmem:[#allocation2 + $0x3d0] sm:$0xff] %vm272_vm3, %v7798_v61  ;;  %396 = vst.msk [vmem:[#allocation2 + $0x3d8] sm:$0xff] %vm272_vm3, %v7798_v61 }
  0x56   : > { %397 = vst.msk [vmem:[#allocation2 + $0x3e0] sm:$0xff] %vm272_vm3, %v7798_v61  ;;  %398 = vst.msk [vmem:[#allocation2 + $0x3e8] sm:$0xff] %vm272_vm3, %v7798_v61 }
  0x57   : > { %2734 = vmatmul.mubr.bf16.gmra.mrb[20].mxu0 %v7417_v37  ;;  %3246 = vmatmul.mubr.bf16.gmra.mrb[20].mxu1 %v7418_v38  ;;  %399 = vst.msk [vmem:[#allocation2 + $0x3f0] sm:$0xff] %vm272_vm3, %v7798_v61  ;;  %400 = vst.msk [vmem:[#allocation2 + $0x3f8] sm:$0xff] %vm272_vm3, %v7798_v61  ;;  %v7511_v37 = vld [vmem:[%s7855_s28 + $0x554] ss:$8 sps:$4 sm:$0xff]   ;;  %v7513_v38 = vld [vmem:[%s7855_s28 + $0x150] ss:$8 sps:$4 sm:$0xff]  }
  0x58   : > { %6688 = vmatprep.mubr.msk.bf16.mxu0 %vm2269_vm0, %v7419_v39  ;;  %6752 = vmatprep.mubr.msk.bf16.mxu1 %vm2269_vm0, %v7421_v40  ;;  %401 = vst.msk [vmem:[#allocation2 + $0x400] sm:$0xff] %vm272_vm3, %v7798_v61  ;;  %402 = vst.msk [vmem:[#allocation2 + $0x408] sm:$0xff] %vm272_vm3, %v7798_v61  ;;  %v7514_v39 = vld [vmem:[%s7855_s28 + $0x550] ss:$8 sps:$4 sm:$0xff]   ;;  %v7515_v40 = vld [vmem:[%s7855_s28 + $0x164] ss:$8 sps:$4 sm:$0xff]  }
  0x59   : > { %403 = vst.msk [vmem:[#allocation2 + $0x410] sm:$0xff] %vm272_vm3, %v7798_v61  ;;  %404 = vst.msk [vmem:[#allocation2 + $0x418] sm:$0xff] %vm272_vm3, %v7798_v61 }
  0x5a   : > { %405 = vst.msk [vmem:[#allocation2 + $0x420] sm:$0xff] %vm272_vm3, %v7798_v61  ;;  %406 = vst.msk [vmem:[#allocation2 + $0x428] sm:$0xff] %vm272_vm3, %v7798_v61 }
  0x5b   : > { %407 = vst.msk [vmem:[#allocation2 + $0x430] sm:$0xff] %vm272_vm3, %v7798_v61  ;;  %408 = vst.msk [vmem:[#allocation2 + $0x438] sm:$0xff] %vm272_vm3, %v7798_v61 }
  0x5c   : > { %409 = vst.msk [vmem:[#allocation2 + $0x440] sm:$0xff] %vm272_vm3, %v7798_v61  ;;  %410 = vst.msk [vmem:[#allocation2 + $0x448] sm:$0xff] %vm272_vm3, %v7798_v61 }
  0x5d   : > { %411 = vst.msk [vmem:[#allocation2 + $0x450] sm:$0xff] %vm272_vm3, %v7798_v61  ;;  %412 = vst.msk [vmem:[#allocation2 + $0x458] sm:$0xff] %vm272_vm3, %v7798_v61 }
  0x5e   : > { %413 = vst.msk [vmem:[#allocation2 + $0x460] sm:$0xff] %vm272_vm3, %v7798_v61  ;;  %414 = vst.msk [vmem:[#allocation2 + $0x468] sm:$0xff] %vm272_vm3, %v7798_v61 }
  0x5f   : > { %2742 = vmatmul.mubr.bf16.gmra.mrb[24].mxu0 %v7423_v41  ;;  %3254 = vmatmul.mubr.bf16.gmra.mrb[24].mxu1 %v7424_v42  ;;  %415 = vst.msk [vmem:[#allocation2 + $0x470] sm:$0xff] %vm272_vm3, %v7798_v61  ;;  %416 = vst.msk [vmem:[#allocation2 + $0x478] sm:$0xff] %vm272_vm3, %v7798_v61  ;;  %v7517_v41 = vld [vmem:[%s7855_s28 + $0x564] ss:$8 sps:$4 sm:$0xff]   ;;  %v7519_v42 = vld [vmem:[%s7855_s28 + $0x160] ss:$8 sps:$4 sm:$0xff]  }
  0x60   : > { %6689 = vmatprep.mubr.msk.bf16.mxu0 %vm2269_vm0, %v7425_v43  ;;  %6753 = vmatprep.mubr.msk.bf16.mxu1 %vm2269_vm0, %v7427_v44  ;;  %417 = vst.msk [vmem:[#allocation2 + $0x480] sm:$0xff] %vm272_vm3, %v7798_v61  ;;  %418 = vst.msk [vmem:[#allocation2 + $0x488] sm:$0xff] %vm272_vm3, %v7798_v61  ;;  %v7520_v43 = vld [vmem:[%s7855_s28 + $0x560] ss:$8 sps:$4 sm:$0xff]   ;;  %v7521_v44 = vld [vmem:[%s7855_s28 + $0x174] ss:$8 sps:$4 sm:$0xff]  }
  0x61   : > { %419 = vst.msk [vmem:[#allocation2 + $0x490] sm:$0xff] %vm272_vm3, %v7798_v61  ;;  %420 = vst.msk [vmem:[#allocation2 + $0x498] sm:$0xff] %vm272_vm3, %v7798_v61 }
  0x62   : > { %421 = vst.msk [vmem:[#allocation2 + $0x4a0] sm:$0xff] %vm272_vm3, %v7798_v61  ;;  %422 = vst.msk [vmem:[#allocation2 + $0x4a8] sm:$0xff] %vm272_vm3, %v7798_v61 }
  0x63   : > { %423 = vst.msk [vmem:[#allocation2 + $0x4b0] sm:$0xff] %vm272_vm3, %v7798_v61  ;;  %424 = vst.msk [vmem:[#allocation2 + $0x4b8] sm:$0xff] %vm272_vm3, %v7798_v61 }
  0x64   : > { %425 = vst.msk [vmem:[#allocation2 + $0x4c0] sm:$0xff] %vm272_vm3, %v7798_v61  ;;  %426 = vst.msk [vmem:[#allocation2 + $0x4c8] sm:$0xff] %vm272_vm3, %v7798_v61 }
  0x65   : > { %427 = vst.msk [vmem:[#allocation2 + $0x4d0] sm:$0xff] %vm272_vm3, %v7798_v61  ;;  %428 = vst.msk [vmem:[#allocation2 + $0x4d8] sm:$0xff] %vm272_vm3, %v7798_v61 }
  0x66   : > { %429 = vst.msk [vmem:[#allocation2 + $0x4e0] sm:$0xff] %vm272_vm3, %v7798_v61  ;;  %430 = vst.msk [vmem:[#allocation2 + $0x4e8] sm:$0xff] %vm272_vm3, %v7798_v61 }
  0x67   : > { %2750 = vmatmul.mubr.bf16.gmra.mrb[28].mxu0 %v7429_v45  ;;  %3262 = vmatmul.mubr.bf16.gmra.mrb[28].mxu1 %v7430_v46  ;;  %431 = vst.msk [vmem:[#allocation2 + $0x4f0] sm:$0xff] %vm272_vm3, %v7798_v61  ;;  %432 = vst.msk [vmem:[#allocation2 + $0x4f8] sm:$0xff] %vm272_vm3, %v7798_v61  ;;  %v7523_v45 = vld [vmem:[%s7855_s28 + $0x574] ss:$8 sps:$4 sm:$0xff]   ;;  %v7525_v46 = vld [vmem:[%s7855_s28 + $0x170] ss:$8 sps:$4 sm:$0xff]  }
  0x68   : > { %6690 = vmatprep.mubr.msk.bf16.mxu0 %vm2269_vm0, %v7431_v47  ;;  %6754 = vmatprep.mubr.msk.bf16.mxu1 %vm2269_vm0, %v7433_v48  ;;  %433 = vst.msk [vmem:[#allocation2 + $0x500] sm:$0xff] %vm272_vm3, %v7798_v61  ;;  %434 = vst.msk [vmem:[#allocation2 + $0x508] sm:$0xff] %vm272_vm3, %v7798_v61  ;;  %v7526_v47 = vld [vmem:[%s7855_s28 + $0x570] ss:$8 sps:$4 sm:$0xff]   ;;  %v7527_v48 = vld [vmem:[%s7855_s28 + $0x184] ss:$8 sps:$4 sm:$0xff]  }
  0x69   : > { %435 = vst.msk [vmem:[#allocation2 + $0x510] sm:$0xff] %vm272_vm3, %v7798_v61  ;;  %436 = vst.msk [vmem:[#allocation2 + $0x518] sm:$0xff] %vm272_vm3, %v7798_v61 }
  0x6a   : > { %437 = vst.msk [vmem:[#allocation2 + $0x520] sm:$0xff] %vm272_vm3, %v7798_v61  ;;  %438 = vst.msk [vmem:[#allocation2 + $0x528] sm:$0xff] %vm272_vm3, %v7798_v61 }
  0x6b   : > { %439 = vst.msk [vmem:[#allocation2 + $0x530] sm:$0xff] %vm272_vm3, %v7798_v61  ;;  %440 = vst.msk [vmem:[#allocation2 + $0x538] sm:$0xff] %vm272_vm3, %v7798_v61 }
  0x6c   : > { %441 = vst.msk [vmem:[#allocation2 + $0x540] sm:$0xff] %vm272_vm3, %v7798_v61  ;;  %442 = vst.msk [vmem:[#allocation2 + $0x548] sm:$0xff] %vm272_vm3, %v7798_v61 }
  0x6d   : > { %443 = vst.msk [vmem:[#allocation2 + $0x550] sm:$0xff] %vm272_vm3, %v7798_v61  ;;  %444 = vst.msk [vmem:[#allocation2 + $0x558] sm:$0xff] %vm272_vm3, %v7798_v61 }
  0x6e   : > { %445 = vst.msk [vmem:[#allocation2 + $0x560] sm:$0xff] %vm272_vm3, %v7798_v61  ;;  %446 = vst.msk [vmem:[#allocation2 + $0x568] sm:$0xff] %vm272_vm3, %v7798_v61 }
  0x6f   : > { %2758 = vmatmul.mubr.bf16.gmra.mrb[32].mxu0 %v7435_v49  ;;  %3270 = vmatmul.mubr.bf16.gmra.mrb[32].mxu1 %v7436_v50  ;;  %447 = vst.msk [vmem:[#allocation2 + $0x570] sm:$0xff] %vm272_vm3, %v7798_v61  ;;  %448 = vst.msk [vmem:[#allocation2 + $0x578] sm:$0xff] %vm272_vm3, %v7798_v61  ;;  %v7529_v49 = vld [vmem:[%s7855_s28 + $0x584] ss:$8 sps:$4 sm:$0xff]   ;;  %v7531_v50 = vld [vmem:[%s7855_s28 + $0x180] ss:$8 sps:$4 sm:$0xff]  }
  0x70   : > { %6691 = vmatprep.mubr.msk.bf16.mxu0 %vm2269_vm0, %v7437_v51  ;;  %6755 = vmatprep.mubr.msk.bf16.mxu1 %vm2269_vm0, %v7439_v52  ;;  %449 = vst.msk [vmem:[#allocation2 + $0x580] sm:$0xff] %vm272_vm3, %v7798_v61  ;;  %450 = vst.msk [vmem:[#allocation2 + $0x588] sm:$0xff] %vm272_vm3, %v7798_v61  ;;  %v7532_v51 = vld [vmem:[%s7855_s28 + $0x580] ss:$8 sps:$4 sm:$0xff]   ;;  %v7533_v52 = vld [vmem:[%s7855_s28 + $0x194] ss:$8 sps:$4 sm:$0xff]  }
  0x71   : > { %451 = vst.msk [vmem:[#allocation2 + $0x590] sm:$0xff] %vm272_vm3, %v7798_v61  ;;  %452 = vst.msk [vmem:[#allocation2 + $0x598] sm:$0xff] %vm272_vm3, %v7798_v61 }
  0x72   : > { %453 = vst.msk [vmem:[#allocation2 + $0x5a0] sm:$0xff] %vm272_vm3, %v7798_v61  ;;  %454 = vst.msk [vmem:[#allocation2 + $0x5a8] sm:$0xff] %vm272_vm3, %v7798_v61 }
  0x73   : > { %455 = vst.msk [vmem:[#allocation2 + $0x5b0] sm:$0xff] %vm272_vm3, %v7798_v61  ;;  %456 = vst.msk [vmem:[#allocation2 + $0x5b8] sm:$0xff] %vm272_vm3, %v7798_v61 }
  0x74   : > { %457 = vst.msk [vmem:[#allocation2 + $0x5c0] sm:$0xff] %vm272_vm3, %v7798_v61  ;;  %458 = vst.msk [vmem:[#allocation2 + $0x5c8] sm:$0xff] %vm272_vm3, %v7798_v61 }
  0x75   : > { %459 = vst.msk [vmem:[#allocation2 + $0x5d0] sm:$0xff] %vm272_vm3, %v7798_v61  ;;  %460 = vst.msk [vmem:[#allocation2 + $0x5d8] sm:$0xff] %vm272_vm3, %v7798_v61 }
  0x76   : > { %461 = vst.msk [vmem:[#allocation2 + $0x5e0] sm:$0xff] %vm272_vm3, %v7798_v61  ;;  %462 = vst.msk [vmem:[#allocation2 + $0x5e8] sm:$0xff] %vm272_vm3, %v7798_v61 }
  0x77   : > { %2766 = vmatmul.mubr.bf16.gmra.mrb[36].mxu0 %v7441_v53  ;;  %3278 = vmatmul.mubr.bf16.gmra.mrb[36].mxu1 %v7442_v54  ;;  %463 = vst.msk [vmem:[#allocation2 + $0x5f0] sm:$0xff] %vm272_vm3, %v7798_v61  ;;  %464 = vst.msk [vmem:[#allocation2 + $0x5f8] sm:$0xff] %vm272_vm3, %v7798_v61  ;;  %v7535_v53 = vld [vmem:[%s7855_s28 + $0x594] ss:$8 sps:$4 sm:$0xff]   ;;  %v7537_v54 = vld [vmem:[%s7855_s28 + $0x190] ss:$8 sps:$4 sm:$0xff]  }
  0x78   : > { %6692 = vmatprep.mubr.msk.bf16.mxu0 %vm2269_vm0, %v7443_v55  ;;  %6756 = vmatprep.mubr.msk.bf16.mxu1 %vm2269_vm0, %v7445_v56  ;;  %465 = vst.msk [vmem:[#allocation2 + $0x600] sm:$0xff] %vm272_vm3, %v7798_v61  ;;  %466 = vst.msk [vmem:[#allocation2 + $0x608] sm:$0xff] %vm272_vm3, %v7798_v61  ;;  %v7538_v55 = vld [vmem:[%s7855_s28 + $0x590] ss:$8 sps:$4 sm:$0xff]   ;;  %v7539_v56 = vld [vmem:[%s7855_s28 + $0x1a4] ss:$8 sps:$4 sm:$0xff]  }
  0x79   : > { %467 = vst.msk [vmem:[#allocation2 + $0x610] sm:$0xff] %vm272_vm3, %v7798_v61  ;;  %468 = vst.msk [vmem:[#allocation2 + $0x618] sm:$0xff] %vm272_vm3, %v7798_v61 }
  0x7a   : > { %469 = vst.msk [vmem:[#allocation2 + $0x620] sm:$0xff] %vm272_vm3, %v7798_v61  ;;  %470 = vst.msk [vmem:[#allocation2 + $0x628] sm:$0xff] %vm272_vm3, %v7798_v61 }
  0x7b   : > { %471 = vst.msk [vmem:[#allocation2 + $0x630] sm:$0xff] %vm272_vm3, %v7798_v61  ;;  %472 = vst.msk [vmem:[#allocation2 + $0x638] sm:$0xff] %vm272_vm3, %v7798_v61 }
  0x7c   : > { %473 = vst.msk [vmem:[#allocation2 + $0x640] sm:$0xff] %vm272_vm3, %v7798_v61  ;;  %474 = vst.msk [vmem:[#allocation2 + $0x648] sm:$0xff] %vm272_vm3, %v7798_v61 }
  0x7d   : > { %475 = vst.msk [vmem:[#allocation2 + $0x650] sm:$0xff] %vm272_vm3, %v7798_v61  ;;  %476 = vst.msk [vmem:[#allocation2 + $0x658] sm:$0xff] %vm272_vm3, %v7798_v61 }
  0x7e   : > { %477 = vst.msk [vmem:[#allocation2 + $0x660] sm:$0xff] %vm272_vm3, %v7798_v61  ;;  %478 = vst.msk [vmem:[#allocation2 + $0x668] sm:$0xff] %vm272_vm3, %v7798_v61 }
  0x7f   : > { %479 = vst.msk [vmem:[#allocation2 + $0x670] sm:$0xff] %vm272_vm3, %v7798_v61  ;;  %480 = vst.msk [vmem:[#allocation2 + $0x678] sm:$0xff] %vm272_vm3, %v7798_v61  ;;  %2774 = vmatmul.mubr.bf16.gmra.mrb[40].mxu0 %v7940_v57  ;;  %3286 = vmatmul.mubr.bf16.gmra.mrb[40].mxu1 %v7943_v58  ;;  %v7541_v57 = vld [vmem:[%s7855_s28 + $0x5a4] ss:$8 sps:$4 sm:$0xff]   ;;  %v7543_v58 = vld [vmem:[%s7855_s28 + $0x1a0] ss:$8 sps:$4 sm:$0xff]  }
  0x80   : > { %481 = vst.msk [vmem:[#allocation2 + $0x680] sm:$0xff] %vm272_vm3, %v7798_v61  ;;  %482 = vst.msk [vmem:[#allocation2 + $0x688] sm:$0xff] %vm272_vm3, %v7798_v61  ;;  %6693 = vmatprep.mubr.msk.bf16.mxu0 %vm2269_vm0, %v7946_v59  ;;  %6757 = vmatprep.mubr.msk.bf16.mxu1 %vm2269_vm0, %v7949_v60  ;;  %v7544_v59 = vld [vmem:[%s7855_s28 + $0x5a0] ss:$8 sps:$4 sm:$0xff]   ;;  %v7545_v60 = vld [vmem:[%s7855_s28 + $0x1b4] ss:$8 sps:$4 sm:$0xff]  }
  0x81   : > { %483 = vst.msk [vmem:[#allocation2 + $0x690] sm:$0xff] %vm272_vm3, %v7798_v61  ;;  %484 = vst.msk [vmem:[#allocation2 + $0x698] sm:$0xff] %vm272_vm3, %v7798_v61 }
  0x82   : > { %485 = vst.msk [vmem:[#allocation2 + $0x6a0] sm:$0xff] %vm272_vm3, %v7798_v61  ;;  %486 = vst.msk [vmem:[#allocation2 + $0x6a8] sm:$0xff] %vm272_vm3, %v7798_v61 }
  0x83   : > { %487 = vst.msk [vmem:[#allocation2 + $0x6b0] sm:$0xff] %vm272_vm3, %v7798_v61  ;;  %488 = vst.msk [vmem:[#allocation2 + $0x6b8] sm:$0xff] %vm272_vm3, %v7798_v61 }
  0x84   : > { %489 = vst.msk [vmem:[#allocation2 + $0x6c0] sm:$0xff] %vm272_vm3, %v7798_v61  ;;  %490 = vst.msk [vmem:[#allocation2 + $0x6c8] sm:$0xff] %vm272_vm3, %v7798_v61 }
  0x85   : > { %491 = vst.msk [vmem:[#allocation2 + $0x6d0] sm:$0xff] %vm272_vm3, %v7798_v61  ;;  %492 = vst.msk [vmem:[#allocation2 + $0x6d8] sm:$0xff] %vm272_vm3, %v7798_v61 }
  0x86   : > { %493 = vst.msk [vmem:[#allocation2 + $0x6e0] sm:$0xff] %vm272_vm3, %v7798_v61  ;;  %494 = vst.msk [vmem:[#allocation2 + $0x6e8] sm:$0xff] %vm272_vm3, %v7798_v61 }
  0x87   : > { %495 = vst.msk [vmem:[#allocation2 + $0x6f0] sm:$0xff] %vm272_vm3, %v7798_v61  ;;  %496 = vst.msk [vmem:[#allocation2 + $0x6f8] sm:$0xff] %vm272_vm3, %v7798_v61  ;;  %2782 = vmatmul.mubr.bf16.gmra.mrb[44].mxu0 %v7453_v62  ;;  %3294 = vmatmul.mubr.bf16.gmra.mrb[44].mxu1 %v7454_v63  ;;  %v529_v62 = vld [vmem:[#allocation2] sm:$0xff] }
  0x88   : > { %497 = vst.msk [vmem:[#allocation2 + $0x700] sm:$0xff] %vm272_vm3, %v7798_v61  ;;  %498 = vst.msk [vmem:[#allocation2 + $0x708] sm:$0xff] %vm272_vm3, %v7798_v61  ;;  %6694 = vmatprep.mubr.msk.bf16.mxu0 %vm2269_vm0, %v7455_v0  ;;  %6758 = vmatprep.mubr.msk.bf16.mxu1 %vm2269_vm0, %v7457_v1  ;;  %v657_v63 = vld [vmem:[#allocation2 + $0x400] sm:$0xff] }
  0x89   : > { %499 = vst.msk [vmem:[#allocation2 + $0x710] sm:$0xff] %vm272_vm3, %v7798_v61  ;;  %500 = vst.msk [vmem:[#allocation2 + $0x718] sm:$0xff] %vm272_vm3, %v7798_v61 }
  0x8a   : > { %501 = vst.msk [vmem:[#allocation2 + $0x720] sm:$0xff] %vm272_vm3, %v7798_v61  ;;  %502 = vst.msk [vmem:[#allocation2 + $0x728] sm:$0xff] %vm272_vm3, %v7798_v61 }
  0x8b   : > { %503 = vst.msk [vmem:[#allocation2 + $0x730] sm:$0xff] %vm272_vm3, %v7798_v61  ;;  %504 = vst.msk [vmem:[#allocation2 + $0x738] sm:$0xff] %vm272_vm3, %v7798_v61 }
  0x8c   : > { %505 = vst.msk [vmem:[#allocation2 + $0x740] sm:$0xff] %vm272_vm3, %v7798_v61  ;;  %506 = vst.msk [vmem:[#allocation2 + $0x748] sm:$0xff] %vm272_vm3, %v7798_v61 }
  0x8d   : > { %507 = vst.msk [vmem:[#allocation2 + $0x750] sm:$0xff] %vm272_vm3, %v7798_v61  ;;  %508 = vst.msk [vmem:[#allocation2 + $0x758] sm:$0xff] %vm272_vm3, %v7798_v61 }
  0x8e   : > { %509 = vst.msk [vmem:[#allocation2 + $0x760] sm:$0xff] %vm272_vm3, %v7798_v61  ;;  %510 = vst.msk [vmem:[#allocation2 + $0x768] sm:$0xff] %vm272_vm3, %v7798_v61 }
  0x8f   : > { %511 = vst.msk [vmem:[#allocation2 + $0x770] sm:$0xff] %vm272_vm3, %v7798_v61  ;;  %512 = vst.msk [vmem:[#allocation2 + $0x778] sm:$0xff] %vm272_vm3, %v7798_v61  ;;  %2790 = vmatmul.mubr.bf16.gmra.mrb[48].mxu0 %v7459_v2  ;;  %3302 = vmatmul.mubr.bf16.gmra.mrb[48].mxu1 %v7460_v3  ;;  %v530_v2 = vld [vmem:[#allocation2 + $0x8] sm:$0xff] }
  0x90   : > { %513 = vst.msk [vmem:[#allocation2 + $0x780] sm:$0xff] %vm272_vm3, %v7798_v61  ;;  %514 = vst.msk [vmem:[#allocation2 + $0x788] sm:$0xff] %vm272_vm3, %v7798_v61  ;;  %6695 = vmatprep.mubr.msk.bf16.mxu0 %vm2269_vm0, %v7461_v4  ;;  %6759 = vmatprep.mubr.msk.bf16.mxu1 %vm2269_vm0, %v7463_v5  ;;  %v658_v3 = vld [vmem:[#allocation2 + $0x408] sm:$0xff] }
  0x91   : > { %515 = vst.msk [vmem:[#allocation2 + $0x790] sm:$0xff] %vm272_vm3, %v7798_v61  ;;  %516 = vst.msk [vmem:[#allocation2 + $0x798] sm:$0xff] %vm272_vm3, %v7798_v61 }
  0x92   : > { %517 = vst.msk [vmem:[#allocation2 + $0x7a0] sm:$0xff] %vm272_vm3, %v7798_v61  ;;  %518 = vst.msk [vmem:[#allocation2 + $0x7a8] sm:$0xff] %vm272_vm3, %v7798_v61 }
  0x93   : > { %519 = vst.msk [vmem:[#allocation2 + $0x7b0] sm:$0xff] %vm272_vm3, %v7798_v61  ;;  %520 = vst.msk [vmem:[#allocation2 + $0x7b8] sm:$0xff] %vm272_vm3, %v7798_v61 }
  0x94   : > { %521 = vst.msk [vmem:[#allocation2 + $0x7c0] sm:$0xff] %vm272_vm3, %v7798_v61  ;;  %522 = vst.msk [vmem:[#allocation2 + $0x7c8] sm:$0xff] %vm272_vm3, %v7798_v61 }
  0x95   : > { %523 = vst.msk [vmem:[#allocation2 + $0x7d0] sm:$0xff] %vm272_vm3, %v7798_v61  ;;  %524 = vst.msk [vmem:[#allocation2 + $0x7d8] sm:$0xff] %vm272_vm3, %v7798_v61 }
  0x96   : > { %525 = vst.msk [vmem:[#allocation2 + $0x7e0] sm:$0xff] %vm272_vm3, %v7798_v61  ;;  %526 = vst.msk [vmem:[#allocation2 + $0x7e8] sm:$0xff] %vm272_vm3, %v7798_v61 }
  0x97   : > { %527 = vst.msk [vmem:[#allocation2 + $0x7f0] sm:$0xff] %vm272_vm3, %v7798_v61  ;;  %528 = vst.msk [vmem:[#allocation2 + $0x7f8] sm:$0xff] %vm272_vm3, %v7798_v61  ;;  %2798 = vmatmul.mubr.bf16.gmra.mrb[52].mxu0 %v7465_v6  ;;  %3310 = vmatmul.mubr.bf16.gmra.mrb[52].mxu1 %v7466_v7  ;;  %v7547_v61 = vld [vmem:[%s7855_s28 + $0x5b4] ss:$8 sps:$4 sm:$0xff]  }
  0x98   : > { %6696 = vmatprep.mubr.msk.bf16.mxu0 %vm2269_vm0, %v7467_v8  ;;  %6760 = vmatprep.mubr.msk.bf16.mxu1 %vm2269_vm0, %v7469_v9  ;;  %v7549_v8 = vld [vmem:[%s7855_s28 + $0x1b0] ss:$8 sps:$4 sm:$0xff]  }
  0x99   : > { %v7550_v9 = vld [vmem:[%s7855_s28 + $0x5b0] ss:$8 sps:$4 sm:$0xff]  }
  0x9f   : > { %2806 = vmatmul.mubr.bf16.gmra.mrb[56].mxu0 %v7471_v10  ;;  %3318 = vmatmul.mubr.bf16.gmra.mrb[56].mxu1 %v7472_v11 }
  0xa0   : > { %6697 = vmatprep.mubr.msk.bf16.mxu0 %vm2269_vm0, %v7473_v12  ;;  %6761 = vmatprep.mubr.msk.bf16.mxu1 %vm2269_vm0, %v7475_v13  ;;  %v7551_v12 = vld [vmem:[%s7855_s28 + $0x1c4] ss:$8 sps:$4 sm:$0xff]  }
  0xa1   : > { %v7553_v13 = vld [vmem:[%s7855_s28 + $0x5c4] ss:$8 sps:$4 sm:$0xff]  }
  0xa7   : > { %2814 = vmatmul.mubr.bf16.gmra.mrb[60].mxu0 %v7477_v14  ;;  %3326 = vmatmul.mubr.bf16.gmra.mrb[60].mxu1 %v7478_v15 }
  0xa8   : > { %6698 = vmatprep.mubr.msk.bf16.mxu0 %vm2269_vm0, %v7479_v16  ;;  %6762 = vmatprep.mubr.msk.bf16.mxu1 %vm2269_vm0, %v7481_v17 }
  0xaf   : > { %2822 = vmatmul.mubr.bf16.gmra.mrb[64].mxu0 %v7483_v18  ;;  %3334 = vmatmul.mubr.bf16.gmra.mrb[64].mxu1 %v7484_v19  ;;  %v531_v18 = vld [vmem:[#allocation2 + $0x10] sm:$0xff] }
  0xb0   : > { %6699 = vmatprep.mubr.msk.bf16.mxu0 %vm2269_vm0, %v7485_v20  ;;  %6763 = vmatprep.mubr.msk.bf16.mxu1 %vm2269_vm0, %v7487_v21  ;;  %v659_v19 = vld [vmem:[#allocation2 + $0x410] sm:$0xff]  ;;  %v8578_v20 = vld [vmem:[%s9854_s2] ss:$0 sm:$0xff] }
  0xb7   : > { %2830 = vmatmul.mubr.bf16.gmra.mrb[68].mxu0 %v7489_v22  ;;  %3342 = vmatmul.mubr.bf16.gmra.mrb[68].mxu1 %v7490_v23  ;;  %v532_v23 = vld [vmem:[#allocation2 + $0x18] sm:$0xff] }
  0xb8   : > { %6700 = vmatprep.mubr.msk.bf16.mxu0 %vm2269_vm0, %v7491_v24  ;;  %6764 = vmatprep.mubr.msk.bf16.mxu1 %vm2269_vm0, %v7493_v25  ;;  %v660_v24 = vld [vmem:[#allocation2 + $0x418] sm:$0xff]  ;;  %v7555_v25 = vld [vmem:[%s7855_s28 + $0x1c0] ss:$8 sps:$4 sm:$0xff]  }
  0xbf   : > { %2838 = vmatmul.mubr.bf16.gmra.mrb[72].mxu0 %v7495_v26  ;;  %3350 = vmatmul.mubr.bf16.gmra.mrb[72].mxu1 %v7496_v27 }
  0xc0   : > { %6701 = vmatprep.mubr.msk.bf16.mxu0 %vm2269_vm0, %v7497_v28  ;;  %6765 = vmatprep.mubr.msk.bf16.mxu1 %vm2269_vm0, %v7499_v29 }
  0xc7   : > { %2846 = vmatmul.mubr.bf16.gmra.mrb[76].mxu0 %v7501_v30  ;;  %3358 = vmatmul.mubr.bf16.gmra.mrb[76].mxu1 %v7502_v31  ;;  %v7556_v30 = vld [vmem:[%s7855_s28 + $0x5c0] ss:$8 sps:$4 sm:$0xff]   ;;  %v7557_v31 = vld [vmem:[%s7855_s28 + $0x1d4] ss:$8 sps:$4 sm:$0xff]  }
  0xc8   : > { %6702 = vmatprep.mubr.msk.bf16.mxu0 %vm2269_vm0, %v7503_v32  ;;  %6766 = vmatprep.mubr.msk.bf16.mxu1 %vm2269_vm0, %v7505_v33 }
  0xcf   : > { %2854 = vmatmul.mubr.bf16.gmra.mrb[80].mxu0 %v7507_v34  ;;  %3366 = vmatmul.mubr.bf16.gmra.mrb[80].mxu1 %v7508_v35 }
  0xd0   : > { %6703 = vmatprep.mubr.msk.bf16.mxu0 %vm2269_vm0, %v7509_v36  ;;  %6767 = vmatprep.mubr.msk.bf16.mxu1 %vm2269_vm0, %v7511_v37  ;;  %v7559_v36 = vld [vmem:[%s7855_s28 + $0x5d4] ss:$8 sps:$4 sm:$0xff]  }
  0xd7   : > { %2862 = vmatmul.mubr.bf16.gmra.mrb[84].mxu0 %v7513_v38  ;;  %3374 = vmatmul.mubr.bf16.gmra.mrb[84].mxu1 %v7514_v39 }
  0xd8   : > { %6704 = vmatprep.mubr.msk.bf16.mxu0 %vm2269_vm0, %v7515_v40  ;;  %6768 = vmatprep.mubr.msk.bf16.mxu1 %vm2269_vm0, %v7517_v41 }
  0xdf   : > { %2870 = vmatmul.mubr.bf16.gmra.mrb[88].mxu0 %v7519_v42  ;;  %3382 = vmatmul.mubr.bf16.gmra.mrb[88].mxu1 %v7520_v43 }
  0xe0   : > { %6705 = vmatprep.mubr.msk.bf16.mxu0 %vm2269_vm0, %v7521_v44  ;;  %6769 = vmatprep.mubr.msk.bf16.mxu1 %vm2269_vm0, %v7523_v45 }
  0xe7   : > { %2878 = vmatmul.mubr.bf16.gmra.mrb[92].mxu0 %v7525_v46  ;;  %3390 = vmatmul.mubr.bf16.gmra.mrb[92].mxu1 %v7526_v47 }
  0xe8   : > { %6706 = vmatprep.mubr.msk.bf16.mxu0 %vm2269_vm0, %v7527_v48  ;;  %6770 = vmatprep.mubr.msk.bf16.mxu1 %vm2269_vm0, %v7529_v49  ;;  %v533_v49 = vld [vmem:[#allocation2 + $0x20] sm:$0xff] }
  0xef   : > { %2886 = vmatmul.mubr.bf16.gmra.mrb[96].mxu0 %v7531_v50  ;;  %3398 = vmatmul.mubr.bf16.gmra.mrb[96].mxu1 %v7532_v51  ;;  %v661_v50 = vld [vmem:[#allocation2 + $0x420] sm:$0xff] }
  0xf0   : > { %6707 = vmatprep.mubr.msk.bf16.mxu0 %vm2269_vm0, %v7533_v52  ;;  %6771 = vmatprep.mubr.msk.bf16.mxu1 %vm2269_vm0, %v7535_v53 }
  0xf7   : > { %2894 = vmatmul.mubr.bf16.gmra.mrb[100].mxu0 %v7537_v54  ;;  %3406 = vmatmul.mubr.bf16.gmra.mrb[100].mxu1 %v7538_v55 }
  0xf8   : > { %6708 = vmatprep.mubr.msk.bf16.mxu0 %vm2269_vm0, %v7539_v56  ;;  %6772 = vmatprep.mubr.msk.bf16.mxu1 %vm2269_vm0, %v7541_v57  ;;  %v534_v57 = vld [vmem:[#allocation2 + $0x28] sm:$0xff] }
  0xff   : > { %2902 = vmatmul.mubr.bf16.gmra.mrb[104].mxu0 %v7543_v58  ;;  %3414 = vmatmul.mubr.bf16.gmra.mrb[104].mxu1 %v7544_v59  ;;  %v662_v58 = vld [vmem:[#allocation2 + $0x428] sm:$0xff]  ;;  %v7561_v59 = vld [vmem:[%s7855_s28 + $0x1d0] ss:$8 sps:$4 sm:$0xff]  }
 0x100   : > { %6709 = vmatprep.mubr.msk.bf16.mxu0 %vm2269_vm0, %v7545_v60  ;;  %6773 = vmatprep.mubr.msk.bf16.mxu1 %vm2269_vm0, %v7547_v61 }
 0x102   : > { %v2695_v0 = vpop.f32.mrb[0].mxu0  ;;  %v3207_v1 = vpop.f32.mrb[0].mxu1 }
 0x103   : > { %v3718_v4 = vadd.f32 %v2695_v0, %v529_v62  ;;  %v3846_v5 = vadd.f32 %v3207_v1, %v657_v63  ;;  %v2697_v6 = vpop.f32.mrb[1].mxu0  ;;  %v3209_v7 = vpop.f32.mrb[1].mxu1 }
 0x104   : > { %v2698_v10 = vpop.f32.mrb[2].mxu0  ;;  %v3210_v11 = vpop.f32.mrb[2].mxu1 }
 0x105   : > { %3975 = vst.msk [vmem:[#allocation2] sm:$0xff] %vm272_vm3, %v3718_v4  ;;  %4103 = vst.msk [vmem:[#allocation2 + $0x400] sm:$0xff] %vm272_vm3, %v3846_v5  ;;  %v3719_v14 = vadd.f32 %v2698_v10, %v530_v2  ;;  %v3847_v15 = vadd.f32 %v3210_v11, %v658_v3  ;;  %v2700_v16 = vpop.f32.mrb[3].mxu0  ;;  %v3212_v17 = vpop.f32.mrb[3].mxu1  ;;  %v7562_v2 = vld [vmem:[%s7855_s28 + $0x5d0] ss:$8 sps:$4 sm:$0xff]  }
 0x106   : > { %v7563_v3 = vld [vmem:[%s7855_s28 + $0x1e4] ss:$8 sps:$4 sm:$0xff]  }
 0x107   : > { %3976 = vst.msk [vmem:[#allocation2 + $0x8] sm:$0xff] %vm272_vm3, %v3719_v14  ;;  %4104 = vst.msk [vmem:[#allocation2 + $0x408] sm:$0xff] %vm272_vm3, %v3847_v15  ;;  %2910 = vmatmul.mubr.bf16.gmra.mrb[108].mxu0 %v7549_v8  ;;  %3422 = vmatmul.mubr.bf16.gmra.mrb[108].mxu1 %v7550_v9  ;;  %v7565_v8 = vld [vmem:[%s7855_s28 + $0x5e4] ss:$8 sps:$4 sm:$0xff]  }
 0x108   : > { %6710 = vmatprep.mubr.msk.bf16.mxu0 %vm2269_vm0, %v7551_v12  ;;  %6774 = vmatprep.mubr.msk.bf16.mxu1 %vm2269_vm0, %v7553_v13 }
 0x10a   : > { %v2703_v21 = vpop.f32.mrb[4].mxu0  ;;  %v3215_v22 = vpop.f32.mrb[4].mxu1 }
 0x10b   : > { %v3720_v26 = vadd.f32 %v2703_v21, %v531_v18  ;;  %v3848_v27 = vadd.f32 %v3215_v22, %v659_v19  ;;  %v2705_v28 = vpop.f32.mrb[5].mxu0  ;;  %v3217_v29 = vpop.f32.mrb[5].mxu1  ;;  %v535_v22 = vld [vmem:[#allocation2 + $0x30] sm:$0xff] }
 0x10c   : > { %v4234_v32 = vld [vmem:[#allocation2] sm:$0xff]  ;;  %v2706_v34 = vpop.f32.mrb[6].mxu0  ;;  %v3218_v35 = vpop.f32.mrb[6].mxu1 }
 0x10d   : > { %v4362_v33 = vld [vmem:[#allocation2 + $0x400] sm:$0xff]  ;;  %v4497_v37 = vadd.f32 %v8578_v20, %v4234_v32  ;;  %3977 = vst.msk [vmem:[#allocation2 + $0x10] sm:$0xff] %vm272_vm3, %v3720_v26  ;;  %4105 = vst.msk [vmem:[#allocation2 + $0x410] sm:$0xff] %vm272_vm3, %v3848_v27  ;;  %v3721_v39 = vadd.f32 %v2706_v34, %v532_v23  ;;  %v3849_v40 = vadd.f32 %v3218_v35, %v660_v24  ;;  %v2708_v41 = vpop.f32.mrb[7].mxu0  ;;  %v3220_v42 = vpop.f32.mrb[7].mxu1  ;;  %v663_v23 = vld [vmem:[#allocation2 + $0x430] sm:$0xff] }
 0x10e   : > { %v4625_v38 = vadd.f32 %v8578_v20, %v4362_v33  ;;  %v4235_v43 = vld [vmem:[#allocation2 + $0x8] sm:$0xff] }
 0x10f   : > { %v4363_v44 = vld [vmem:[#allocation2 + $0x408] sm:$0xff]  ;;  %v4753_v45 = vmax.f32 %v4497_v37, 0.0  ;;  %v4498_v47 = vadd.f32 %v8578_v20, %v4235_v43  ;;  %3978 = vst.msk [vmem:[#allocation2 + $0x18] sm:$0xff] %vm272_vm3, %v3721_v39  ;;  %4106 = vst.msk [vmem:[#allocation2 + $0x418] sm:$0xff] %vm272_vm3, %v3849_v40  ;;  %2918 = vmatmul.mubr.bf16.gmra.mrb[112].mxu0 %v7555_v25  ;;  %3430 = vmatmul.mubr.bf16.gmra.mrb[112].mxu1 %v7556_v30  ;;  %v536_v30 = vld [vmem:[#allocation2 + $0x38] sm:$0xff] }
 0x110   : > { %v4881_v46 = vmax.f32 %v4625_v38, 0.0  ;;  %v4626_v48 = vadd.f32 %v8578_v20, %v4363_v44  ;;  %6711 = vmatprep.mubr.msk.bf16.mxu0 %vm2269_vm0, %v7557_v31  ;;  %6775 = vmatprep.mubr.msk.bf16.mxu1 %vm2269_vm0, %v7559_v36  ;;  %v664_v31 = vld [vmem:[#allocation2 + $0x438] sm:$0xff]  ;;  %v7567_v32 = vld [vmem:[%s7855_s28 + $0x1e0] ss:$8 sps:$4 sm:$0xff]  }
 0x111   : > { %v7070_v51 = vpack.c.bf16 %v4753_v45, %v4753_v45  ;;  %v4754_v53 = vmax.f32 %v4498_v47, 0.0  ;;  %v7568_v39 = vld [vmem:[%s7855_s28 + $0x5e0] ss:$8 sps:$4 sm:$0xff]   ;;  %v7569_v40 = vld [vmem:[%s7855_s28 + $0x1f4] ss:$8 sps:$4 sm:$0xff]  }
 0x112   : > { %v7198_v52 = vpack.c.bf16 %v4881_v46, %v4881_v46  ;;  %v4882_v54 = vmax.f32 %v4626_v48, 0.0  ;;  %v2711_v55 = vpop.f32.mrb[8].mxu0  ;;  %v3223_v56 = vpop.f32.mrb[8].mxu1  ;;  %v7571_v45 = vld [vmem:[%s7855_s28 + $0x5f4] ss:$8 sps:$4 sm:$0xff]  }
 0x113   : > { %6034 = vst.msk [vmem:[%s8596_s22] sm:$0xf] %vm6033_vm4, %v7070_v51  ;;  %v7071_v60 = vpack.c.bf16 %v4754_v53, %v4754_v53  ;;  %v3722_v62 = vadd.f32 %v2711_v55, %v533_v49  ;;  %v3850_v63 = vadd.f32 %v3223_v56, %v661_v50  ;;  %v2713_v0 = vpop.f32.mrb[9].mxu0  ;;  %v3225_v1 = vpop.f32.mrb[9].mxu1 }
 0x114   : > { %6162 = vst.msk [vmem:[%s8596_s22 + $0x200] sm:$0xf] %vm6033_vm4, %v7198_v52  ;;  %v7199_v61 = vpack.c.bf16 %v4882_v54, %v4882_v54  ;;  %v4236_v4 = vld [vmem:[#allocation2 + $0x10] sm:$0xff]  ;;  %v2714_v6 = vpop.f32.mrb[10].mxu0  ;;  %v3226_v7 = vpop.f32.mrb[10].mxu1 }
 0x115   : > { %v4364_v5 = vld [vmem:[#allocation2 + $0x410] sm:$0xff]  ;;  %6035 = vst.msk [vmem:[%s8596_s22 + $0x4] sm:$0xf] %vm6033_vm4, %v7071_v60  ;;  %v4499_v9 = vadd.f32 %v8578_v20, %v4236_v4  ;;  %v3723_v11 = vadd.f32 %v2714_v6, %v534_v57  ;;  %v3851_v12 = vadd.f32 %v3226_v7, %v662_v58  ;;  %v2716_v13 = vpop.f32.mrb[11].mxu0  ;;  %v3228_v14 = vpop.f32.mrb[11].mxu1  ;;  %v537_v58 = vld [vmem:[#allocation2 + $0x40] sm:$0xff] }
 0x116   : > { %6163 = vst.msk [vmem:[%s8596_s22 + $0x204] sm:$0xf] %vm6033_vm4, %v7199_v61  ;;  %v4627_v10 = vadd.f32 %v8578_v20, %v4364_v5  ;;  %v4237_v15 = vld [vmem:[#allocation2 + $0x18] sm:$0xff] }
 0x117   : > { %3979 = vst.msk [vmem:[#allocation2 + $0x20] sm:$0xff] %vm272_vm3, %v3722_v62  ;;  %4107 = vst.msk [vmem:[#allocation2 + $0x420] sm:$0xff] %vm272_vm3, %v3850_v63  ;;  %v4365_v16 = vld [vmem:[#allocation2 + $0x418] sm:$0xff]  ;;  %v4755_v17 = vmax.f32 %v4499_v9, 0.0  ;;  %v4500_v19 = vadd.f32 %v8578_v20, %v4237_v15  ;;  %2926 = vmatmul.mubr.bf16.gmra.mrb[116].mxu0 %v7561_v59  ;;  %3438 = vmatmul.mubr.bf16.gmra.mrb[116].mxu1 %v7562_v2  ;;  %v665_v59 = vld [vmem:[#allocation2 + $0x440] sm:$0xff] }
 0x118   : > { %v4883_v18 = vmax.f32 %v4627_v10, 0.0  ;;  %v4628_v21 = vadd.f32 %v8578_v20, %v4365_v16  ;;  %3980 = vst.msk [vmem:[#allocation2 + $0x28] sm:$0xff] %vm272_vm3, %v3723_v11  ;;  %4108 = vst.msk [vmem:[#allocation2 + $0x428] sm:$0xff] %vm272_vm3, %v3851_v12  ;;  %6712 = vmatprep.mubr.msk.bf16.mxu0 %vm2269_vm0, %v7563_v3  ;;  %6776 = vmatprep.mubr.msk.bf16.mxu1 %vm2269_vm0, %v7565_v8  ;;  %v538_v2 = vld [vmem:[#allocation2 + $0x48] sm:$0xff]  ;;  %v7573_v4 = vld [vmem:[%s7855_s28 + $0x1f0] ss:$8 sps:$4 sm:$0xff]  }
 0x119   : > { %v7072_v24 = vpack.c.bf16 %v4755_v17, %v4755_v17  ;;  %v4756_v26 = vmax.f32 %v4500_v19, 0.0  ;;  %v666_v3 = vld [vmem:[#allocation2 + $0x448] sm:$0xff]  ;;  %v7574_v11 = vld [vmem:[%s7855_s28 + $0x5f0] ss:$8 sps:$4 sm:$0xff]  }
 0x11a   : > { %v7200_v25 = vpack.c.bf16 %v4883_v18, %v4883_v18  ;;  %v4884_v27 = vmax.f32 %v4628_v21, 0.0  ;;  %v2719_v28 = vpop.f32.mrb[12].mxu0  ;;  %v3231_v29 = vpop.f32.mrb[12].mxu1  ;;  %v7575_v12 = vld [vmem:[%s7855_s28 + $0x204] ss:$8 sps:$4 sm:$0xff]  }
 0x11b   : > { %6036 = vst.msk [vmem:[%s8596_s22 + $0x8] sm:$0xf] %vm6033_vm4, %v7072_v24  ;;  %v7073_v33 = vpack.c.bf16 %v4756_v26, %v4756_v26  ;;  %v3724_v35 = vadd.f32 %v2719_v28, %v535_v22  ;;  %v3852_v36 = vadd.f32 %v3231_v29, %v663_v23  ;;  %v2721_v37 = vpop.f32.mrb[13].mxu0  ;;  %v3233_v38 = vpop.f32.mrb[13].mxu1  ;;  %v7577_v17 = vld [vmem:[%s7855_s28 + $0x604] ss:$8 sps:$4 sm:$0xff]  }
 0x11c   : > { %6164 = vst.msk [vmem:[%s8596_s22 + $0x208] sm:$0xf] %vm6033_vm4, %v7200_v25  ;;  %v7201_v34 = vpack.c.bf16 %v4884_v27, %v4884_v27  ;;  %v2722_v43 = vpop.f32.mrb[14].mxu0  ;;  %v3234_v44 = vpop.f32.mrb[14].mxu1 }
 0x11d   : > { %6037 = vst.msk [vmem:[%s8596_s22 + $0xc] sm:$0xf] %vm6033_vm4, %v7073_v33  ;;  %v3725_v48 = vadd.f32 %v2722_v43, %v536_v30  ;;  %v3853_v49 = vadd.f32 %v3234_v44, %v664_v31  ;;  %v2724_v50 = vpop.f32.mrb[15].mxu0  ;;  %v3236_v51 = vpop.f32.mrb[15].mxu1  ;;  %v539_v31 = vld [vmem:[#allocation2 + $0x50] sm:$0xff] }
 0x11e   : > { %v4238_v41 = vld [vmem:[#allocation2 + $0x20] sm:$0xff]  ;;  %6165 = vst.msk [vmem:[%s8596_s22 + $0x20c] sm:$0xf] %vm6033_vm4, %v7201_v34 }
 0x11f   : > { %v4366_v42 = vld [vmem:[#allocation2 + $0x420] sm:$0xff]  ;;  %v4501_v46 = vadd.f32 %v8578_v20, %v4238_v41  ;;  %3981 = vst.msk [vmem:[#allocation2 + $0x30] sm:$0xff] %vm272_vm3, %v3724_v35  ;;  %4109 = vst.msk [vmem:[#allocation2 + $0x430] sm:$0xff] %vm272_vm3, %v3852_v36  ;;  %v4239_v52 = vld [vmem:[#allocation2 + $0x28] sm:$0xff]  ;;  %2934 = vmatmul.mubr.bf16.gmra.mrb[120].mxu0 %v7567_v32  ;;  %3446 = vmatmul.mubr.bf16.gmra.mrb[120].mxu1 %v7568_v39 }
 0x120   : > { %v4629_v47 = vadd.f32 %v8578_v20, %v4366_v42  ;;  %v4367_v53 = vld [vmem:[#allocation2 + $0x428] sm:$0xff]  ;;  %v4502_v56 = vadd.f32 %v8578_v20, %v4239_v52  ;;  %3982 = vst.msk [vmem:[#allocation2 + $0x38] sm:$0xff] %vm272_vm3, %v3725_v48  ;;  %4110 = vst.msk [vmem:[#allocation2 + $0x438] sm:$0xff] %vm272_vm3, %v3853_v49  ;;  %6713 = vmatprep.mubr.msk.bf16.mxu0 %vm2269_vm0, %v7569_v40  ;;  %6777 = vmatprep.mubr.msk.bf16.mxu1 %vm2269_vm0, %v7571_v45  ;;  %v667_v32 = vld [vmem:[#allocation2 + $0x450] sm:$0xff] }
 0x121   : > { %v4757_v54 = vmax.f32 %v4501_v46, 0.0  ;;  %v4630_v57 = vadd.f32 %v8578_v20, %v4367_v53  ;;  %v540_v39 = vld [vmem:[#allocation2 + $0x58] sm:$0xff]  ;;  %v7579_v41 = vld [vmem:[%s7855_s28 + $0x200] ss:$8 sps:$4 sm:$0xff]  }
 0x122   : > { %v4885_v55 = vmax.f32 %v4629_v47, 0.0  ;;  %v4758_v62 = vmax.f32 %v4502_v56, 0.0  ;;  %v2727_v0 = vpop.f32.mrb[16].mxu0  ;;  %v3239_v1 = vpop.f32.mrb[16].mxu1  ;;  %v668_v40 = vld [vmem:[#allocation2 + $0x458] sm:$0xff] }
 0x123   : > { %v7074_v60 = vpack.c.bf16 %v4757_v54, %v4757_v54  ;;  %v4886_v63 = vmax.f32 %v4630_v57, 0.0  ;;  %v3726_v7 = vadd.f32 %v2727_v0, %v537_v58  ;;  %v3854_v8 = vadd.f32 %v3239_v1, %v665_v59  ;;  %v2729_v9 = vpop.f32.mrb[17].mxu0  ;;  %v3241_v10 = vpop.f32.mrb[17].mxu1  ;;  %v7580_v48 = vld [vmem:[%s7855_s28 + $0x600] ss:$8 sps:$4 sm:$0xff]  }
 0x124   : > { %v7202_v61 = vpack.c.bf16 %v4885_v55, %v4885_v55  ;;  %v7075_v5 = vpack.c.bf16 %v4758_v62, %v4758_v62  ;;  %v2730_v15 = vpop.f32.mrb[18].mxu0  ;;  %v3242_v16 = vpop.f32.mrb[18].mxu1  ;;  %v7581_v49 = vld [vmem:[%s7855_s28 + $0x214] ss:$8 sps:$4 sm:$0xff]  }
 0x125   : > { %6038 = vst.msk [vmem:[%s8596_s22 + $0x10] sm:$0xf] %vm6033_vm4, %v7074_v60  ;;  %v7203_v6 = vpack.c.bf16 %v4886_v63, %v4886_v63  ;;  %v3727_v21 = vadd.f32 %v2730_v15, %v538_v2  ;;  %v3855_v22 = vadd.f32 %v3242_v16, %v666_v3  ;;  %v2732_v23 = vpop.f32.mrb[19].mxu0  ;;  %v3244_v24 = vpop.f32.mrb[19].mxu1  ;;  %v7583_v54 = vld [vmem:[%s7855_s28 + $0x614] ss:$8 sps:$4 sm:$0xff]  }
 0x126   : > { %6166 = vst.msk [vmem:[%s8596_s22 + $0x210] sm:$0xf] %vm6033_vm4, %v7202_v61  ;;  %v4240_v13 = vld [vmem:[#allocation2 + $0x30] sm:$0xff]  ;;  %6039 = vst.msk [vmem:[%s8596_s22 + $0x14] sm:$0xf] %vm6033_vm4, %v7075_v5  ;;  %v541_v3 = vld [vmem:[#allocation2 + $0x60] sm:$0xff] }
 0x127   : > { %v4368_v14 = vld [vmem:[#allocation2 + $0x430] sm:$0xff]  ;;  %6167 = vst.msk [vmem:[%s8596_s22 + $0x214] sm:$0xf] %vm6033_vm4, %v7203_v6  ;;  %v4503_v18 = vadd.f32 %v8578_v20, %v4240_v13  ;;  %v4241_v25 = vld [vmem:[#allocation2 + $0x38] sm:$0xff]  ;;  %2942 = vmatmul.mubr.bf16.gmra.mrb[124].mxu0 %v7573_v4  ;;  %3454 = vmatmul.mubr.bf16.gmra.mrb[124].mxu1 %v7574_v11  ;;  %v669_v4 = vld [vmem:[#allocation2 + $0x460] sm:$0xff] }
 0x128   : > { %v4631_v19 = vadd.f32 %v8578_v20, %v4368_v14  ;;  %3983 = vst.msk [vmem:[#allocation2 + $0x40] sm:$0xff] %vm272_vm3, %v3726_v7  ;;  %4111 = vst.msk [vmem:[#allocation2 + $0x440] sm:$0xff] %vm272_vm3, %v3854_v8  ;;  %v4369_v26 = vld [vmem:[#allocation2 + $0x438] sm:$0xff]  ;;  %v4504_v29 = vadd.f32 %v8578_v20, %v4241_v25  ;;  %6714 = vmatprep.mubr.msk.bf16.mxu0 %vm2269_vm0, %v7575_v12  ;;  %6778 = vmatprep.mubr.msk.bf16.mxu1 %vm2269_vm0, %v7577_v17  ;;  %v542_v11 = vld [vmem:[#allocation2 + $0x68] sm:$0xff] }
 0x129   : > { %v4759_v27 = vmax.f32 %v4503_v18, 0.0  ;;  %v4632_v30 = vadd.f32 %v8578_v20, %v4369_v26  ;;  %3984 = vst.msk [vmem:[#allocation2 + $0x48] sm:$0xff] %vm272_vm3, %v3727_v21  ;;  %4112 = vst.msk [vmem:[#allocation2 + $0x448] sm:$0xff] %vm272_vm3, %v3855_v22  ;;  %v670_v12 = vld [vmem:[#allocation2 + $0x468] sm:$0xff]  ;;  %v7585_v13 = vld [vmem:[%s7855_s28 + $0x210] ss:$8 sps:$4 sm:$0xff]  }
 0x12a   : > { %v4887_v28 = vmax.f32 %v4631_v19, 0.0  ;;  %v4760_v35 = vmax.f32 %v4504_v29, 0.0  ;;  %v2735_v37 = vpop.f32.mrb[20].mxu0  ;;  %v3247_v38 = vpop.f32.mrb[20].mxu1  ;;  %v7586_v21 = vld [vmem:[%s7855_s28 + $0x610] ss:$8 sps:$4 sm:$0xff]  }
 0x12b   : > { %v7076_v33 = vpack.c.bf16 %v4759_v27, %v4759_v27  ;;  %v4888_v36 = vmax.f32 %v4632_v30, 0.0  ;;  %v3728_v44 = vadd.f32 %v2735_v37, %v539_v31  ;;  %v3856_v45 = vadd.f32 %v3247_v38, %v667_v32  ;;  %v2737_v46 = vpop.f32.mrb[21].mxu0  ;;  %v3249_v47 = vpop.f32.mrb[21].mxu1  ;;  %v7587_v22 = vld [vmem:[%s7855_s28 + $0x224] ss:$8 sps:$4 sm:$0xff]  }
 0x12c   : > { %v7204_v34 = vpack.c.bf16 %v4887_v28, %v4887_v28  ;;  %v7077_v42 = vpack.c.bf16 %v4760_v35, %v4760_v35  ;;  %v2738_v52 = vpop.f32.mrb[22].mxu0  ;;  %v3250_v53 = vpop.f32.mrb[22].mxu1  ;;  %v7589_v27 = vld [vmem:[%s7855_s28 + $0x624] ss:$8 sps:$4 sm:$0xff]  }
 0x12d   : > { %6040 = vst.msk [vmem:[%s8596_s22 + $0x18] sm:$0xf] %vm6033_vm4, %v7076_v33  ;;  %v7205_v43 = vpack.c.bf16 %v4888_v36, %v4888_v36  ;;  %v3729_v57 = vadd.f32 %v2738_v52, %v540_v39  ;;  %v3857_v58 = vadd.f32 %v3250_v53, %v668_v40  ;;  %v2740_v59 = vpop.f32.mrb[23].mxu0  ;;  %v3252_v60 = vpop.f32.mrb[23].mxu1  ;;  %v543_v40 = vld [vmem:[#allocation2 + $0x70] sm:$0xff] }
 0x12e   : > { %6168 = vst.msk [vmem:[%s8596_s22 + $0x218] sm:$0xf] %vm6033_vm4, %v7204_v34  ;;  %6041 = vst.msk [vmem:[%s8596_s22 + $0x1c] sm:$0xf] %vm6033_vm4, %v7077_v42 }
 0x12f   : > { %v4242_v50 = vld [vmem:[#allocation2 + $0x40] sm:$0xff]  ;;  %6169 = vst.msk [vmem:[%s8596_s22 + $0x21c] sm:$0xf] %vm6033_vm4, %v7205_v43  ;;  %2950 = vmatmul.mubr.bf16.gmra.mrb[128].mxu0 %v7579_v41  ;;  %3462 = vmatmul.mubr.bf16.gmra.mrb[128].mxu1 %v7580_v48  ;;  %v671_v41 = vld [vmem:[#allocation2 + $0x470] sm:$0xff]  ;;  %v544_v48 = vld [vmem:[#allocation2 + $0x78] sm:$0xff] }
 0x130   : > { %v4370_v51 = vld [vmem:[#allocation2 + $0x440] sm:$0xff]  ;;  %v4505_v55 = vadd.f32 %v8578_v20, %v4242_v50  ;;  %3985 = vst.msk [vmem:[#allocation2 + $0x50] sm:$0xff] %vm272_vm3, %v3728_v44  ;;  %4113 = vst.msk [vmem:[#allocation2 + $0x450] sm:$0xff] %vm272_vm3, %v3856_v45  ;;  %v4243_v61 = vld [vmem:[#allocation2 + $0x48] sm:$0xff]  ;;  %6715 = vmatprep.mubr.msk.bf16.mxu0 %vm2269_vm0, %v7581_v49  ;;  %6779 = vmatprep.mubr.msk.bf16.mxu1 %vm2269_vm0, %v7583_v54 }
 0x131   : > { %v4633_v56 = vadd.f32 %v8578_v20, %v4370_v51  ;;  %v4371_v62 = vld [vmem:[#allocation2 + $0x448] sm:$0xff]  ;;  %v4506_v1 = vadd.f32 %v8578_v20, %v4243_v61  ;;  %3986 = vst.msk [vmem:[#allocation2 + $0x58] sm:$0xff] %vm272_vm3, %v3729_v57  ;;  %4114 = vst.msk [vmem:[#allocation2 + $0x458] sm:$0xff] %vm272_vm3, %v3857_v58  ;;  %v672_v49 = vld [vmem:[#allocation2 + $0x478] sm:$0xff] }
 0x132   : > { %v4761_v63 = vmax.f32 %v4505_v55, 0.0  ;;  %v4634_v2 = vadd.f32 %v8578_v20, %v4371_v62  ;;  %v2743_v9 = vpop.f32.mrb[24].mxu0  ;;  %v3255_v10 = vpop.f32.mrb[24].mxu1  ;;  %v7591_v50 = vld [vmem:[%s7855_s28 + $0x220] ss:$8 sps:$4 sm:$0xff]  }
 0x133   : > { %v4889_v0 = vmax.f32 %v4633_v56, 0.0  ;;  %v4762_v7 = vmax.f32 %v4506_v1, 0.0  ;;  %v3730_v16 = vadd.f32 %v2743_v9, %v541_v3  ;;  %v3858_v17 = vadd.f32 %v3255_v10, %v669_v4  ;;  %v2745_v18 = vpop.f32.mrb[25].mxu0  ;;  %v3257_v19 = vpop.f32.mrb[25].mxu1  ;;  %v7592_v57 = vld [vmem:[%s7855_s28 + $0x620] ss:$8 sps:$4 sm:$0xff]  }
 0x134   : > { %v7078_v5 = vpack.c.bf16 %v4761_v63, %v4761_v63  ;;  %v4890_v8 = vmax.f32 %v4634_v2, 0.0  ;;  %v2746_v25 = vpop.f32.mrb[26].mxu0  ;;  %v3258_v26 = vpop.f32.mrb[26].mxu1  ;;  %v7593_v58 = vld [vmem:[%s7855_s28 + $0x234] ss:$8 sps:$4 sm:$0xff]  }
 0x135   : > { %v7206_v6 = vpack.c.bf16 %v4889_v0, %v4889_v0  ;;  %v7079_v14 = vpack.c.bf16 %v4762_v7, %v4762_v7  ;;  %3987 = vst.msk [vmem:[#allocation2 + $0x60] sm:$0xff] %vm272_vm3, %v3730_v16  ;;  %4115 = vst.msk [vmem:[#allocation2 + $0x460] sm:$0xff] %vm272_vm3, %v3858_v17  ;;  %v3731_v30 = vadd.f32 %v2746_v25, %v542_v11  ;;  %v2748_v32 = vpop.f32.mrb[27].mxu0  ;;  %v3260_v33 = vpop.f32.mrb[27].mxu1  ;;  %v7595_v63 = vld [vmem:[%s7855_s28 + $0x634] ss:$8 sps:$4 sm:$0xff]  }
 0x136   : > { %6042 = vst.msk [vmem:[%s8596_s22 + $0x20] sm:$0xf] %vm6033_vm4, %v7078_v5  ;;  %v7207_v15 = vpack.c.bf16 %v4890_v8, %v4890_v8  ;;  %v3859_v31 = vadd.f32 %v3258_v26, %v670_v12  ;;  %v545_v12 = vld [vmem:[#allocation2 + $0x80] sm:$0xff] }
 0x137   : > { %6170 = vst.msk [vmem:[%s8596_s22 + $0x220] sm:$0xf] %vm6033_vm4, %v7206_v6  ;;  %v4244_v23 = vld [vmem:[#allocation2 + $0x50] sm:$0xff]  ;;  %6043 = vst.msk [vmem:[%s8596_s22 + $0x24] sm:$0xf] %vm6033_vm4, %v7079_v14  ;;  %2958 = vmatmul.mubr.bf16.gmra.mrb[132].mxu0 %v7585_v13  ;;  %3470 = vmatmul.mubr.bf16.gmra.mrb[132].mxu1 %v7586_v21  ;;  %v673_v13 = vld [vmem:[#allocation2 + $0x480] sm:$0xff] }
 0x138   : > { %v4372_v24 = vld [vmem:[#allocation2 + $0x450] sm:$0xff]  ;;  %6171 = vst.msk [vmem:[%s8596_s22 + $0x224] sm:$0xf] %vm6033_vm4, %v7207_v15  ;;  %v4507_v28 = vadd.f32 %v8578_v20, %v4244_v23  ;;  %v4245_v34 = vld [vmem:[#allocation2 + $0x58] sm:$0xff]  ;;  %6716 = vmatprep.mubr.msk.bf16.mxu0 %vm2269_vm0, %v7587_v22  ;;  %6780 = vmatprep.mubr.msk.bf16.mxu1 %vm2269_vm0, %v7589_v27  ;;  %v546_v21 = vld [vmem:[#allocation2 + $0x88] sm:$0xff] }
 0x139   : > { %v4635_v29 = vadd.f32 %v8578_v20, %v4372_v24  ;;  %v4373_v35 = vld [vmem:[#allocation2 + $0x458] sm:$0xff]  ;;  %v4508_v38 = vadd.f32 %v8578_v20, %v4245_v34  ;;  %3988 = vst.msk [vmem:[#allocation2 + $0x68] sm:$0xff] %vm272_vm3, %v3731_v30  ;;  %4116 = vst.msk [vmem:[#allocation2 + $0x468] sm:$0xff] %vm272_vm3, %v3859_v31  ;;  %v674_v22 = vld [vmem:[#allocation2 + $0x488] sm:$0xff] }
 0x13a   : > { %v4763_v36 = vmax.f32 %v4507_v28, 0.0  ;;  %v4636_v39 = vadd.f32 %v8578_v20, %v4373_v35  ;;  %v2751_v46 = vpop.f32.mrb[28].mxu0  ;;  %v3263_v47 = vpop.f32.mrb[28].mxu1  ;;  %v7597_v23 = vld [vmem:[%s7855_s28 + $0x230] ss:$8 sps:$4 sm:$0xff]  }
 0x13b   : > { %v4891_v37 = vmax.f32 %v4635_v29, 0.0  ;;  %v4764_v44 = vmax.f32 %v4508_v38, 0.0  ;;  %v3732_v53 = vadd.f32 %v2751_v46, %v543_v40  ;;  %v3860_v54 = vadd.f32 %v3263_v47, %v671_v41  ;;  %v2753_v55 = vpop.f32.mrb[29].mxu0  ;;  %v3265_v56 = vpop.f32.mrb[29].mxu1  ;;  %v7598_v30 = vld [vmem:[%s7855_s28 + $0x630] ss:$8 sps:$4 sm:$0xff]  }
 0x13c   : > { %v7080_v42 = vpack.c.bf16 %v4763_v36, %v4763_v36  ;;  %v4892_v45 = vmax.f32 %v4636_v39, 0.0  ;;  %v4246_v59 = vld [vmem:[#allocation2 + $0x60] sm:$0xff]  ;;  %v2754_v61 = vpop.f32.mrb[30].mxu0  ;;  %v3266_v62 = vpop.f32.mrb[30].mxu1 }
 0x13d   : > { %v7208_v43 = vpack.c.bf16 %v4891_v37, %v4891_v37  ;;  %v7081_v51 = vpack.c.bf16 %v4764_v44, %v4764_v44  ;;  %v4374_v60 = vld [vmem:[#allocation2 + $0x460] sm:$0xff]  ;;  %v4509_v0 = vadd.f32 %v8578_v20, %v4246_v59  ;;  %3989 = vst.msk [vmem:[#allocation2 + $0x70] sm:$0xff] %vm272_vm3, %v3732_v53  ;;  %4117 = vst.msk [vmem:[#allocation2 + $0x470] sm:$0xff] %vm272_vm3, %v3860_v54  ;;  %v2756_v4 = vpop.f32.mrb[31].mxu0  ;;  %v3268_v5 = vpop.f32.mrb[31].mxu1 }
 0x13e   : > { %6044 = vst.msk [vmem:[%s8596_s22 + $0x28] sm:$0xf] %vm6033_vm4, %v7080_v42  ;;  %v7209_v52 = vpack.c.bf16 %v4892_v45, %v4892_v45  ;;  %v4637_v1 = vadd.f32 %v8578_v20, %v4374_v60  ;;  %v3733_v2 = vadd.f32 %v2754_v61, %v544_v48  ;;  %v3861_v3 = vadd.f32 %v3266_v62, %v672_v49  ;;  %v7599_v31 = vld [vmem:[%s7855_s28 + $0x244] ss:$8 sps:$4 sm:$0xff]   ;;  %v547_v49 = vld [vmem:[#allocation2 + $0x90] sm:$0xff] }
 0x13f   : > { %6172 = vst.msk [vmem:[%s8596_s22 + $0x228] sm:$0xf] %vm6033_vm4, %v7208_v43  ;;  %6045 = vst.msk [vmem:[%s8596_s22 + $0x2c] sm:$0xf] %vm6033_vm4, %v7081_v51  ;;  %v4765_v8 = vmax.f32 %v4509_v0, 0.0  ;;  %2966 = vmatmul.mubr.bf16.gmra.mrb[136].mxu0 %v7591_v50  ;;  %3478 = vmatmul.mubr.bf16.gmra.mrb[136].mxu1 %v7592_v57  ;;  %v675_v50 = vld [vmem:[#allocation2 + $0x490] sm:$0xff] }
 0x140   : > { %6173 = vst.msk [vmem:[%s8596_s22 + $0x22c] sm:$0xf] %vm6033_vm4, %v7209_v52  ;;  %v4247_v6 = vld [vmem:[#allocation2 + $0x68] sm:$0xff]  ;;  %v4893_v9 = vmax.f32 %v4637_v1, 0.0  ;;  %6717 = vmatprep.mubr.msk.bf16.mxu0 %vm2269_vm0, %v7593_v58  ;;  %6781 = vmatprep.mubr.msk.bf16.mxu1 %vm2269_vm0, %v7595_v63  ;;  %v548_v57 = vld [vmem:[#allocation2 + $0x98] sm:$0xff] }
 0x141   : > { %v4375_v7 = vld [vmem:[#allocation2 + $0x468] sm:$0xff]  ;;  %v4510_v10 = vadd.f32 %v8578_v20, %v4247_v6  ;;  %3990 = vst.msk [vmem:[#allocation2 + $0x78] sm:$0xff] %vm272_vm3, %v3733_v2  ;;  %4118 = vst.msk [vmem:[#allocation2 + $0x478] sm:$0xff] %vm272_vm3, %v3861_v3  ;;  %v7082_v14 = vpack.c.bf16 %v4765_v8, %v4765_v8  ;;  %v676_v58 = vld [vmem:[#allocation2 + $0x498] sm:$0xff] }
 0x142   : > { %v4638_v11 = vadd.f32 %v8578_v20, %v4375_v7  ;;  %v7210_v15 = vpack.c.bf16 %v4893_v9, %v4893_v9  ;;  %v2759_v18 = vpop.f32.mrb[32].mxu0  ;;  %v3271_v19 = vpop.f32.mrb[32].mxu1  ;;  %v7601_v36 = vld [vmem:[%s7855_s28 + $0x644] ss:$8 sps:$4 sm:$0xff]   ;;  %v7603_v59 = vld [vmem:[%s7855_s28 + $0x240] ss:$8 sps:$4 sm:$0xff]  }
 0x143   : > { %v4766_v16 = vmax.f32 %v4510_v10, 0.0  ;;  %6046 = vst.msk [vmem:[%s8596_s22 + $0x30] sm:$0xf] %vm6033_vm4, %v7082_v14  ;;  %v3734_v26 = vadd.f32 %v2759_v18, %v545_v12  ;;  %v3862_v27 = vadd.f32 %v3271_v19, %v673_v13  ;;  %v2761_v28 = vpop.f32.mrb[33].mxu0  ;;  %v3273_v29 = vpop.f32.mrb[33].mxu1 }
 0x144   : > { %v4894_v17 = vmax.f32 %v4638_v11, 0.0  ;;  %6174 = vst.msk [vmem:[%s8596_s22 + $0x230] sm:$0xf] %vm6033_vm4, %v7210_v15  ;;  %v4248_v32 = vld [vmem:[#allocation2 + $0x70] sm:$0xff]  ;;  %v2762_v34 = vpop.f32.mrb[34].mxu0  ;;  %v3274_v35 = vpop.f32.mrb[34].mxu1 }
 0x145   : > { %v7083_v24 = vpack.c.bf16 %v4766_v16, %v4766_v16  ;;  %v4376_v33 = vld [vmem:[#allocation2 + $0x470] sm:$0xff]  ;;  %v4511_v37 = vadd.f32 %v8578_v20, %v4248_v32  ;;  %3991 = vst.msk [vmem:[#allocation2 + $0x80] sm:$0xff] %vm272_vm3, %v3734_v26  ;;  %4119 = vst.msk [vmem:[#allocation2 + $0x480] sm:$0xff] %vm272_vm3, %v3862_v27  ;;  %v3735_v39 = vadd.f32 %v2762_v34, %v546_v21  ;;  %v2764_v41 = vpop.f32.mrb[35].mxu0  ;;  %v3276_v42 = vpop.f32.mrb[35].mxu1 }
 0x146   : > { %v7211_v25 = vpack.c.bf16 %v4894_v17, %v4894_v17  ;;  %v4639_v38 = vadd.f32 %v8578_v20, %v4376_v33  ;;  %v3863_v40 = vadd.f32 %v3274_v35, %v674_v22  ;;  %v7604_v2 = vld [vmem:[%s7855_s28 + $0x640] ss:$8 sps:$4 sm:$0xff]   ;;  %v7605_v3 = vld [vmem:[%s7855_s28 + $0x254] ss:$8 sps:$4 sm:$0xff]   ;;  %v7609_v32 = vld [vmem:[%s7855_s28 + $0x250] ss:$8 sps:$4 sm:$0xff]  }
 0x147   : > { %6047 = vst.msk [vmem:[%s8596_s22 + $0x34] sm:$0xf] %vm6033_vm4, %v7083_v24  ;;  %v4767_v45 = vmax.f32 %v4511_v37, 0.0  ;;  %2974 = vmatmul.mubr.bf16.gmra.mrb[140].mxu0 %v7597_v23  ;;  %3486 = vmatmul.mubr.bf16.gmra.mrb[140].mxu1 %v7598_v30  ;;  %v7607_v8 = vld [vmem:[%s7855_s28 + $0x654] ss:$8 sps:$4 sm:$0xff]   ;;  %v549_v22 = vld [vmem:[#allocation2 + $0xa0] sm:$0xff] }
 0x148   : > { %6175 = vst.msk [vmem:[%s8596_s22 + $0x234] sm:$0xf] %vm6033_vm4, %v7211_v25  ;;  %v4249_v43 = vld [vmem:[#allocation2 + $0x78] sm:$0xff]  ;;  %v4895_v46 = vmax.f32 %v4639_v38, 0.0  ;;  %6718 = vmatprep.mubr.msk.bf16.mxu0 %vm2269_vm0, %v7599_v31  ;;  %6782 = vmatprep.mubr.msk.bf16.mxu1 %vm2269_vm0, %v7601_v36  ;;  %v677_v23 = vld [vmem:[#allocation2 + $0x4a0] sm:$0xff]  ;;  %v550_v30 = vld [vmem:[#allocation2 + $0xa8] sm:$0xff] }
 0x149   : > { %v4377_v44 = vld [vmem:[#allocation2 + $0x478] sm:$0xff]  ;;  %v4512_v47 = vadd.f32 %v8578_v20, %v4249_v43  ;;  %3992 = vst.msk [vmem:[#allocation2 + $0x88] sm:$0xff] %vm272_vm3, %v3735_v39  ;;  %4120 = vst.msk [vmem:[#allocation2 + $0x488] sm:$0xff] %vm272_vm3, %v3863_v40  ;;  %v7084_v51 = vpack.c.bf16 %v4767_v45, %v4767_v45  ;;  %v678_v31 = vld [vmem:[#allocation2 + $0x4a8] sm:$0xff] }
 0x14a   : > { %v4640_v48 = vadd.f32 %v8578_v20, %v4377_v44  ;;  %v7212_v52 = vpack.c.bf16 %v4895_v46, %v4895_v46  ;;  %v2767_v55 = vpop.f32.mrb[36].mxu0  ;;  %v3279_v56 = vpop.f32.mrb[36].mxu1  ;;  %v7610_v39 = vld [vmem:[%s7855_s28 + $0x650] ss:$8 sps:$4 sm:$0xff]   ;;  %v7611_v40 = vld [vmem:[%s7855_s28 + $0x264] ss:$8 sps:$4 sm:$0xff]  }
 0x14b   : > { %v4768_v53 = vmax.f32 %v4512_v47, 0.0  ;;  %6048 = vst.msk [vmem:[%s8596_s22 + $0x38] sm:$0xf] %vm6033_vm4, %v7084_v51  ;;  %v3736_v62 = vadd.f32 %v2767_v55, %v547_v49  ;;  %v3864_v63 = vadd.f32 %v3279_v56, %v675_v50  ;;  %v2769_v0 = vpop.f32.mrb[37].mxu0  ;;  %v3281_v1 = vpop.f32.mrb[37].mxu1 }
 0x14c   : > { %v4896_v54 = vmax.f32 %v4640_v48, 0.0  ;;  %6176 = vst.msk [vmem:[%s8596_s22 + $0x238] sm:$0xf] %vm6033_vm4, %v7212_v52  ;;  %v4250_v4 = vld [vmem:[#allocation2 + $0x80] sm:$0xff]  ;;  %v2770_v6 = vpop.f32.mrb[38].mxu0  ;;  %v3282_v7 = vpop.f32.mrb[38].mxu1 }
 0x14d   : > { %v7085_v60 = vpack.c.bf16 %v4768_v53, %v4768_v53  ;;  %v4378_v5 = vld [vmem:[#allocation2 + $0x480] sm:$0xff]  ;;  %v4513_v9 = vadd.f32 %v8578_v20, %v4250_v4  ;;  %3993 = vst.msk [vmem:[#allocation2 + $0x90] sm:$0xff] %vm272_vm3, %v3736_v62  ;;  %4121 = vst.msk [vmem:[#allocation2 + $0x490] sm:$0xff] %vm272_vm3, %v3864_v63  ;;  %v3737_v11 = vadd.f32 %v2770_v6, %v548_v57  ;;  %v2772_v13 = vpop.f32.mrb[39].mxu0  ;;  %v3284_v14 = vpop.f32.mrb[39].mxu1 }
 0x14e   : > { %v7213_v61 = vpack.c.bf16 %v4896_v54, %v4896_v54  ;;  %v4641_v10 = vadd.f32 %v8578_v20, %v4378_v5  ;;  %v3865_v12 = vadd.f32 %v3282_v7, %v676_v58  ;;  %v7613_v45 = vld [vmem:[%s7855_s28 + $0x664] ss:$8 sps:$4 sm:$0xff]   ;;  %v551_v58 = vld [vmem:[#allocation2 + $0xb0] sm:$0xff]  ;;  %v7615_v4 = vld [vmem:[%s7855_s28 + $0x260] ss:$8 sps:$4 sm:$0xff]  }
 0x14f   : > { %6049 = vst.msk [vmem:[%s8596_s22 + $0x3c] sm:$0xf] %vm6033_vm4, %v7085_v60  ;;  %v4769_v17 = vmax.f32 %v4513_v9, 0.0  ;;  %2982 = vmatmul.mubr.bf16.gmra.mrb[144].mxu0 %v7603_v59  ;;  %3494 = vmatmul.mubr.bf16.gmra.mrb[144].mxu1 %v7604_v2  ;;  %v679_v59 = vld [vmem:[#allocation2 + $0x4b0] sm:$0xff]  ;;  %v552_v2 = vld [vmem:[#allocation2 + $0xb8] sm:$0xff] }
 0x150   : > { %6177 = vst.msk [vmem:[%s8596_s22 + $0x23c] sm:$0xf] %vm6033_vm4, %v7213_v61  ;;  %v4251_v15 = vld [vmem:[#allocation2 + $0x88] sm:$0xff]  ;;  %v4897_v18 = vmax.f32 %v4641_v10, 0.0  ;;  %6719 = vmatprep.mubr.msk.bf16.mxu0 %vm2269_vm0, %v7605_v3  ;;  %6783 = vmatprep.mubr.msk.bf16.mxu1 %vm2269_vm0, %v7607_v8  ;;  %v680_v3 = vld [vmem:[#allocation2 + $0x4b8] sm:$0xff] }
 0x151   : > { %v4379_v16 = vld [vmem:[#allocation2 + $0x488] sm:$0xff]  ;;  %v4514_v19 = vadd.f32 %v8578_v20, %v4251_v15  ;;  %3994 = vst.msk [vmem:[#allocation2 + $0x98] sm:$0xff] %vm272_vm3, %v3737_v11  ;;  %4122 = vst.msk [vmem:[#allocation2 + $0x498] sm:$0xff] %vm272_vm3, %v3865_v12  ;;  %v7086_v24 = vpack.c.bf16 %v4769_v17, %v4769_v17  ;;  %v7617_v12 = vld [vmem:[%s7855_s28 + $0x274] ss:$8 sps:$4 sm:$0xff]  }
 0x152   : > { %v4642_v21 = vadd.f32 %v8578_v20, %v4379_v16  ;;  %v7214_v25 = vpack.c.bf16 %v4897_v18, %v4897_v18  ;;  %v2775_v28 = vpop.f32.mrb[40].mxu0  ;;  %v3287_v29 = vpop.f32.mrb[40].mxu1  ;;  %v7616_v11 = vld [vmem:[%s7855_s28 + $0x660] ss:$8 sps:$4 sm:$0xff]   ;;  %v7619_v17 = vld [vmem:[%s7855_s28 + $0x674] ss:$8 sps:$4 sm:$0xff]  }
 0x153   : > { %v4770_v26 = vmax.f32 %v4514_v19, 0.0  ;;  %6050 = vst.msk [vmem:[%s8596_s22 + $0x40] sm:$0xf] %vm6033_vm4, %v7086_v24  ;;  %v3738_v35 = vadd.f32 %v2775_v28, %v549_v22  ;;  %v3866_v36 = vadd.f32 %v3287_v29, %v677_v23  ;;  %v2777_v37 = vpop.f32.mrb[41].mxu0  ;;  %v3289_v38 = vpop.f32.mrb[41].mxu1 }
 0x154   : > { %v4898_v27 = vmax.f32 %v4642_v21, 0.0  ;;  %6178 = vst.msk [vmem:[%s8596_s22 + $0x240] sm:$0xf] %vm6033_vm4, %v7214_v25  ;;  %v4252_v41 = vld [vmem:[#allocation2 + $0x90] sm:$0xff]  ;;  %v2778_v43 = vpop.f32.mrb[42].mxu0  ;;  %v3290_v44 = vpop.f32.mrb[42].mxu1 }
 0x155   : > { %v7087_v33 = vpack.c.bf16 %v4770_v26, %v4770_v26  ;;  %v4380_v42 = vld [vmem:[#allocation2 + $0x490] sm:$0xff]  ;;  %v4515_v46 = vadd.f32 %v8578_v20, %v4252_v41  ;;  %3995 = vst.msk [vmem:[#allocation2 + $0xa0] sm:$0xff] %vm272_vm3, %v3738_v35  ;;  %4123 = vst.msk [vmem:[#allocation2 + $0x4a0] sm:$0xff] %vm272_vm3, %v3866_v36  ;;  %v3739_v48 = vadd.f32 %v2778_v43, %v550_v30  ;;  %v2780_v50 = vpop.f32.mrb[43].mxu0  ;;  %v3292_v51 = vpop.f32.mrb[43].mxu1 }
 0x156   : > { %v7215_v34 = vpack.c.bf16 %v4898_v27, %v4898_v27  ;;  %v4643_v47 = vadd.f32 %v8578_v20, %v4380_v42  ;;  %v3867_v49 = vadd.f32 %v3290_v44, %v678_v31  ;;  %v8817_v29 = vld [vmem:[%s9854_s2] ss:$0 sm:$0xff]  ;;  %v7621_v41 = vld [vmem:[%s7855_s28 + $0x270] ss:$8 sps:$4 sm:$0xff]  }
 0x157   : > { %6051 = vst.msk [vmem:[%s8596_s22 + $0x44] sm:$0xf] %vm6033_vm4, %v7087_v33  ;;  %v4771_v54 = vmax.f32 %v4515_v46, 0.0  ;;  %2990 = vmatmul.mubr.bf16.gmra.mrb[148].mxu0 %v7609_v32  ;;  %3502 = vmatmul.mubr.bf16.gmra.mrb[148].mxu1 %v7610_v39  ;;  %v553_v31 = vld [vmem:[#allocation2 + $0xc0] sm:$0xff]  ;;  %v554_v39 = vld [vmem:[#allocation2 + $0xc8] sm:$0xff] }
 0x158   : > { %6179 = vst.msk [vmem:[%s8596_s22 + $0x244] sm:$0xf] %vm6033_vm4, %v7215_v34  ;;  %v4253_v52 = vld [vmem:[#allocation2 + $0x98] sm:$0xff]  ;;  %v4899_v55 = vmax.f32 %v4643_v47, 0.0  ;;  %6720 = vmatprep.mubr.msk.bf16.mxu0 %vm2269_vm0, %v7611_v40  ;;  %6784 = vmatprep.mubr.msk.bf16.mxu1 %vm2269_vm0, %v7613_v45  ;;  %v681_v32 = vld [vmem:[#allocation2 + $0x4c0] sm:$0xff]  ;;  %v682_v40 = vld [vmem:[#allocation2 + $0x4c8] sm:$0xff] }
 0x159   : > { %v4381_v53 = vld [vmem:[#allocation2 + $0x498] sm:$0xff]  ;;  %v4516_v56 = vadd.f32 %v8578_v20, %v4253_v52  ;;  %3996 = vst.msk [vmem:[#allocation2 + $0xa8] sm:$0xff] %vm272_vm3, %v3739_v48  ;;  %4124 = vst.msk [vmem:[#allocation2 + $0x4a8] sm:$0xff] %vm272_vm3, %v3867_v49  ;;  %v7088_v60 = vpack.c.bf16 %v4771_v54, %v4771_v54  ;;  %v7623_v49 = vld [vmem:[%s7855_s28 + $0x284] ss:$8 sps:$4 sm:$0xff]  }
 0x15a   : > { %v4644_v57 = vadd.f32 %v8578_v20, %v4381_v53  ;;  %v7216_v61 = vpack.c.bf16 %v4899_v55, %v4899_v55  ;;  %v2783_v0 = vpop.f32.mrb[44].mxu0  ;;  %v3295_v1 = vpop.f32.mrb[44].mxu1  ;;  %v7622_v48 = vld [vmem:[%s7855_s28 + $0x670] ss:$8 sps:$4 sm:$0xff]   ;;  %v7625_v54 = vld [vmem:[%s7855_s28 + $0x684] ss:$8 sps:$4 sm:$0xff]  }
 0x15b   : > { %v4772_v62 = vmax.f32 %v4516_v56, 0.0  ;;  %6052 = vst.msk [vmem:[%s8596_s22 + $0x48] sm:$0xf] %vm6033_vm4, %v7088_v60  ;;  %v3740_v7 = vadd.f32 %v2783_v0, %v551_v58  ;;  %v3868_v8 = vadd.f32 %v3295_v1, %v679_v59  ;;  %v2785_v9 = vpop.f32.mrb[45].mxu0  ;;  %v3297_v10 = vpop.f32.mrb[45].mxu1 }
 0x15c   : > { %v4900_v63 = vmax.f32 %v4644_v57, 0.0  ;;  %6180 = vst.msk [vmem:[%s8596_s22 + $0x248] sm:$0xf] %vm6033_vm4, %v7216_v61  ;;  %v4254_v13 = vld [vmem:[#allocation2 + $0xa0] sm:$0xff]  ;;  %v2786_v15 = vpop.f32.mrb[46].mxu0  ;;  %v3298_v16 = vpop.f32.mrb[46].mxu1 }
 0x15d   : > { %v7089_v5 = vpack.c.bf16 %v4772_v62, %v4772_v62  ;;  %v4382_v14 = vld [vmem:[#allocation2 + $0x4a0] sm:$0xff]  ;;  %v4517_v18 = vadd.f32 %v8578_v20, %v4254_v13  ;;  %3997 = vst.msk [vmem:[#allocation2 + $0xb0] sm:$0xff] %vm272_vm3, %v3740_v7  ;;  %4125 = vst.msk [vmem:[#allocation2 + $0x4b0] sm:$0xff] %vm272_vm3, %v3868_v8  ;;  %v3741_v21 = vadd.f32 %v2786_v15, %v552_v2  ;;  %v2788_v23 = vpop.f32.mrb[47].mxu0  ;;  %v3300_v24 = vpop.f32.mrb[47].mxu1 }
 0x15e   : > { %v7217_v6 = vpack.c.bf16 %v4900_v63, %v4900_v63  ;;  %v4645_v19 = vadd.f32 %v8578_v20, %v4382_v14  ;;  %v3869_v22 = vadd.f32 %v3298_v16, %v680_v3  ;;  %v555_v3 = vld [vmem:[#allocation2 + $0xd0] sm:$0xff]  ;;  %v7627_v13 = vld [vmem:[%s7855_s28 + $0x280] ss:$8 sps:$4 sm:$0xff]  }
 0x15f   : > { %6053 = vst.msk [vmem:[%s8596_s22 + $0x4c] sm:$0xf] %vm6033_vm4, %v7089_v5  ;;  %v4773_v27 = vmax.f32 %v4517_v18, 0.0  ;;  %2998 = vmatmul.mubr.bf16.gmra.mrb[152].mxu0 %v7615_v4  ;;  %3510 = vmatmul.mubr.bf16.gmra.mrb[152].mxu1 %v7616_v11  ;;  %v683_v4 = vld [vmem:[#allocation2 + $0x4d0] sm:$0xff]  ;;  %v556_v11 = vld [vmem:[#allocation2 + $0xd8] sm:$0xff] }
 0x160   : > { %6181 = vst.msk [vmem:[%s8596_s22 + $0x24c] sm:$0xf] %vm6033_vm4, %v7217_v6  ;;  %v4255_v25 = vld [vmem:[#allocation2 + $0xa8] sm:$0xff]  ;;  %v4901_v28 = vmax.f32 %v4645_v19, 0.0  ;;  %6721 = vmatprep.mubr.msk.bf16.mxu0 %vm2269_vm0, %v7617_v12  ;;  %6785 = vmatprep.mubr.msk.bf16.mxu1 %vm2269_vm0, %v7619_v17  ;;  %v684_v12 = vld [vmem:[#allocation2 + $0x4d8] sm:$0xff] }
 0x161   : > { %v4383_v26 = vld [vmem:[#allocation2 + $0x4a8] sm:$0xff]  ;;  %v4518_v30 = vadd.f32 %v8817_v29, %v4255_v25  ;;  %3998 = vst.msk [vmem:[#allocation2 + $0xb8] sm:$0xff] %vm272_vm3, %v3741_v21  ;;  %4126 = vst.msk [vmem:[#allocation2 + $0x4b8] sm:$0xff] %vm272_vm3, %v3869_v22  ;;  %v7090_v33 = vpack.c.bf16 %v4773_v27, %v4773_v27  ;;  %v7629_v22 = vld [vmem:[%s7855_s28 + $0x294] ss:$8 sps:$4 sm:$0xff]  }
 0x162   : > { %v4646_v20 = vadd.f32 %v8817_v29, %v4383_v26  ;;  %v7218_v34 = vpack.c.bf16 %v4901_v28, %v4901_v28  ;;  %v2791_v37 = vpop.f32.mrb[48].mxu0  ;;  %v3303_v38 = vpop.f32.mrb[48].mxu1  ;;  %v7628_v21 = vld [vmem:[%s7855_s28 + $0x680] ss:$8 sps:$4 sm:$0xff]   ;;  %v7631_v27 = vld [vmem:[%s7855_s28 + $0x694] ss:$8 sps:$4 sm:$0xff]  }
 0x163   : > { %v4774_v35 = vmax.f32 %v4518_v30, 0.0  ;;  %6054 = vst.msk [vmem:[%s8596_s22 + $0x50] sm:$0xf] %vm6033_vm4, %v7090_v33  ;;  %v3742_v44 = vadd.f32 %v2791_v37, %v553_v31  ;;  %v3870_v45 = vadd.f32 %v3303_v38, %v681_v32  ;;  %v2793_v46 = vpop.f32.mrb[49].mxu0  ;;  %v3305_v47 = vpop.f32.mrb[49].mxu1 }
 0x164   : > { %v4902_v36 = vmax.f32 %v4646_v20, 0.0  ;;  %6182 = vst.msk [vmem:[%s8596_s22 + $0x250] sm:$0xf] %vm6033_vm4, %v7218_v34  ;;  %v4256_v50 = vld [vmem:[#allocation2 + $0xb0] sm:$0xff]  ;;  %v2794_v52 = vpop.f32.mrb[50].mxu0  ;;  %v3306_v53 = vpop.f32.mrb[50].mxu1 }
 0x165   : > { %v7091_v42 = vpack.c.bf16 %v4774_v35, %v4774_v35  ;;  %v4384_v51 = vld [vmem:[#allocation2 + $0x4b0] sm:$0xff]  ;;  %v4519_v55 = vadd.f32 %v8817_v29, %v4256_v50  ;;  %3999 = vst.msk [vmem:[#allocation2 + $0xc0] sm:$0xff] %vm272_vm3, %v3742_v44  ;;  %4127 = vst.msk [vmem:[#allocation2 + $0x4c0] sm:$0xff] %vm272_vm3, %v3870_v45  ;;  %v3743_v57 = vadd.f32 %v2794_v52, %v554_v39  ;;  %v2796_v59 = vpop.f32.mrb[51].mxu0  ;;  %v3308_v60 = vpop.f32.mrb[51].mxu1 }
 0x166   : > { %v7219_v43 = vpack.c.bf16 %v4902_v36, %v4902_v36  ;;  %v4647_v56 = vadd.f32 %v8817_v29, %v4384_v51  ;;  %v3871_v58 = vadd.f32 %v3306_v53, %v682_v40  ;;  %v557_v40 = vld [vmem:[#allocation2 + $0xe0] sm:$0xff]  ;;  %v7633_v50 = vld [vmem:[%s7855_s28 + $0x290] ss:$8 sps:$4 sm:$0xff]  }
 0x167   : > { %6055 = vst.msk [vmem:[%s8596_s22 + $0x54] sm:$0xf] %vm6033_vm4, %v7091_v42  ;;  %v4775_v63 = vmax.f32 %v4519_v55, 0.0  ;;  %3006 = vmatmul.mubr.bf16.gmra.mrb[156].mxu0 %v7621_v41  ;;  %3518 = vmatmul.mubr.bf16.gmra.mrb[156].mxu1 %v7622_v48  ;;  %v685_v41 = vld [vmem:[#allocation2 + $0x4e0] sm:$0xff]  ;;  %v558_v48 = vld [vmem:[#allocation2 + $0xe8] sm:$0xff] }
 0x168   : > { %6183 = vst.msk [vmem:[%s8596_s22 + $0x254] sm:$0xf] %vm6033_vm4, %v7219_v43  ;;  %v4257_v61 = vld [vmem:[#allocation2 + $0xb8] sm:$0xff]  ;;  %v4903_v0 = vmax.f32 %v4647_v56, 0.0  ;;  %6722 = vmatprep.mubr.msk.bf16.mxu0 %vm2269_vm0, %v7623_v49  ;;  %6786 = vmatprep.mubr.msk.bf16.mxu1 %vm2269_vm0, %v7625_v54  ;;  %v686_v49 = vld [vmem:[#allocation2 + $0x4e8] sm:$0xff] }
 0x169   : > { %v4385_v62 = vld [vmem:[#allocation2 + $0x4b8] sm:$0xff]  ;;  %v4520_v1 = vadd.f32 %v8817_v29, %v4257_v61  ;;  %4000 = vst.msk [vmem:[#allocation2 + $0xc8] sm:$0xff] %vm272_vm3, %v3743_v57  ;;  %4128 = vst.msk [vmem:[#allocation2 + $0x4c8] sm:$0xff] %vm272_vm3, %v3871_v58  ;;  %v7092_v5 = vpack.c.bf16 %v4775_v63, %v4775_v63  ;;  %v7635_v58 = vld [vmem:[%s7855_s28 + $0x2a4] ss:$8 sps:$4 sm:$0xff]  }
 0x16a   : > { %v4648_v2 = vadd.f32 %v8817_v29, %v4385_v62  ;;  %v7220_v6 = vpack.c.bf16 %v4903_v0, %v4903_v0  ;;  %v2799_v9 = vpop.f32.mrb[52].mxu0  ;;  %v3311_v10 = vpop.f32.mrb[52].mxu1  ;;  %v7634_v57 = vld [vmem:[%s7855_s28 + $0x690] ss:$8 sps:$4 sm:$0xff]   ;;  %v7637_v63 = vld [vmem:[%s7855_s28 + $0x6a4] ss:$8 sps:$4 sm:$0xff]  }
 0x16b   : > { %v4776_v7 = vmax.f32 %v4520_v1, 0.0  ;;  %6056 = vst.msk [vmem:[%s8596_s22 + $0x58] sm:$0xf] %vm6033_vm4, %v7092_v5  ;;  %v3744_v16 = vadd.f32 %v2799_v9, %v555_v3  ;;  %v3872_v17 = vadd.f32 %v3311_v10, %v683_v4  ;;  %v2801_v18 = vpop.f32.mrb[53].mxu0  ;;  %v3313_v19 = vpop.f32.mrb[53].mxu1 }
 0x16c   : > { %v4904_v8 = vmax.f32 %v4648_v2, 0.0  ;;  %6184 = vst.msk [vmem:[%s8596_s22 + $0x258] sm:$0xf] %vm6033_vm4, %v7220_v6  ;;  %v4258_v23 = vld [vmem:[#allocation2 + $0xc0] sm:$0xff]  ;;  %v2802_v25 = vpop.f32.mrb[54].mxu0  ;;  %v3314_v26 = vpop.f32.mrb[54].mxu1 }
 0x16d   : > { %v7093_v14 = vpack.c.bf16 %v4776_v7, %v4776_v7  ;;  %v4386_v24 = vld [vmem:[#allocation2 + $0x4c0] sm:$0xff]  ;;  %v4521_v28 = vadd.f32 %v8817_v29, %v4258_v23  ;;  %4001 = vst.msk [vmem:[#allocation2 + $0xd0] sm:$0xff] %vm272_vm3, %v3744_v16  ;;  %4129 = vst.msk [vmem:[#allocation2 + $0x4d0] sm:$0xff] %vm272_vm3, %v3872_v17  ;;  %v3745_v20 = vadd.f32 %v2802_v25, %v556_v11  ;;  %v2804_v32 = vpop.f32.mrb[55].mxu0  ;;  %v3316_v33 = vpop.f32.mrb[55].mxu1 }
 0x16e   : > { %v7221_v15 = vpack.c.bf16 %v4904_v8, %v4904_v8  ;;  %v4649_v30 = vadd.f32 %v8817_v29, %v4386_v24  ;;  %v3873_v31 = vadd.f32 %v3314_v26, %v684_v12  ;;  %v559_v12 = vld [vmem:[#allocation2 + $0xf0] sm:$0xff]  ;;  %v7639_v23 = vld [vmem:[%s7855_s28 + $0x2a0] ss:$8 sps:$4 sm:$0xff]  }
 0x16f   : > { %6057 = vst.msk [vmem:[%s8596_s22 + $0x5c] sm:$0xf] %vm6033_vm4, %v7093_v14  ;;  %v4777_v36 = vmax.f32 %v4521_v28, 0.0  ;;  %3014 = vmatmul.mubr.bf16.gmra.mrb[160].mxu0 %v7627_v13  ;;  %3526 = vmatmul.mubr.bf16.gmra.mrb[160].mxu1 %v7628_v21  ;;  %v687_v13 = vld [vmem:[#allocation2 + $0x4f0] sm:$0xff]  ;;  %v560_v21 = vld [vmem:[#allocation2 + $0xf8] sm:$0xff] }
 0x170   : > { %6185 = vst.msk [vmem:[%s8596_s22 + $0x25c] sm:$0xf] %vm6033_vm4, %v7221_v15  ;;  %v4259_v34 = vld [vmem:[#allocation2 + $0xc8] sm:$0xff]  ;;  %v4905_v37 = vmax.f32 %v4649_v30, 0.0  ;;  %6723 = vmatprep.mubr.msk.bf16.mxu0 %vm2269_vm0, %v7629_v22  ;;  %6787 = vmatprep.mubr.msk.bf16.mxu1 %vm2269_vm0, %v7631_v27  ;;  %v688_v22 = vld [vmem:[#allocation2 + $0x4f8] sm:$0xff] }
 0x171   : > { %v4387_v35 = vld [vmem:[#allocation2 + $0x4c8] sm:$0xff]  ;;  %v4522_v38 = vadd.f32 %v8817_v29, %v4259_v34  ;;  %4002 = vst.msk [vmem:[#allocation2 + $0xd8] sm:$0xff] %vm272_vm3, %v3745_v20  ;;  %4130 = vst.msk [vmem:[#allocation2 + $0x4d8] sm:$0xff] %vm272_vm3, %v3873_v31  ;;  %v7094_v42 = vpack.c.bf16 %v4777_v36, %v4777_v36  ;;  %v7641_v31 = vld [vmem:[%s7855_s28 + $0x2b4] ss:$8 sps:$4 sm:$0xff]  }
 0x172   : > { %v4650_v39 = vadd.f32 %v8817_v29, %v4387_v35  ;;  %v7222_v43 = vpack.c.bf16 %v4905_v37, %v4905_v37  ;;  %v2807_v46 = vpop.f32.mrb[56].mxu0  ;;  %v3319_v47 = vpop.f32.mrb[56].mxu1  ;;  %v7640_v20 = vld [vmem:[%s7855_s28 + $0x6a0] ss:$8 sps:$4 sm:$0xff]   ;;  %v7643_v36 = vld [vmem:[%s7855_s28 + $0x6b4] ss:$8 sps:$4 sm:$0xff]  }
 0x173   : > { %v4778_v44 = vmax.f32 %v4522_v38, 0.0  ;;  %6058 = vst.msk [vmem:[%s8596_s22 + $0x60] sm:$0xf] %vm6033_vm4, %v7094_v42  ;;  %v3746_v53 = vadd.f32 %v2807_v46, %v557_v40  ;;  %v3874_v54 = vadd.f32 %v3319_v47, %v685_v41  ;;  %v2809_v55 = vpop.f32.mrb[57].mxu0  ;;  %v3321_v56 = vpop.f32.mrb[57].mxu1 }
 0x174   : > { %v4906_v45 = vmax.f32 %v4650_v39, 0.0  ;;  %6186 = vst.msk [vmem:[%s8596_s22 + $0x260] sm:$0xf] %vm6033_vm4, %v7222_v43  ;;  %v4260_v59 = vld [vmem:[#allocation2 + $0xd0] sm:$0xff]  ;;  %v2810_v61 = vpop.f32.mrb[58].mxu0  ;;  %v3322_v62 = vpop.f32.mrb[58].mxu1 }
 0x175   : > { %v7095_v51 = vpack.c.bf16 %v4778_v44, %v4778_v44  ;;  %v4388_v60 = vld [vmem:[#allocation2 + $0x4d0] sm:$0xff]  ;;  %v4523_v0 = vadd.f32 %v8817_v29, %v4260_v59  ;;  %4003 = vst.msk [vmem:[#allocation2 + $0xe0] sm:$0xff] %vm272_vm3, %v3746_v53  ;;  %4131 = vst.msk [vmem:[#allocation2 + $0x4e0] sm:$0xff] %vm272_vm3, %v3874_v54  ;;  %v3747_v2 = vadd.f32 %v2810_v61, %v558_v48  ;;  %v2812_v4 = vpop.f32.mrb[59].mxu0  ;;  %v3324_v5 = vpop.f32.mrb[59].mxu1 }
 0x176   : > { %v7223_v52 = vpack.c.bf16 %v4906_v45, %v4906_v45  ;;  %v4651_v1 = vadd.f32 %v8817_v29, %v4388_v60  ;;  %v3875_v3 = vadd.f32 %v3322_v62, %v686_v49  ;;  %v561_v49 = vld [vmem:[#allocation2 + $0x100] sm:$0xff]  ;;  %v7645_v59 = vld [vmem:[%s7855_s28 + $0x2b0] ss:$8 sps:$4 sm:$0xff]  }
 0x177   : > { %6059 = vst.msk [vmem:[%s8596_s22 + $0x64] sm:$0xf] %vm6033_vm4, %v7095_v51  ;;  %v4779_v8 = vmax.f32 %v4523_v0, 0.0  ;;  %3022 = vmatmul.mubr.bf16.gmra.mrb[164].mxu0 %v7633_v50  ;;  %3534 = vmatmul.mubr.bf16.gmra.mrb[164].mxu1 %v7634_v57  ;;  %v689_v50 = vld [vmem:[#allocation2 + $0x500] sm:$0xff]  ;;  %v562_v57 = vld [vmem:[#allocation2 + $0x108] sm:$0xff] }
 0x178   : > { %6187 = vst.msk [vmem:[%s8596_s22 + $0x264] sm:$0xf] %vm6033_vm4, %v7223_v52  ;;  %v4261_v6 = vld [vmem:[#allocation2 + $0xd8] sm:$0xff]  ;;  %v4907_v9 = vmax.f32 %v4651_v1, 0.0  ;;  %6724 = vmatprep.mubr.msk.bf16.mxu0 %vm2269_vm0, %v7635_v58  ;;  %6788 = vmatprep.mubr.msk.bf16.mxu1 %vm2269_vm0, %v7637_v63  ;;  %v690_v58 = vld [vmem:[#allocation2 + $0x508] sm:$0xff] }
 0x179   : > { %v4389_v7 = vld [vmem:[#allocation2 + $0x4d8] sm:$0xff]  ;;  %v4524_v10 = vadd.f32 %v8817_v29, %v4261_v6  ;;  %4004 = vst.msk [vmem:[#allocation2 + $0xe8] sm:$0xff] %vm272_vm3, %v3747_v2  ;;  %4132 = vst.msk [vmem:[#allocation2 + $0x4e8] sm:$0xff] %vm272_vm3, %v3875_v3  ;;  %v7096_v14 = vpack.c.bf16 %v4779_v8, %v4779_v8  ;;  %v7647_v3 = vld [vmem:[%s7855_s28 + $0x2c4] ss:$8 sps:$4 sm:$0xff]  }
 0x17a   : > { %v4652_v11 = vadd.f32 %v8817_v29, %v4389_v7  ;;  %v7224_v15 = vpack.c.bf16 %v4907_v9, %v4907_v9  ;;  %v2815_v18 = vpop.f32.mrb[60].mxu0  ;;  %v3327_v19 = vpop.f32.mrb[60].mxu1  ;;  %v7646_v2 = vld [vmem:[%s7855_s28 + $0x6b0] ss:$8 sps:$4 sm:$0xff]   ;;  %v7649_v8 = vld [vmem:[%s7855_s28 + $0x6c4] ss:$8 sps:$4 sm:$0xff]  }
 0x17b   : > { %v4780_v16 = vmax.f32 %v4524_v10, 0.0  ;;  %6060 = vst.msk [vmem:[%s8596_s22 + $0x68] sm:$0xf] %vm6033_vm4, %v7096_v14  ;;  %v3748_v26 = vadd.f32 %v2815_v18, %v559_v12  ;;  %v3876_v27 = vadd.f32 %v3327_v19, %v687_v13  ;;  %v2817_v28 = vpop.f32.mrb[61].mxu0  ;;  %v3329_v30 = vpop.f32.mrb[61].mxu1 }
 0x17c   : > { %v4908_v17 = vmax.f32 %v4652_v11, 0.0  ;;  %6188 = vst.msk [vmem:[%s8596_s22 + $0x268] sm:$0xf] %vm6033_vm4, %v7224_v15  ;;  %v4262_v32 = vld [vmem:[#allocation2 + $0xe0] sm:$0xff]  ;;  %v2818_v34 = vpop.f32.mrb[62].mxu0  ;;  %v3330_v35 = vpop.f32.mrb[62].mxu1 }
 0x17d   : > { %v7097_v24 = vpack.c.bf16 %v4780_v16, %v4780_v16  ;;  %v4390_v33 = vld [vmem:[#allocation2 + $0x4e0] sm:$0xff]  ;;  %v4525_v37 = vadd.f32 %v8817_v29, %v4262_v32  ;;  %4005 = vst.msk [vmem:[#allocation2 + $0xf0] sm:$0xff] %vm272_vm3, %v3748_v26  ;;  %4133 = vst.msk [vmem:[#allocation2 + $0x4f0] sm:$0xff] %vm272_vm3, %v3876_v27  ;;  %v3749_v39 = vadd.f32 %v2818_v34, %v560_v21  ;;  %v2820_v41 = vpop.f32.mrb[63].mxu0  ;;  %v3332_v42 = vpop.f32.mrb[63].mxu1 }
 0x17e   : > { %v7225_v25 = vpack.c.bf16 %v4908_v17, %v4908_v17  ;;  %v4653_v38 = vadd.f32 %v8817_v29, %v4390_v33  ;;  %v3877_v40 = vadd.f32 %v3330_v35, %v688_v22  ;;  %v563_v22 = vld [vmem:[#allocation2 + $0x110] sm:$0xff]  ;;  %v7651_v32 = vld [vmem:[%s7855_s28 + $0x2c0] ss:$8 sps:$4 sm:$0xff]  }
 0x17f   : > { %6061 = vst.msk [vmem:[%s8596_s22 + $0x6c] sm:$0xf] %vm6033_vm4, %v7097_v24  ;;  %v4781_v45 = vmax.f32 %v4525_v37, 0.0  ;;  %3030 = vmatmul.mubr.bf16.gmra.mrb[168].mxu0 %v7639_v23  ;;  %3542 = vmatmul.mubr.bf16.gmra.mrb[168].mxu1 %v7640_v20  ;;  %v691_v23 = vld [vmem:[#allocation2 + $0x510] sm:$0xff]  ;;  %v564_v20 = vld [vmem:[#allocation2 + $0x118] sm:$0xff] }
 0x180   : > { %6189 = vst.msk [vmem:[%s8596_s22 + $0x26c] sm:$0xf] %vm6033_vm4, %v7225_v25  ;;  %v4263_v43 = vld [vmem:[#allocation2 + $0xe8] sm:$0xff]  ;;  %v4909_v46 = vmax.f32 %v4653_v38, 0.0  ;;  %6725 = vmatprep.mubr.msk.bf16.mxu0 %vm2269_vm0, %v7641_v31  ;;  %6789 = vmatprep.mubr.msk.bf16.mxu1 %vm2269_vm0, %v7643_v36  ;;  %v692_v31 = vld [vmem:[#allocation2 + $0x518] sm:$0xff] }
 0x181   : > { %v4391_v44 = vld [vmem:[#allocation2 + $0x4e8] sm:$0xff]  ;;  %v4526_v47 = vadd.f32 %v8817_v29, %v4263_v43  ;;  %4006 = vst.msk [vmem:[#allocation2 + $0xf8] sm:$0xff] %vm272_vm3, %v3749_v39  ;;  %4134 = vst.msk [vmem:[#allocation2 + $0x4f8] sm:$0xff] %vm272_vm3, %v3877_v40  ;;  %v7098_v51 = vpack.c.bf16 %v4781_v45, %v4781_v45  ;;  %v7653_v40 = vld [vmem:[%s7855_s28 + $0x2d4] ss:$8 sps:$4 sm:$0xff]  }
 0x182   : > { %v4654_v48 = vadd.f32 %v8817_v29, %v4391_v44  ;;  %v7226_v52 = vpack.c.bf16 %v4909_v46, %v4909_v46  ;;  %v2823_v55 = vpop.f32.mrb[64].mxu0  ;;  %v3335_v56 = vpop.f32.mrb[64].mxu1  ;;  %v7652_v39 = vld [vmem:[%s7855_s28 + $0x6c0] ss:$8 sps:$4 sm:$0xff]   ;;  %v7655_v45 = vld [vmem:[%s7855_s28 + $0x6d4] ss:$8 sps:$4 sm:$0xff]  }
 0x183   : > { %v4782_v53 = vmax.f32 %v4526_v47, 0.0  ;;  %6062 = vst.msk [vmem:[%s8596_s22 + $0x70] sm:$0xf] %vm6033_vm4, %v7098_v51  ;;  %v3750_v62 = vadd.f32 %v2823_v55, %v561_v49  ;;  %v3878_v63 = vadd.f32 %v3335_v56, %v689_v50  ;;  %v2825_v0 = vpop.f32.mrb[65].mxu0  ;;  %v3337_v1 = vpop.f32.mrb[65].mxu1 }
 0x184   : > { %v4910_v54 = vmax.f32 %v4654_v48, 0.0  ;;  %6190 = vst.msk [vmem:[%s8596_s22 + $0x270] sm:$0xf] %vm6033_vm4, %v7226_v52  ;;  %v4264_v4 = vld [vmem:[#allocation2 + $0xf0] sm:$0xff]  ;;  %v2826_v6 = vpop.f32.mrb[66].mxu0  ;;  %v3338_v7 = vpop.f32.mrb[66].mxu1 }
 0x185   : > { %v7099_v60 = vpack.c.bf16 %v4782_v53, %v4782_v53  ;;  %v4392_v5 = vld [vmem:[#allocation2 + $0x4f0] sm:$0xff]  ;;  %v4527_v9 = vadd.f32 %v8817_v29, %v4264_v4  ;;  %4007 = vst.msk [vmem:[#allocation2 + $0x100] sm:$0xff] %vm272_vm3, %v3750_v62  ;;  %4135 = vst.msk [vmem:[#allocation2 + $0x500] sm:$0xff] %vm272_vm3, %v3878_v63  ;;  %v3751_v11 = vadd.f32 %v2826_v6, %v562_v57  ;;  %v2828_v13 = vpop.f32.mrb[67].mxu0  ;;  %v3340_v14 = vpop.f32.mrb[67].mxu1 }
 0x186   : > { %v7227_v61 = vpack.c.bf16 %v4910_v54, %v4910_v54  ;;  %v4655_v10 = vadd.f32 %v8817_v29, %v4392_v5  ;;  %v3879_v12 = vadd.f32 %v3338_v7, %v690_v58  ;;  %v565_v58 = vld [vmem:[#allocation2 + $0x120] sm:$0xff]  ;;  %v7657_v4 = vld [vmem:[%s7855_s28 + $0x2d0] ss:$8 sps:$4 sm:$0xff]  }
 0x187   : > { %6063 = vst.msk [vmem:[%s8596_s22 + $0x74] sm:$0xf] %vm6033_vm4, %v7099_v60  ;;  %v4783_v17 = vmax.f32 %v4527_v9, 0.0  ;;  %3038 = vmatmul.mubr.bf16.gmra.mrb[172].mxu0 %v7645_v59  ;;  %3550 = vmatmul.mubr.bf16.gmra.mrb[172].mxu1 %v7646_v2  ;;  %v693_v59 = vld [vmem:[#allocation2 + $0x520] sm:$0xff]  ;;  %v566_v2 = vld [vmem:[#allocation2 + $0x128] sm:$0xff] }
 0x188   : > { %6191 = vst.msk [vmem:[%s8596_s22 + $0x274] sm:$0xf] %vm6033_vm4, %v7227_v61  ;;  %v4265_v15 = vld [vmem:[#allocation2 + $0xf8] sm:$0xff]  ;;  %v4911_v18 = vmax.f32 %v4655_v10, 0.0  ;;  %6726 = vmatprep.mubr.msk.bf16.mxu0 %vm2269_vm0, %v7647_v3  ;;  %6790 = vmatprep.mubr.msk.bf16.mxu1 %vm2269_vm0, %v7649_v8  ;;  %v694_v3 = vld [vmem:[#allocation2 + $0x528] sm:$0xff] }
 0x189   : > { %v4393_v16 = vld [vmem:[#allocation2 + $0x4f8] sm:$0xff]  ;;  %v4528_v19 = vadd.f32 %v8817_v29, %v4265_v15  ;;  %4008 = vst.msk [vmem:[#allocation2 + $0x108] sm:$0xff] %vm272_vm3, %v3751_v11  ;;  %4136 = vst.msk [vmem:[#allocation2 + $0x508] sm:$0xff] %vm272_vm3, %v3879_v12  ;;  %v7100_v24 = vpack.c.bf16 %v4783_v17, %v4783_v17  ;;  %v7659_v12 = vld [vmem:[%s7855_s28 + $0x2e4] ss:$8 sps:$4 sm:$0xff]  }
 0x18a   : > { %v4656_v21 = vadd.f32 %v8817_v29, %v4393_v16  ;;  %v7228_v25 = vpack.c.bf16 %v4911_v18, %v4911_v18  ;;  %v2831_v28 = vpop.f32.mrb[68].mxu0  ;;  %v3343_v30 = vpop.f32.mrb[68].mxu1  ;;  %v7658_v11 = vld [vmem:[%s7855_s28 + $0x6d0] ss:$8 sps:$4 sm:$0xff]   ;;  %v7661_v17 = vld [vmem:[%s7855_s28 + $0x6e4] ss:$8 sps:$4 sm:$0xff]  }
 0x18b   : > { %v4784_v26 = vmax.f32 %v4528_v19, 0.0  ;;  %6064 = vst.msk [vmem:[%s8596_s22 + $0x78] sm:$0xf] %vm6033_vm4, %v7100_v24  ;;  %v3752_v35 = vadd.f32 %v2831_v28, %v563_v22  ;;  %v3880_v36 = vadd.f32 %v3343_v30, %v691_v23  ;;  %v2833_v37 = vpop.f32.mrb[69].mxu0  ;;  %v3345_v38 = vpop.f32.mrb[69].mxu1 }
 0x18c   : > { %v4912_v27 = vmax.f32 %v4656_v21, 0.0  ;;  %6192 = vst.msk [vmem:[%s8596_s22 + $0x278] sm:$0xf] %vm6033_vm4, %v7228_v25  ;;  %v4266_v41 = vld [vmem:[#allocation2 + $0x100] sm:$0xff]  ;;  %v2834_v43 = vpop.f32.mrb[70].mxu0  ;;  %v3346_v44 = vpop.f32.mrb[70].mxu1 }
 0x18d   : > { %v7101_v33 = vpack.c.bf16 %v4784_v26, %v4784_v26  ;;  %v4394_v42 = vld [vmem:[#allocation2 + $0x500] sm:$0xff]  ;;  %v4529_v46 = vadd.f32 %v8817_v29, %v4266_v41  ;;  %4009 = vst.msk [vmem:[#allocation2 + $0x110] sm:$0xff] %vm272_vm3, %v3752_v35  ;;  %4137 = vst.msk [vmem:[#allocation2 + $0x510] sm:$0xff] %vm272_vm3, %v3880_v36  ;;  %v3753_v48 = vadd.f32 %v2834_v43, %v564_v20  ;;  %v2836_v50 = vpop.f32.mrb[71].mxu0  ;;  %v3348_v51 = vpop.f32.mrb[71].mxu1 }
 0x18e   : > { %v7229_v34 = vpack.c.bf16 %v4912_v27, %v4912_v27  ;;  %v4657_v47 = vadd.f32 %v8817_v29, %v4394_v42  ;;  %v3881_v49 = vadd.f32 %v3346_v44, %v692_v31  ;;  %v567_v31 = vld [vmem:[#allocation2 + $0x130] sm:$0xff]  ;;  %v7663_v41 = vld [vmem:[%s7855_s28 + $0x2e0] ss:$8 sps:$4 sm:$0xff]  }
 0x18f   : > { %6065 = vst.msk [vmem:[%s8596_s22 + $0x7c] sm:$0xf] %vm6033_vm4, %v7101_v33  ;;  %v4785_v54 = vmax.f32 %v4529_v46, 0.0  ;;  %3046 = vmatmul.mubr.bf16.gmra.mrb[176].mxu0 %v7651_v32  ;;  %3558 = vmatmul.mubr.bf16.gmra.mrb[176].mxu1 %v7652_v39  ;;  %v695_v32 = vld [vmem:[#allocation2 + $0x530] sm:$0xff]  ;;  %v568_v39 = vld [vmem:[#allocation2 + $0x138] sm:$0xff] }
 0x190   : > { %6193 = vst.msk [vmem:[%s8596_s22 + $0x27c] sm:$0xf] %vm6033_vm4, %v7229_v34  ;;  %v4267_v52 = vld [vmem:[#allocation2 + $0x108] sm:$0xff]  ;;  %v4913_v55 = vmax.f32 %v4657_v47, 0.0  ;;  %6727 = vmatprep.mubr.msk.bf16.mxu0 %vm2269_vm0, %v7653_v40  ;;  %6791 = vmatprep.mubr.msk.bf16.mxu1 %vm2269_vm0, %v7655_v45  ;;  %v696_v40 = vld [vmem:[#allocation2 + $0x538] sm:$0xff] }
 0x191   : > { %v4395_v53 = vld [vmem:[#allocation2 + $0x508] sm:$0xff]  ;;  %v4530_v56 = vadd.f32 %v8817_v29, %v4267_v52  ;;  %4010 = vst.msk [vmem:[#allocation2 + $0x118] sm:$0xff] %vm272_vm3, %v3753_v48  ;;  %4138 = vst.msk [vmem:[#allocation2 + $0x518] sm:$0xff] %vm272_vm3, %v3881_v49  ;;  %v7102_v60 = vpack.c.bf16 %v4785_v54, %v4785_v54  ;;  %v7665_v49 = vld [vmem:[%s7855_s28 + $0x2f4] ss:$8 sps:$4 sm:$0xff]  }
 0x192   : > { %v4658_v57 = vadd.f32 %v8817_v29, %v4395_v53  ;;  %v7230_v61 = vpack.c.bf16 %v4913_v55, %v4913_v55  ;;  %v2839_v0 = vpop.f32.mrb[72].mxu0  ;;  %v3351_v1 = vpop.f32.mrb[72].mxu1  ;;  %v7664_v48 = vld [vmem:[%s7855_s28 + $0x6e0] ss:$8 sps:$4 sm:$0xff]   ;;  %v7667_v54 = vld [vmem:[%s7855_s28 + $0x6f4] ss:$8 sps:$4 sm:$0xff]  }
 0x193   : > { %v4786_v62 = vmax.f32 %v4530_v56, 0.0  ;;  %6066 = vst.msk [vmem:[%s8596_s22 + $0x80] sm:$0xf] %vm6033_vm4, %v7102_v60  ;;  %v3754_v7 = vadd.f32 %v2839_v0, %v565_v58  ;;  %v3882_v8 = vadd.f32 %v3351_v1, %v693_v59  ;;  %v2841_v9 = vpop.f32.mrb[73].mxu0  ;;  %v3353_v10 = vpop.f32.mrb[73].mxu1 }
 0x194   : > { %v4914_v63 = vmax.f32 %v4658_v57, 0.0  ;;  %6194 = vst.msk [vmem:[%s8596_s22 + $0x280] sm:$0xf] %vm6033_vm4, %v7230_v61  ;;  %v4268_v13 = vld [vmem:[#allocation2 + $0x110] sm:$0xff]  ;;  %v2842_v15 = vpop.f32.mrb[74].mxu0  ;;  %v3354_v16 = vpop.f32.mrb[74].mxu1 }
 0x195   : > { %v7103_v5 = vpack.c.bf16 %v4786_v62, %v4786_v62  ;;  %v4396_v14 = vld [vmem:[#allocation2 + $0x510] sm:$0xff]  ;;  %v4531_v18 = vadd.f32 %v8817_v29, %v4268_v13  ;;  %4011 = vst.msk [vmem:[#allocation2 + $0x120] sm:$0xff] %vm272_vm3, %v3754_v7  ;;  %4139 = vst.msk [vmem:[#allocation2 + $0x520] sm:$0xff] %vm272_vm3, %v3882_v8  ;;  %v3755_v21 = vadd.f32 %v2842_v15, %v566_v2  ;;  %v2844_v23 = vpop.f32.mrb[75].mxu0  ;;  %v3356_v24 = vpop.f32.mrb[75].mxu1 }
 0x196   : > { %v7231_v6 = vpack.c.bf16 %v4914_v63, %v4914_v63  ;;  %v4659_v19 = vadd.f32 %v8817_v29, %v4396_v14  ;;  %v3883_v22 = vadd.f32 %v3354_v16, %v694_v3  ;;  %v569_v3 = vld [vmem:[#allocation2 + $0x140] sm:$0xff]  ;;  %v7669_v13 = vld [vmem:[%s7855_s28 + $0x2f0] ss:$8 sps:$4 sm:$0xff]  }
 0x197   : > { %6067 = vst.msk [vmem:[%s8596_s22 + $0x84] sm:$0xf] %vm6033_vm4, %v7103_v5  ;;  %v4787_v27 = vmax.f32 %v4531_v18, 0.0  ;;  %3054 = vmatmul.mubr.bf16.gmra.mrb[180].mxu0 %v7657_v4  ;;  %3566 = vmatmul.mubr.bf16.gmra.mrb[180].mxu1 %v7658_v11  ;;  %v697_v4 = vld [vmem:[#allocation2 + $0x540] sm:$0xff]  ;;  %v570_v11 = vld [vmem:[#allocation2 + $0x148] sm:$0xff] }
 0x198   : > { %6195 = vst.msk [vmem:[%s8596_s22 + $0x284] sm:$0xf] %vm6033_vm4, %v7231_v6  ;;  %v4269_v25 = vld [vmem:[#allocation2 + $0x118] sm:$0xff]  ;;  %v4915_v28 = vmax.f32 %v4659_v19, 0.0  ;;  %6728 = vmatprep.mubr.msk.bf16.mxu0 %vm2269_vm0, %v7659_v12  ;;  %6792 = vmatprep.mubr.msk.bf16.mxu1 %vm2269_vm0, %v7661_v17  ;;  %v698_v12 = vld [vmem:[#allocation2 + $0x548] sm:$0xff] }
 0x199   : > { %v4397_v26 = vld [vmem:[#allocation2 + $0x518] sm:$0xff]  ;;  %v4532_v30 = vadd.f32 %v8817_v29, %v4269_v25  ;;  %4012 = vst.msk [vmem:[#allocation2 + $0x128] sm:$0xff] %vm272_vm3, %v3755_v21  ;;  %4140 = vst.msk [vmem:[#allocation2 + $0x528] sm:$0xff] %vm272_vm3, %v3883_v22  ;;  %v7104_v33 = vpack.c.bf16 %v4787_v27, %v4787_v27  ;;  %v7671_v22 = vld [vmem:[%s7855_s28 + $0x304] ss:$8 sps:$4 sm:$0xff]  }
 0x19a   : > { %v4660_v20 = vadd.f32 %v8817_v29, %v4397_v26  ;;  %v7232_v34 = vpack.c.bf16 %v4915_v28, %v4915_v28  ;;  %v2847_v37 = vpop.f32.mrb[76].mxu0  ;;  %v3359_v38 = vpop.f32.mrb[76].mxu1  ;;  %v7670_v21 = vld [vmem:[%s7855_s28 + $0x6f0] ss:$8 sps:$4 sm:$0xff]   ;;  %v7673_v27 = vld [vmem:[%s7855_s28 + $0x704] ss:$8 sps:$4 sm:$0xff]  }
 0x19b   : > { %v4788_v35 = vmax.f32 %v4532_v30, 0.0  ;;  %6068 = vst.msk [vmem:[%s8596_s22 + $0x88] sm:$0xf] %vm6033_vm4, %v7104_v33  ;;  %v3756_v44 = vadd.f32 %v2847_v37, %v567_v31  ;;  %v3884_v45 = vadd.f32 %v3359_v38, %v695_v32  ;;  %v2849_v46 = vpop.f32.mrb[77].mxu0  ;;  %v3361_v47 = vpop.f32.mrb[77].mxu1 }
 0x19c   : > { %v4916_v36 = vmax.f32 %v4660_v20, 0.0  ;;  %6196 = vst.msk [vmem:[%s8596_s22 + $0x288] sm:$0xf] %vm6033_vm4, %v7232_v34  ;;  %v4270_v50 = vld [vmem:[#allocation2 + $0x120] sm:$0xff]  ;;  %v2850_v52 = vpop.f32.mrb[78].mxu0  ;;  %v3362_v53 = vpop.f32.mrb[78].mxu1 }
 0x19d   : > { %v7105_v42 = vpack.c.bf16 %v4788_v35, %v4788_v35  ;;  %v4398_v51 = vld [vmem:[#allocation2 + $0x520] sm:$0xff]  ;;  %v4533_v55 = vadd.f32 %v8817_v29, %v4270_v50  ;;  %4013 = vst.msk [vmem:[#allocation2 + $0x130] sm:$0xff] %vm272_vm3, %v3756_v44  ;;  %4141 = vst.msk [vmem:[#allocation2 + $0x530] sm:$0xff] %vm272_vm3, %v3884_v45  ;;  %v3757_v57 = vadd.f32 %v2850_v52, %v568_v39  ;;  %v2852_v59 = vpop.f32.mrb[79].mxu0  ;;  %v3364_v60 = vpop.f32.mrb[79].mxu1 }
 0x19e   : > { %v7233_v43 = vpack.c.bf16 %v4916_v36, %v4916_v36  ;;  %v4661_v56 = vadd.f32 %v8817_v29, %v4398_v51  ;;  %v3885_v58 = vadd.f32 %v3362_v53, %v696_v40  ;;  %v571_v40 = vld [vmem:[#allocation2 + $0x150] sm:$0xff]  ;;  %v7675_v50 = vld [vmem:[%s7855_s28 + $0x300] ss:$8 sps:$4 sm:$0xff]  }
 0x19f   : > { %6069 = vst.msk [vmem:[%s8596_s22 + $0x8c] sm:$0xf] %vm6033_vm4, %v7105_v42  ;;  %v4789_v63 = vmax.f32 %v4533_v55, 0.0  ;;  %3062 = vmatmul.mubr.bf16.gmra.mrb[184].mxu0 %v7663_v41  ;;  %3574 = vmatmul.mubr.bf16.gmra.mrb[184].mxu1 %v7664_v48  ;;  %v699_v41 = vld [vmem:[#allocation2 + $0x550] sm:$0xff]  ;;  %v572_v48 = vld [vmem:[#allocation2 + $0x158] sm:$0xff] }
 0x1a0   : > { %6197 = vst.msk [vmem:[%s8596_s22 + $0x28c] sm:$0xf] %vm6033_vm4, %v7233_v43  ;;  %v4271_v61 = vld [vmem:[#allocation2 + $0x128] sm:$0xff]  ;;  %v4917_v0 = vmax.f32 %v4661_v56, 0.0  ;;  %6729 = vmatprep.mubr.msk.bf16.mxu0 %vm2269_vm0, %v7665_v49  ;;  %6793 = vmatprep.mubr.msk.bf16.mxu1 %vm2269_vm0, %v7667_v54  ;;  %v700_v49 = vld [vmem:[#allocation2 + $0x558] sm:$0xff] }
 0x1a1   : > { %v4399_v62 = vld [vmem:[#allocation2 + $0x528] sm:$0xff]  ;;  %v4534_v1 = vadd.f32 %v8817_v29, %v4271_v61  ;;  %4014 = vst.msk [vmem:[#allocation2 + $0x138] sm:$0xff] %vm272_vm3, %v3757_v57  ;;  %4142 = vst.msk [vmem:[#allocation2 + $0x538] sm:$0xff] %vm272_vm3, %v3885_v58  ;;  %v7106_v5 = vpack.c.bf16 %v4789_v63, %v4789_v63  ;;  %v7677_v58 = vld [vmem:[%s7855_s28 + $0x314] ss:$8 sps:$4 sm:$0xff]  }
 0x1a2   : > { %v4662_v2 = vadd.f32 %v8817_v29, %v4399_v62  ;;  %v7234_v6 = vpack.c.bf16 %v4917_v0, %v4917_v0  ;;  %v2855_v9 = vpop.f32.mrb[80].mxu0  ;;  %v3367_v10 = vpop.f32.mrb[80].mxu1  ;;  %v7676_v57 = vld [vmem:[%s7855_s28 + $0x700] ss:$8 sps:$4 sm:$0xff]   ;;  %v7679_v63 = vld [vmem:[%s7855_s28 + $0x714] ss:$8 sps:$4 sm:$0xff]  }
 0x1a3   : > { %v4790_v7 = vmax.f32 %v4534_v1, 0.0  ;;  %6070 = vst.msk [vmem:[%s8596_s22 + $0x90] sm:$0xf] %vm6033_vm4, %v7106_v5  ;;  %v3758_v16 = vadd.f32 %v2855_v9, %v569_v3  ;;  %v3886_v17 = vadd.f32 %v3367_v10, %v697_v4  ;;  %v2857_v18 = vpop.f32.mrb[81].mxu0  ;;  %v3369_v19 = vpop.f32.mrb[81].mxu1 }
 0x1a4   : > { %v4918_v8 = vmax.f32 %v4662_v2, 0.0  ;;  %6198 = vst.msk [vmem:[%s8596_s22 + $0x290] sm:$0xf] %vm6033_vm4, %v7234_v6  ;;  %v4272_v23 = vld [vmem:[#allocation2 + $0x130] sm:$0xff]  ;;  %v2858_v25 = vpop.f32.mrb[82].mxu0  ;;  %v3370_v26 = vpop.f32.mrb[82].mxu1 }
 0x1a5   : > { %v7107_v14 = vpack.c.bf16 %v4790_v7, %v4790_v7  ;;  %v4400_v24 = vld [vmem:[#allocation2 + $0x530] sm:$0xff]  ;;  %v4535_v28 = vadd.f32 %v8817_v29, %v4272_v23  ;;  %4015 = vst.msk [vmem:[#allocation2 + $0x140] sm:$0xff] %vm272_vm3, %v3758_v16  ;;  %4143 = vst.msk [vmem:[#allocation2 + $0x540] sm:$0xff] %vm272_vm3, %v3886_v17  ;;  %v3759_v20 = vadd.f32 %v2858_v25, %v570_v11  ;;  %v2860_v32 = vpop.f32.mrb[83].mxu0  ;;  %v3372_v33 = vpop.f32.mrb[83].mxu1  ;;  %v574_v19 = vld [vmem:[#allocation2 + $0x168] sm:$0xff] }
 0x1a6   : > { %v7235_v15 = vpack.c.bf16 %v4918_v8, %v4918_v8  ;;  %v4663_v30 = vadd.f32 %v8817_v29, %v4400_v24  ;;  %v3887_v31 = vadd.f32 %v3370_v26, %v698_v12  ;;  %v573_v12 = vld [vmem:[#allocation2 + $0x160] sm:$0xff] }
 0x1a7   : > { %6071 = vst.msk [vmem:[%s8596_s22 + $0x94] sm:$0xf] %vm6033_vm4, %v7107_v14  ;;  %v4791_v36 = vmax.f32 %v4535_v28, 0.0  ;;  %3070 = vmatmul.mubr.bf16.gmra.mrb[188].mxu0 %v7669_v13  ;;  %3582 = vmatmul.mubr.bf16.gmra.mrb[188].mxu1 %v7670_v21  ;;  %v701_v13 = vld [vmem:[#allocation2 + $0x560] sm:$0xff]  ;;  %v702_v21 = vld [vmem:[#allocation2 + $0x568] sm:$0xff] }
 0x1a8   : > { %6199 = vst.msk [vmem:[%s8596_s22 + $0x294] sm:$0xf] %vm6033_vm4, %v7235_v15  ;;  %v4273_v34 = vld [vmem:[#allocation2 + $0x138] sm:$0xff]  ;;  %v4919_v37 = vmax.f32 %v4663_v30, 0.0  ;;  %6730 = vmatprep.mubr.msk.bf16.mxu0 %vm2269_vm0, %v7671_v22  ;;  %6794 = vmatprep.mubr.msk.bf16.mxu1 %vm2269_vm0, %v7673_v27 }
 0x1a9   : > { %v4401_v35 = vld [vmem:[#allocation2 + $0x538] sm:$0xff]  ;;  %v4536_v38 = vadd.f32 %v8817_v29, %v4273_v34  ;;  %4016 = vst.msk [vmem:[#allocation2 + $0x148] sm:$0xff] %vm272_vm3, %v3759_v20  ;;  %4144 = vst.msk [vmem:[#allocation2 + $0x548] sm:$0xff] %vm272_vm3, %v3887_v31  ;;  %v7108_v42 = vpack.c.bf16 %v4791_v36, %v4791_v36  ;;  %v7683_v20 = vld [vmem:[%s7855_s28 + $0x324] ss:$8 sps:$4 sm:$0xff]  }
 0x1aa   : > { %v4664_v39 = vadd.f32 %v8817_v29, %v4401_v35  ;;  %v7236_v43 = vpack.c.bf16 %v4919_v37, %v4919_v37  ;;  %v2863_v46 = vpop.f32.mrb[84].mxu0  ;;  %v3375_v47 = vpop.f32.mrb[84].mxu1  ;;  %v7681_v22 = vld [vmem:[%s7855_s28 + $0x310] ss:$8 sps:$4 sm:$0xff]   ;;  %v7685_v35 = vld [vmem:[%s7855_s28 + $0x724] ss:$8 sps:$4 sm:$0xff]  }
 0x1ab   : > { %v4792_v44 = vmax.f32 %v4536_v38, 0.0  ;;  %6072 = vst.msk [vmem:[%s8596_s22 + $0x98] sm:$0xf] %vm6033_vm4, %v7108_v42  ;;  %v3760_v53 = vadd.f32 %v2863_v46, %v571_v40  ;;  %v3888_v54 = vadd.f32 %v3375_v47, %v699_v41  ;;  %v2865_v55 = vpop.f32.mrb[85].mxu0  ;;  %v3377_v56 = vpop.f32.mrb[85].mxu1 }
 0x1ac   : > { %v4920_v45 = vmax.f32 %v4664_v39, 0.0  ;;  %6200 = vst.msk [vmem:[%s8596_s22 + $0x298] sm:$0xf] %vm6033_vm4, %v7236_v43  ;;  %v4274_v59 = vld [vmem:[#allocation2 + $0x140] sm:$0xff]  ;;  %v2866_v61 = vpop.f32.mrb[86].mxu0  ;;  %v3378_v62 = vpop.f32.mrb[86].mxu1 }
 0x1ad   : > { %v7109_v51 = vpack.c.bf16 %v4792_v44, %v4792_v44  ;;  %v4402_v60 = vld [vmem:[#allocation2 + $0x540] sm:$0xff]  ;;  %v4537_v0 = vadd.f32 %v8817_v29, %v4274_v59  ;;  %4017 = vst.msk [vmem:[#allocation2 + $0x150] sm:$0xff] %vm272_vm3, %v3760_v53  ;;  %4145 = vst.msk [vmem:[#allocation2 + $0x550] sm:$0xff] %vm272_vm3, %v3888_v54  ;;  %v3761_v2 = vadd.f32 %v2866_v61, %v572_v48  ;;  %v2868_v4 = vpop.f32.mrb[87].mxu0  ;;  %v3380_v5 = vpop.f32.mrb[87].mxu1 }
 0x1ae   : > { %v7237_v52 = vpack.c.bf16 %v4920_v45, %v4920_v45  ;;  %v4665_v1 = vadd.f32 %v8817_v29, %v4402_v60  ;;  %v3889_v3 = vadd.f32 %v3378_v62, %v700_v49  ;;  %v7682_v30 = vld [vmem:[%s7855_s28 + $0x710] ss:$8 sps:$4 sm:$0xff]   ;;  %v9060_v36 = vld [vmem:[%s9854_s2] ss:$0 sm:$0xff] }
 0x1af   : > { %6073 = vst.msk [vmem:[%s8596_s22 + $0x9c] sm:$0xf] %vm6033_vm4, %v7109_v51  ;;  %v4793_v8 = vmax.f32 %v4537_v0, 0.0  ;;  %3078 = vmatmul.mubr.bf16.gmra.mrb[192].mxu0 %v7675_v50  ;;  %3590 = vmatmul.mubr.bf16.gmra.mrb[192].mxu1 %v7676_v57  ;;  %v575_v49 = vld [vmem:[#allocation2 + $0x170] sm:$0xff]  ;;  %v576_v57 = vld [vmem:[#allocation2 + $0x178] sm:$0xff] }
 0x1b0   : > { %6201 = vst.msk [vmem:[%s8596_s22 + $0x29c] sm:$0xf] %vm6033_vm4, %v7237_v52  ;;  %v4275_v6 = vld [vmem:[#allocation2 + $0x148] sm:$0xff]  ;;  %v4921_v9 = vmax.f32 %v4665_v1, 0.0  ;;  %6731 = vmatprep.mubr.msk.bf16.mxu0 %vm2269_vm0, %v7677_v58  ;;  %6795 = vmatprep.mubr.msk.bf16.mxu1 %vm2269_vm0, %v7679_v63  ;;  %v703_v50 = vld [vmem:[#allocation2 + $0x570] sm:$0xff]  ;;  %v704_v58 = vld [vmem:[#allocation2 + $0x578] sm:$0xff] }
 0x1b1   : > { %v4403_v7 = vld [vmem:[#allocation2 + $0x548] sm:$0xff]  ;;  %v4538_v10 = vadd.f32 %v8817_v29, %v4275_v6  ;;  %4018 = vst.msk [vmem:[#allocation2 + $0x158] sm:$0xff] %vm272_vm3, %v3761_v2  ;;  %4146 = vst.msk [vmem:[#allocation2 + $0x558] sm:$0xff] %vm272_vm3, %v3889_v3  ;;  %v7110_v14 = vpack.c.bf16 %v4793_v8, %v4793_v8  ;;  %v7689_v3 = vld [vmem:[%s7855_s28 + $0x334] ss:$8 sps:$4 sm:$0xff]  }
 0x1b2   : > { %v4666_v11 = vadd.f32 %v8817_v29, %v4403_v7  ;;  %v7238_v15 = vpack.c.bf16 %v4921_v9, %v4921_v9  ;;  %v2871_v17 = vpop.f32.mrb[88].mxu0  ;;  %v3383_v18 = vpop.f32.mrb[88].mxu1  ;;  %v7687_v59 = vld [vmem:[%s7855_s28 + $0x320] ss:$8 sps:$4 sm:$0xff]   ;;  %v7691_v8 = vld [vmem:[%s7855_s28 + $0x734] ss:$8 sps:$4 sm:$0xff]  }
 0x1b3   : > { %v4794_v16 = vmax.f32 %v4538_v10, 0.0  ;;  %6074 = vst.msk [vmem:[%s8596_s22 + $0xa0] sm:$0xf] %vm6033_vm4, %v7110_v14  ;;  %v3762_v25 = vadd.f32 %v2871_v17, %v573_v12  ;;  %v3890_v26 = vadd.f32 %v3383_v18, %v701_v13  ;;  %v2873_v27 = vpop.f32.mrb[89].mxu0  ;;  %v3385_v28 = vpop.f32.mrb[89].mxu1 }
 0x1b4   : > { %v4922_v29 = vmax.f32 %v4666_v11, 0.0  ;;  %6202 = vst.msk [vmem:[%s8596_s22 + $0x2a0] sm:$0xf] %vm6033_vm4, %v7238_v15  ;;  %v4276_v31 = vld [vmem:[#allocation2 + $0x150] sm:$0xff]  ;;  %v2874_v33 = vpop.f32.mrb[90].mxu0  ;;  %v3386_v34 = vpop.f32.mrb[90].mxu1 }
 0x1b5   : > { %v7111_v23 = vpack.c.bf16 %v4794_v16, %v4794_v16  ;;  %v4404_v32 = vld [vmem:[#allocation2 + $0x550] sm:$0xff]  ;;  %v4539_v37 = vadd.f32 %v9060_v36, %v4276_v31  ;;  %4019 = vst.msk [vmem:[#allocation2 + $0x160] sm:$0xff] %vm272_vm3, %v3762_v25  ;;  %4147 = vst.msk [vmem:[#allocation2 + $0x560] sm:$0xff] %vm272_vm3, %v3890_v26  ;;  %v3763_v39 = vadd.f32 %v2874_v33, %v574_v19  ;;  %v2876_v41 = vpop.f32.mrb[91].mxu0  ;;  %v3388_v42 = vpop.f32.mrb[91].mxu1 }
 0x1b6   : > { %v7239_v24 = vpack.c.bf16 %v4922_v29, %v4922_v29  ;;  %v4667_v38 = vadd.f32 %v9060_v36, %v4404_v32  ;;  %v3891_v40 = vadd.f32 %v3386_v34, %v702_v21  ;;  %v7688_v2 = vld [vmem:[%s7855_s28 + $0x720] ss:$8 sps:$4 sm:$0xff]   ;;  %v7693_v31 = vld [vmem:[%s7855_s28 + $0x330] ss:$8 sps:$4 sm:$0xff]  }
 0x1b7   : > { %6075 = vst.msk [vmem:[%s8596_s22 + $0xa4] sm:$0xf] %vm6033_vm4, %v7111_v23  ;;  %v4795_v45 = vmax.f32 %v4539_v37, 0.0  ;;  %3086 = vmatmul.mubr.bf16.gmra.mrb[196].mxu0 %v7681_v22  ;;  %3598 = vmatmul.mubr.bf16.gmra.mrb[196].mxu1 %v7682_v30  ;;  %v577_v21 = vld [vmem:[#allocation2 + $0x180] sm:$0xff]  ;;  %v578_v30 = vld [vmem:[#allocation2 + $0x188] sm:$0xff] }
 0x1b8   : > { %6203 = vst.msk [vmem:[%s8596_s22 + $0x2a4] sm:$0xf] %vm6033_vm4, %v7239_v24  ;;  %v4277_v43 = vld [vmem:[#allocation2 + $0x158] sm:$0xff]  ;;  %v4923_v46 = vmax.f32 %v4667_v38, 0.0  ;;  %6732 = vmatprep.mubr.msk.bf16.mxu0 %vm2269_vm0, %v7683_v20  ;;  %6796 = vmatprep.mubr.msk.bf16.mxu1 %vm2269_vm0, %v7685_v35  ;;  %v705_v22 = vld [vmem:[#allocation2 + $0x580] sm:$0xff]  ;;  %v706_v20 = vld [vmem:[#allocation2 + $0x588] sm:$0xff] }
 0x1b9   : > { %v4405_v44 = vld [vmem:[#allocation2 + $0x558] sm:$0xff]  ;;  %v4540_v47 = vadd.f32 %v9060_v36, %v4277_v43  ;;  %4020 = vst.msk [vmem:[#allocation2 + $0x168] sm:$0xff] %vm272_vm3, %v3763_v39  ;;  %4148 = vst.msk [vmem:[#allocation2 + $0x568] sm:$0xff] %vm272_vm3, %v3891_v40  ;;  %v7112_v51 = vpack.c.bf16 %v4795_v45, %v4795_v45  ;;  %v7695_v40 = vld [vmem:[%s7855_s28 + $0x344] ss:$8 sps:$4 sm:$0xff]  }
 0x1ba   : > { %v4668_v48 = vadd.f32 %v9060_v36, %v4405_v44  ;;  %v7240_v52 = vpack.c.bf16 %v4923_v46, %v4923_v46  ;;  %v2879_v55 = vpop.f32.mrb[92].mxu0  ;;  %v3391_v56 = vpop.f32.mrb[92].mxu1  ;;  %v7694_v39 = vld [vmem:[%s7855_s28 + $0x730] ss:$8 sps:$4 sm:$0xff]   ;;  %v7697_v45 = vld [vmem:[%s7855_s28 + $0x744] ss:$8 sps:$4 sm:$0xff]  }
 0x1bb   : > { %v4796_v53 = vmax.f32 %v4540_v47, 0.0  ;;  %6076 = vst.msk [vmem:[%s8596_s22 + $0xa8] sm:$0xf] %vm6033_vm4, %v7112_v51  ;;  %v3764_v62 = vadd.f32 %v2879_v55, %v575_v49  ;;  %v3892_v63 = vadd.f32 %v3391_v56, %v703_v50  ;;  %v2881_v0 = vpop.f32.mrb[93].mxu0  ;;  %v3393_v1 = vpop.f32.mrb[93].mxu1 }
 0x1bc   : > { %v4924_v54 = vmax.f32 %v4668_v48, 0.0  ;;  %6204 = vst.msk [vmem:[%s8596_s22 + $0x2a8] sm:$0xf] %vm6033_vm4, %v7240_v52  ;;  %v4278_v4 = vld [vmem:[#allocation2 + $0x160] sm:$0xff]  ;;  %v2882_v6 = vpop.f32.mrb[94].mxu0  ;;  %v3394_v7 = vpop.f32.mrb[94].mxu1 }
 0x1bd   : > { %v7113_v60 = vpack.c.bf16 %v4796_v53, %v4796_v53  ;;  %v4406_v5 = vld [vmem:[#allocation2 + $0x560] sm:$0xff]  ;;  %v4541_v9 = vadd.f32 %v9060_v36, %v4278_v4  ;;  %4021 = vst.msk [vmem:[#allocation2 + $0x170] sm:$0xff] %vm272_vm3, %v3764_v62  ;;  %4149 = vst.msk [vmem:[#allocation2 + $0x570] sm:$0xff] %vm272_vm3, %v3892_v63  ;;  %v3765_v11 = vadd.f32 %v2882_v6, %v576_v57  ;;  %v2884_v13 = vpop.f32.mrb[95].mxu0  ;;  %v3396_v14 = vpop.f32.mrb[95].mxu1 }
 0x1be   : > { %v7241_v61 = vpack.c.bf16 %v4924_v54, %v4924_v54  ;;  %v4669_v10 = vadd.f32 %v9060_v36, %v4406_v5  ;;  %v3893_v12 = vadd.f32 %v3394_v7, %v704_v58  ;;  %v579_v58 = vld [vmem:[#allocation2 + $0x190] sm:$0xff]  ;;  %v7699_v4 = vld [vmem:[%s7855_s28 + $0x340] ss:$8 sps:$4 sm:$0xff]  }
 0x1bf   : > { %6077 = vst.msk [vmem:[%s8596_s22 + $0xac] sm:$0xf] %vm6033_vm4, %v7113_v60  ;;  %v4797_v29 = vmax.f32 %v4541_v9, 0.0  ;;  %3094 = vmatmul.mubr.bf16.gmra.mrb[200].mxu0 %v7687_v59  ;;  %3606 = vmatmul.mubr.bf16.gmra.mrb[200].mxu1 %v7688_v2  ;;  %v707_v59 = vld [vmem:[#allocation2 + $0x590] sm:$0xff]  ;;  %v580_v2 = vld [vmem:[#allocation2 + $0x198] sm:$0xff] }
 0x1c0   : > { %6205 = vst.msk [vmem:[%s8596_s22 + $0x2ac] sm:$0xf] %vm6033_vm4, %v7241_v61  ;;  %v4279_v15 = vld [vmem:[#allocation2 + $0x168] sm:$0xff]  ;;  %v4925_v17 = vmax.f32 %v4669_v10, 0.0  ;;  %6733 = vmatprep.mubr.msk.bf16.mxu0 %vm2269_vm0, %v7689_v3  ;;  %6797 = vmatprep.mubr.msk.bf16.mxu1 %vm2269_vm0, %v7691_v8  ;;  %v708_v3 = vld [vmem:[#allocation2 + $0x598] sm:$0xff] }
 0x1c1   : > { %v4407_v16 = vld [vmem:[#allocation2 + $0x568] sm:$0xff]  ;;  %v4542_v18 = vadd.f32 %v9060_v36, %v4279_v15  ;;  %4022 = vst.msk [vmem:[#allocation2 + $0x178] sm:$0xff] %vm272_vm3, %v3765_v11  ;;  %4150 = vst.msk [vmem:[#allocation2 + $0x578] sm:$0xff] %vm272_vm3, %v3893_v12  ;;  %v7114_v23 = vpack.c.bf16 %v4797_v29, %v4797_v29  ;;  %v7701_v12 = vld [vmem:[%s7855_s28 + $0x354] ss:$8 sps:$4 sm:$0xff]  }
 0x1c2   : > { %v4670_v19 = vadd.f32 %v9060_v36, %v4407_v16  ;;  %v7242_v24 = vpack.c.bf16 %v4925_v17, %v4925_v17  ;;  %v2887_v27 = vpop.f32.mrb[96].mxu0  ;;  %v3399_v28 = vpop.f32.mrb[96].mxu1  ;;  %v7700_v11 = vld [vmem:[%s7855_s28 + $0x740] ss:$8 sps:$4 sm:$0xff]   ;;  %v7703_v29 = vld [vmem:[%s7855_s28 + $0x754] ss:$8 sps:$4 sm:$0xff]  }
 0x1c3   : > { %v4798_v25 = vmax.f32 %v4542_v18, 0.0  ;;  %6078 = vst.msk [vmem:[%s8596_s22 + $0xb0] sm:$0xf] %vm6033_vm4, %v7114_v23  ;;  %v3766_v34 = vadd.f32 %v2887_v27, %v577_v21  ;;  %v3894_v35 = vadd.f32 %v3399_v28, %v705_v22  ;;  %v2889_v37 = vpop.f32.mrb[97].mxu0  ;;  %v3401_v38 = vpop.f32.mrb[97].mxu1 }
 0x1c4   : > { %v4926_v26 = vmax.f32 %v4670_v19, 0.0  ;;  %6206 = vst.msk [vmem:[%s8596_s22 + $0x2b0] sm:$0xf] %vm6033_vm4, %v7242_v24  ;;  %v4280_v41 = vld [vmem:[#allocation2 + $0x170] sm:$0xff]  ;;  %v2890_v43 = vpop.f32.mrb[98].mxu0  ;;  %v3402_v44 = vpop.f32.mrb[98].mxu1 }
 0x1c5   : > { %v7115_v32 = vpack.c.bf16 %v4798_v25, %v4798_v25  ;;  %v4408_v42 = vld [vmem:[#allocation2 + $0x570] sm:$0xff]  ;;  %v4543_v46 = vadd.f32 %v9060_v36, %v4280_v41  ;;  %4023 = vst.msk [vmem:[#allocation2 + $0x180] sm:$0xff] %vm272_vm3, %v3766_v34  ;;  %4151 = vst.msk [vmem:[#allocation2 + $0x580] sm:$0xff] %vm272_vm3, %v3894_v35  ;;  %v3767_v48 = vadd.f32 %v2890_v43, %v578_v30  ;;  %v2892_v50 = vpop.f32.mrb[99].mxu0  ;;  %v3404_v51 = vpop.f32.mrb[99].mxu1 }
 0x1c6   : > { %v7243_v33 = vpack.c.bf16 %v4926_v26, %v4926_v26  ;;  %v4671_v47 = vadd.f32 %v9060_v36, %v4408_v42  ;;  %v3895_v49 = vadd.f32 %v3402_v44, %v706_v20  ;;  %v581_v20 = vld [vmem:[#allocation2 + $0x1a0] sm:$0xff]  ;;  %v7705_v41 = vld [vmem:[%s7855_s28 + $0x350] ss:$8 sps:$4 sm:$0xff]  }
 0x1c7   : > { %6079 = vst.msk [vmem:[%s8596_s22 + $0xb4] sm:$0xf] %vm6033_vm4, %v7115_v32  ;;  %v4799_v54 = vmax.f32 %v4543_v46, 0.0  ;;  %3102 = vmatmul.mubr.bf16.gmra.mrb[204].mxu0 %v7693_v31  ;;  %3614 = vmatmul.mubr.bf16.gmra.mrb[204].mxu1 %v7694_v39  ;;  %v709_v31 = vld [vmem:[#allocation2 + $0x5a0] sm:$0xff]  ;;  %v582_v39 = vld [vmem:[#allocation2 + $0x1a8] sm:$0xff] }
 0x1c8   : > { %6207 = vst.msk [vmem:[%s8596_s22 + $0x2b4] sm:$0xf] %vm6033_vm4, %v7243_v33  ;;  %v4281_v52 = vld [vmem:[#allocation2 + $0x178] sm:$0xff]  ;;  %v4927_v55 = vmax.f32 %v4671_v47, 0.0  ;;  %6734 = vmatprep.mubr.msk.bf16.mxu0 %vm2269_vm0, %v7695_v40  ;;  %6798 = vmatprep.mubr.msk.bf16.mxu1 %vm2269_vm0, %v7697_v45  ;;  %v710_v40 = vld [vmem:[#allocation2 + $0x5a8] sm:$0xff] }
 0x1c9   : > { %v4409_v53 = vld [vmem:[#allocation2 + $0x578] sm:$0xff]  ;;  %v4544_v56 = vadd.f32 %v9060_v36, %v4281_v52  ;;  %4024 = vst.msk [vmem:[#allocation2 + $0x188] sm:$0xff] %vm272_vm3, %v3767_v48  ;;  %4152 = vst.msk [vmem:[#allocation2 + $0x588] sm:$0xff] %vm272_vm3, %v3895_v49  ;;  %v7116_v60 = vpack.c.bf16 %v4799_v54, %v4799_v54  ;;  %v7707_v49 = vld [vmem:[%s7855_s28 + $0x364] ss:$8 sps:$4 sm:$0xff]  }
 0x1ca   : > { %v4672_v57 = vadd.f32 %v9060_v36, %v4409_v53  ;;  %v7244_v61 = vpack.c.bf16 %v4927_v55, %v4927_v55  ;;  %v2895_v0 = vpop.f32.mrb[100].mxu0  ;;  %v3407_v1 = vpop.f32.mrb[100].mxu1  ;;  %v7706_v48 = vld [vmem:[%s7855_s28 + $0x750] ss:$8 sps:$4 sm:$0xff]   ;;  %v7709_v54 = vld [vmem:[%s7855_s28 + $0x764] ss:$8 sps:$4 sm:$0xff]  }
 0x1cb   : > { %v4800_v62 = vmax.f32 %v4544_v56, 0.0  ;;  %6080 = vst.msk [vmem:[%s8596_s22 + $0xb8] sm:$0xf] %vm6033_vm4, %v7116_v60  ;;  %v3768_v7 = vadd.f32 %v2895_v0, %v579_v58  ;;  %v3896_v8 = vadd.f32 %v3407_v1, %v707_v59  ;;  %v2897_v9 = vpop.f32.mrb[101].mxu0  ;;  %v3409_v10 = vpop.f32.mrb[101].mxu1 }
 0x1cc   : > { %v4928_v63 = vmax.f32 %v4672_v57, 0.0  ;;  %6208 = vst.msk [vmem:[%s8596_s22 + $0x2b8] sm:$0xf] %vm6033_vm4, %v7244_v61  ;;  %v4282_v13 = vld [vmem:[#allocation2 + $0x180] sm:$0xff]  ;;  %v2898_v15 = vpop.f32.mrb[102].mxu0  ;;  %v3410_v16 = vpop.f32.mrb[102].mxu1 }
 0x1cd   : > { %v7117_v5 = vpack.c.bf16 %v4800_v62, %v4800_v62  ;;  %v4410_v14 = vld [vmem:[#allocation2 + $0x580] sm:$0xff]  ;;  %v4545_v17 = vadd.f32 %v9060_v36, %v4282_v13  ;;  %4025 = vst.msk [vmem:[#allocation2 + $0x190] sm:$0xff] %vm272_vm3, %v3768_v7  ;;  %4153 = vst.msk [vmem:[#allocation2 + $0x590] sm:$0xff] %vm272_vm3, %v3896_v8  ;;  %v3769_v19 = vadd.f32 %v2898_v15, %v580_v2  ;;  %v2900_v22 = vpop.f32.mrb[103].mxu0  ;;  %v3412_v23 = vpop.f32.mrb[103].mxu1 }
 0x1ce   : > { %v7245_v6 = vpack.c.bf16 %v4928_v63, %v4928_v63  ;;  %v4673_v18 = vadd.f32 %v9060_v36, %v4410_v14  ;;  %v3897_v21 = vadd.f32 %v3410_v16, %v708_v3  ;;  %v583_v3 = vld [vmem:[#allocation2 + $0x1b0] sm:$0xff]  ;;  %v7711_v13 = vld [vmem:[%s7855_s28 + $0x360] ss:$8 sps:$4 sm:$0xff]  }
 0x1cf   : > { %6081 = vst.msk [vmem:[%s8596_s22 + $0xbc] sm:$0xf] %vm6033_vm4, %v7117_v5  ;;  %v4801_v26 = vmax.f32 %v4545_v17, 0.0  ;;  %3110 = vmatmul.mubr.bf16.gmra.mrb[208].mxu0 %v7699_v4  ;;  %3622 = vmatmul.mubr.bf16.gmra.mrb[208].mxu1 %v7700_v11  ;;  %v711_v4 = vld [vmem:[#allocation2 + $0x5b0] sm:$0xff]  ;;  %v584_v11 = vld [vmem:[#allocation2 + $0x1b8] sm:$0xff] }
 0x1d0   : > { %6209 = vst.msk [vmem:[%s8596_s22 + $0x2bc] sm:$0xf] %vm6033_vm4, %v7245_v6  ;;  %v4283_v24 = vld [vmem:[#allocation2 + $0x188] sm:$0xff]  ;;  %v4929_v27 = vmax.f32 %v4673_v18, 0.0  ;;  %6735 = vmatprep.mubr.msk.bf16.mxu0 %vm2269_vm0, %v7701_v12  ;;  %6799 = vmatprep.mubr.msk.bf16.mxu1 %vm2269_vm0, %v7703_v29  ;;  %v712_v12 = vld [vmem:[#allocation2 + $0x5b8] sm:$0xff] }
 0x1d1   : > { %v4411_v25 = vld [vmem:[#allocation2 + $0x588] sm:$0xff]  ;;  %v4546_v28 = vadd.f32 %v9060_v36, %v4283_v24  ;;  %4026 = vst.msk [vmem:[#allocation2 + $0x198] sm:$0xff] %vm272_vm3, %v3769_v19  ;;  %4154 = vst.msk [vmem:[#allocation2 + $0x598] sm:$0xff] %vm272_vm3, %v3897_v21  ;;  %v7118_v32 = vpack.c.bf16 %v4801_v26, %v4801_v26  ;;  %v7713_v21 = vld [vmem:[%s7855_s28 + $0x374] ss:$8 sps:$4 sm:$0xff]  }
 0x1d2   : > { %v4674_v30 = vadd.f32 %v9060_v36, %v4411_v25  ;;  %v7246_v33 = vpack.c.bf16 %v4929_v27, %v4929_v27  ;;  %v2903_v37 = vpop.f32.mrb[104].mxu0  ;;  %v3415_v38 = vpop.f32.mrb[104].mxu1  ;;  %v7712_v19 = vld [vmem:[%s7855_s28 + $0x760] ss:$8 sps:$4 sm:$0xff]   ;;  %v7715_v26 = vld [vmem:[%s7855_s28 + $0x774] ss:$8 sps:$4 sm:$0xff]  }
 0x1d3   : > { %v4802_v34 = vmax.f32 %v4546_v28, 0.0  ;;  %6082 = vst.msk [vmem:[%s8596_s22 + $0xc0] sm:$0xf] %vm6033_vm4, %v7118_v32  ;;  %v3770_v44 = vadd.f32 %v2903_v37, %v581_v20  ;;  %v3898_v45 = vadd.f32 %v3415_v38, %v709_v31  ;;  %v2905_v46 = vpop.f32.mrb[105].mxu0  ;;  %v3417_v47 = vpop.f32.mrb[105].mxu1 }
 0x1d4   : > { %v4930_v35 = vmax.f32 %v4674_v30, 0.0  ;;  %6210 = vst.msk [vmem:[%s8596_s22 + $0x2c0] sm:$0xf] %vm6033_vm4, %v7246_v33  ;;  %v4284_v50 = vld [vmem:[#allocation2 + $0x190] sm:$0xff]  ;;  %v2906_v52 = vpop.f32.mrb[106].mxu0  ;;  %v3418_v53 = vpop.f32.mrb[106].mxu1 }
 0x1d5   : > { %v7119_v42 = vpack.c.bf16 %v4802_v34, %v4802_v34  ;;  %v4412_v51 = vld [vmem:[#allocation2 + $0x590] sm:$0xff]  ;;  %v4547_v55 = vadd.f32 %v9060_v36, %v4284_v50  ;;  %4027 = vst.msk [vmem:[#allocation2 + $0x1a0] sm:$0xff] %vm272_vm3, %v3770_v44  ;;  %4155 = vst.msk [vmem:[#allocation2 + $0x5a0] sm:$0xff] %vm272_vm3, %v3898_v45  ;;  %v3771_v57 = vadd.f32 %v2906_v52, %v582_v39  ;;  %v2908_v59 = vpop.f32.mrb[107].mxu0  ;;  %v3420_v60 = vpop.f32.mrb[107].mxu1 }
 0x1d6   : > { %v7247_v43 = vpack.c.bf16 %v4930_v35, %v4930_v35  ;;  %v4675_v56 = vadd.f32 %v9060_v36, %v4412_v51  ;;  %v3899_v58 = vadd.f32 %v3418_v53, %v710_v40  ;;  %v585_v40 = vld [vmem:[#allocation2 + $0x1c0] sm:$0xff]  ;;  %v7717_v50 = vld [vmem:[%s7855_s28 + $0x370] ss:$8 sps:$4 sm:$0xff]  }
 0x1d7   : > { %6083 = vst.msk [vmem:[%s8596_s22 + $0xc4] sm:$0xf] %vm6033_vm4, %v7119_v42  ;;  %v4803_v63 = vmax.f32 %v4547_v55, 0.0  ;;  %3118 = vmatmul.mubr.bf16.gmra.mrb[212].mxu0 %v7705_v41  ;;  %3630 = vmatmul.mubr.bf16.gmra.mrb[212].mxu1 %v7706_v48  ;;  %v713_v41 = vld [vmem:[#allocation2 + $0x5c0] sm:$0xff]  ;;  %v586_v48 = vld [vmem:[#allocation2 + $0x1c8] sm:$0xff] }
 0x1d8   : > { %6211 = vst.msk [vmem:[%s8596_s22 + $0x2c4] sm:$0xf] %vm6033_vm4, %v7247_v43  ;;  %v4285_v61 = vld [vmem:[#allocation2 + $0x198] sm:$0xff]  ;;  %v4931_v0 = vmax.f32 %v4675_v56, 0.0  ;;  %6736 = vmatprep.mubr.msk.bf16.mxu0 %vm2269_vm0, %v7707_v49  ;;  %6800 = vmatprep.mubr.msk.bf16.mxu1 %vm2269_vm0, %v7709_v54  ;;  %v714_v49 = vld [vmem:[#allocation2 + $0x5c8] sm:$0xff] }
 0x1d9   : > { %v4413_v62 = vld [vmem:[#allocation2 + $0x598] sm:$0xff]  ;;  %v4548_v1 = vadd.f32 %v9060_v36, %v4285_v61  ;;  %4028 = vst.msk [vmem:[#allocation2 + $0x1a8] sm:$0xff] %vm272_vm3, %v3771_v57  ;;  %4156 = vst.msk [vmem:[#allocation2 + $0x5a8] sm:$0xff] %vm272_vm3, %v3899_v58  ;;  %v7120_v5 = vpack.c.bf16 %v4803_v63, %v4803_v63  ;;  %v7719_v58 = vld [vmem:[%s7855_s28 + $0x384] ss:$8 sps:$4 sm:$0xff]  }
 0x1da   : > { %v4676_v2 = vadd.f32 %v9060_v36, %v4413_v62  ;;  %v7248_v6 = vpack.c.bf16 %v4931_v0, %v4931_v0  ;;  %v2911_v9 = vpop.f32.mrb[108].mxu0  ;;  %v3423_v10 = vpop.f32.mrb[108].mxu1  ;;  %v7718_v57 = vld [vmem:[%s7855_s28 + $0x770] ss:$8 sps:$4 sm:$0xff]   ;;  %v7721_v63 = vld [vmem:[%s7855_s28 + $0x784] ss:$8 sps:$4 sm:$0xff]  }
 0x1db   : > { %v4804_v7 = vmax.f32 %v4548_v1, 0.0  ;;  %6084 = vst.msk [vmem:[%s8596_s22 + $0xc8] sm:$0xf] %vm6033_vm4, %v7120_v5  ;;  %v3772_v16 = vadd.f32 %v2911_v9, %v583_v3  ;;  %v3900_v29 = vadd.f32 %v3423_v10, %v711_v4  ;;  %v2913_v17 = vpop.f32.mrb[109].mxu0  ;;  %v3425_v18 = vpop.f32.mrb[109].mxu1 }
 0x1dc   : > { %v4932_v8 = vmax.f32 %v4676_v2, 0.0  ;;  %6212 = vst.msk [vmem:[%s8596_s22 + $0x2c8] sm:$0xf] %vm6033_vm4, %v7248_v6  ;;  %v4286_v22 = vld [vmem:[#allocation2 + $0x1a0] sm:$0xff]  ;;  %v2914_v24 = vpop.f32.mrb[110].mxu0  ;;  %v3426_v25 = vpop.f32.mrb[110].mxu1 }
 0x1dd   : > { %v7121_v14 = vpack.c.bf16 %v4804_v7, %v4804_v7  ;;  %v4414_v23 = vld [vmem:[#allocation2 + $0x5a0] sm:$0xff]  ;;  %v4549_v27 = vadd.f32 %v9060_v36, %v4286_v22  ;;  %4029 = vst.msk [vmem:[#allocation2 + $0x1b0] sm:$0xff] %vm272_vm3, %v3772_v16  ;;  %4157 = vst.msk [vmem:[#allocation2 + $0x5b0] sm:$0xff] %vm272_vm3, %v3900_v29  ;;  %v3773_v30 = vadd.f32 %v2914_v24, %v584_v11  ;;  %v2916_v31 = vpop.f32.mrb[111].mxu0  ;;  %v3428_v32 = vpop.f32.mrb[111].mxu1 }
 0x1de   : > { %v7249_v15 = vpack.c.bf16 %v4932_v8, %v4932_v8  ;;  %v4677_v28 = vadd.f32 %v9060_v36, %v4414_v23  ;;  %v3901_v20 = vadd.f32 %v3426_v25, %v712_v12  ;;  %v587_v12 = vld [vmem:[#allocation2 + $0x1d0] sm:$0xff]  ;;  %v7723_v22 = vld [vmem:[%s7855_s28 + $0x380] ss:$8 sps:$4 sm:$0xff]  }
 0x1df   : > { %6085 = vst.msk [vmem:[%s8596_s22 + $0xcc] sm:$0xf] %vm6033_vm4, %v7121_v14  ;;  %v4805_v35 = vmax.f32 %v4549_v27, 0.0  ;;  %3126 = vmatmul.mubr.bf16.gmra.mrb[216].mxu0 %v7711_v13  ;;  %3638 = vmatmul.mubr.bf16.gmra.mrb[216].mxu1 %v7712_v19  ;;  %v715_v13 = vld [vmem:[#allocation2 + $0x5d0] sm:$0xff]  ;;  %v588_v19 = vld [vmem:[#allocation2 + $0x1d8] sm:$0xff] }
 0x1e0   : > { %6213 = vst.msk [vmem:[%s8596_s22 + $0x2cc] sm:$0xf] %vm6033_vm4, %v7249_v15  ;;  %v4287_v33 = vld [vmem:[#allocation2 + $0x1a8] sm:$0xff]  ;;  %v4933_v37 = vmax.f32 %v4677_v28, 0.0  ;;  %6737 = vmatprep.mubr.msk.bf16.mxu0 %vm2269_vm0, %v7713_v21  ;;  %6801 = vmatprep.mubr.msk.bf16.mxu1 %vm2269_vm0, %v7715_v26  ;;  %v716_v21 = vld [vmem:[#allocation2 + $0x5d8] sm:$0xff] }
 0x1e1   : > { %v4415_v34 = vld [vmem:[#allocation2 + $0x5a8] sm:$0xff]  ;;  %v4550_v38 = vadd.f32 %v9060_v36, %v4287_v33  ;;  %4030 = vst.msk [vmem:[#allocation2 + $0x1b8] sm:$0xff] %vm272_vm3, %v3773_v30  ;;  %4158 = vst.msk [vmem:[#allocation2 + $0x5b8] sm:$0xff] %vm272_vm3, %v3901_v20  ;;  %v7122_v42 = vpack.c.bf16 %v4805_v35, %v4805_v35  ;;  %v7725_v20 = vld [vmem:[%s7855_s28 + $0x394] ss:$8 sps:$4 sm:$0xff]  }
 0x1e2   : > { %v4678_v39 = vadd.f32 %v9060_v36, %v4415_v34  ;;  %v7250_v43 = vpack.c.bf16 %v4933_v37, %v4933_v37  ;;  %v2919_v46 = vpop.f32.mrb[112].mxu0  ;;  %v3431_v47 = vpop.f32.mrb[112].mxu1  ;;  %v7724_v30 = vld [vmem:[%s7855_s28 + $0x780] ss:$8 sps:$4 sm:$0xff]   ;;  %v7727_v35 = vld [vmem:[%s7855_s28 + $0x794] ss:$8 sps:$4 sm:$0xff]  }
 0x1e3   : > { %v4806_v44 = vmax.f32 %v4550_v38, 0.0  ;;  %6086 = vst.msk [vmem:[%s8596_s22 + $0xd0] sm:$0xf] %vm6033_vm4, %v7122_v42  ;;  %v3774_v53 = vadd.f32 %v2919_v46, %v585_v40  ;;  %v3902_v54 = vadd.f32 %v3431_v47, %v713_v41  ;;  %v2921_v55 = vpop.f32.mrb[113].mxu0  ;;  %v3433_v56 = vpop.f32.mrb[113].mxu1 }
 0x1e4   : > { %v4934_v45 = vmax.f32 %v4678_v39, 0.0  ;;  %6214 = vst.msk [vmem:[%s8596_s22 + $0x2d0] sm:$0xf] %vm6033_vm4, %v7250_v43  ;;  %v4288_v59 = vld [vmem:[#allocation2 + $0x1b0] sm:$0xff]  ;;  %v2922_v61 = vpop.f32.mrb[114].mxu0  ;;  %v3434_v62 = vpop.f32.mrb[114].mxu1 }
 0x1e5   : > { %v7123_v51 = vpack.c.bf16 %v4806_v44, %v4806_v44  ;;  %v4416_v60 = vld [vmem:[#allocation2 + $0x5b0] sm:$0xff]  ;;  %v4551_v0 = vadd.f32 %v9060_v36, %v4288_v59  ;;  %4031 = vst.msk [vmem:[#allocation2 + $0x1c0] sm:$0xff] %vm272_vm3, %v3774_v53  ;;  %4159 = vst.msk [vmem:[#allocation2 + $0x5c0] sm:$0xff] %vm272_vm3, %v3902_v54  ;;  %v3775_v2 = vadd.f32 %v2922_v61, %v586_v48  ;;  %v2924_v4 = vpop.f32.mrb[115].mxu0  ;;  %v3436_v5 = vpop.f32.mrb[115].mxu1 }
 0x1e6   : > { %v7251_v52 = vpack.c.bf16 %v4934_v45, %v4934_v45  ;;  %v4679_v1 = vadd.f32 %v9060_v36, %v4416_v60  ;;  %v3903_v3 = vadd.f32 %v3434_v62, %v714_v49  ;;  %v589_v49 = vld [vmem:[#allocation2 + $0x1e0] sm:$0xff]  ;;  %v7729_v59 = vld [vmem:[%s7855_s28 + $0x390] ss:$8 sps:$4 sm:$0xff]  }
 0x1e7   : > { %6087 = vst.msk [vmem:[%s8596_s22 + $0xd4] sm:$0xf] %vm6033_vm4, %v7123_v51  ;;  %v4807_v8 = vmax.f32 %v4551_v0, 0.0  ;;  %3134 = vmatmul.mubr.bf16.gmra.mrb[220].mxu0 %v7717_v50  ;;  %3646 = vmatmul.mubr.bf16.gmra.mrb[220].mxu1 %v7718_v57  ;;  %v717_v50 = vld [vmem:[#allocation2 + $0x5e0] sm:$0xff]  ;;  %v590_v57 = vld [vmem:[#allocation2 + $0x1e8] sm:$0xff] }
 0x1e8   : > { %6215 = vst.msk [vmem:[%s8596_s22 + $0x2d4] sm:$0xf] %vm6033_vm4, %v7251_v52  ;;  %v4289_v6 = vld [vmem:[#allocation2 + $0x1b8] sm:$0xff]  ;;  %v4935_v9 = vmax.f32 %v4679_v1, 0.0  ;;  %6738 = vmatprep.mubr.msk.bf16.mxu0 %vm2269_vm0, %v7719_v58  ;;  %6802 = vmatprep.mubr.msk.bf16.mxu1 %vm2269_vm0, %v7721_v63  ;;  %v718_v58 = vld [vmem:[#allocation2 + $0x5e8] sm:$0xff] }
 0x1e9   : > { %v4417_v7 = vld [vmem:[#allocation2 + $0x5b8] sm:$0xff]  ;;  %v4552_v10 = vadd.f32 %v9060_v36, %v4289_v6  ;;  %4032 = vst.msk [vmem:[#allocation2 + $0x1c8] sm:$0xff] %vm272_vm3, %v3775_v2  ;;  %4160 = vst.msk [vmem:[#allocation2 + $0x5c8] sm:$0xff] %vm272_vm3, %v3903_v3  ;;  %v7124_v14 = vpack.c.bf16 %v4807_v8, %v4807_v8  ;;  %v7731_v3 = vld [vmem:[%s7855_s28 + $0x3a4] ss:$8 sps:$4 sm:$0xff]  }
 0x1ea   : > { %v4680_v11 = vadd.f32 %v9060_v36, %v4417_v7  ;;  %v7252_v15 = vpack.c.bf16 %v4935_v9, %v4935_v9  ;;  %v2927_v17 = vpop.f32.mrb[116].mxu0  ;;  %v3439_v18 = vpop.f32.mrb[116].mxu1  ;;  %v7730_v2 = vld [vmem:[%s7855_s28 + $0x790] ss:$8 sps:$4 sm:$0xff]   ;;  %v7733_v8 = vld [vmem:[%s7855_s28 + $0x7a4] ss:$8 sps:$4 sm:$0xff]  }
 0x1eb   : > { %v4808_v16 = vmax.f32 %v4552_v10, 0.0  ;;  %6088 = vst.msk [vmem:[%s8596_s22 + $0xd8] sm:$0xf] %vm6033_vm4, %v7124_v14  ;;  %v3776_v25 = vadd.f32 %v2927_v17, %v587_v12  ;;  %v3904_v26 = vadd.f32 %v3439_v18, %v715_v13  ;;  %v2929_v27 = vpop.f32.mrb[117].mxu0  ;;  %v3441_v28 = vpop.f32.mrb[117].mxu1 }
 0x1ec   : > { %v4936_v29 = vmax.f32 %v4680_v11, 0.0  ;;  %6216 = vst.msk [vmem:[%s8596_s22 + $0x2d8] sm:$0xf] %vm6033_vm4, %v7252_v15  ;;  %v4290_v31 = vld [vmem:[#allocation2 + $0x1c0] sm:$0xff]  ;;  %v2930_v33 = vpop.f32.mrb[118].mxu0  ;;  %v3442_v34 = vpop.f32.mrb[118].mxu1 }
 0x1ed   : > { %v7125_v23 = vpack.c.bf16 %v4808_v16, %v4808_v16  ;;  %v4418_v32 = vld [vmem:[#allocation2 + $0x5c0] sm:$0xff]  ;;  %v4553_v37 = vadd.f32 %v9060_v36, %v4290_v31  ;;  %4033 = vst.msk [vmem:[#allocation2 + $0x1d0] sm:$0xff] %vm272_vm3, %v3776_v25  ;;  %4161 = vst.msk [vmem:[#allocation2 + $0x5d0] sm:$0xff] %vm272_vm3, %v3904_v26  ;;  %v3777_v39 = vadd.f32 %v2930_v33, %v588_v19  ;;  %v2932_v41 = vpop.f32.mrb[119].mxu0  ;;  %v3444_v42 = vpop.f32.mrb[119].mxu1 }
 0x1ee   : > { %v7253_v24 = vpack.c.bf16 %v4936_v29, %v4936_v29  ;;  %v4681_v38 = vadd.f32 %v9060_v36, %v4418_v32  ;;  %v3905_v40 = vadd.f32 %v3442_v34, %v716_v21  ;;  %v591_v21 = vld [vmem:[#allocation2 + $0x1f0] sm:$0xff]  ;;  %v7735_v31 = vld [vmem:[%s7855_s28 + $0x3a0] ss:$8 sps:$4 sm:$0xff]  }
 0x1ef   : > { %6089 = vst.msk [vmem:[%s8596_s22 + $0xdc] sm:$0xf] %vm6033_vm4, %v7125_v23  ;;  %v4809_v45 = vmax.f32 %v4553_v37, 0.0  ;;  %3142 = vmatmul.mubr.bf16.gmra.mrb[224].mxu0 %v7723_v22  ;;  %3654 = vmatmul.mubr.bf16.gmra.mrb[224].mxu1 %v7724_v30  ;;  %v719_v22 = vld [vmem:[#allocation2 + $0x5f0] sm:$0xff]  ;;  %v592_v30 = vld [vmem:[#allocation2 + $0x1f8] sm:$0xff] }
 0x1f0   : > { %6217 = vst.msk [vmem:[%s8596_s22 + $0x2dc] sm:$0xf] %vm6033_vm4, %v7253_v24  ;;  %v4291_v43 = vld [vmem:[#allocation2 + $0x1c8] sm:$0xff]  ;;  %v4937_v46 = vmax.f32 %v4681_v38, 0.0  ;;  %6739 = vmatprep.mubr.msk.bf16.mxu0 %vm2269_vm0, %v7725_v20  ;;  %6803 = vmatprep.mubr.msk.bf16.mxu1 %vm2269_vm0, %v7727_v35  ;;  %v720_v20 = vld [vmem:[#allocation2 + $0x5f8] sm:$0xff] }
 0x1f1   : > { %v4419_v44 = vld [vmem:[#allocation2 + $0x5c8] sm:$0xff]  ;;  %v4554_v47 = vadd.f32 %v9060_v36, %v4291_v43  ;;  %4034 = vst.msk [vmem:[#allocation2 + $0x1d8] sm:$0xff] %vm272_vm3, %v3777_v39  ;;  %4162 = vst.msk [vmem:[#allocation2 + $0x5d8] sm:$0xff] %vm272_vm3, %v3905_v40  ;;  %v7126_v51 = vpack.c.bf16 %v4809_v45, %v4809_v45  ;;  %v7737_v40 = vld [vmem:[%s7855_s28 + $0x3b4] ss:$8 sps:$4 sm:$0xff]  }
 0x1f2   : > { %v4682_v48 = vadd.f32 %v9060_v36, %v4419_v44  ;;  %v7254_v52 = vpack.c.bf16 %v4937_v46, %v4937_v46  ;;  %v2935_v55 = vpop.f32.mrb[120].mxu0  ;;  %v3447_v56 = vpop.f32.mrb[120].mxu1  ;;  %v7736_v39 = vld [vmem:[%s7855_s28 + $0x7a0] ss:$8 sps:$4 sm:$0xff]   ;;  %v7739_v45 = vld [vmem:[%s7855_s28 + $0x7b4] ss:$8 sps:$4 sm:$0xff]  }
 0x1f3   : > { %v4810_v53 = vmax.f32 %v4554_v47, 0.0  ;;  %6090 = vst.msk [vmem:[%s8596_s22 + $0xe0] sm:$0xf] %vm6033_vm4, %v7126_v51  ;;  %v3778_v62 = vadd.f32 %v2935_v55, %v589_v49  ;;  %v3906_v63 = vadd.f32 %v3447_v56, %v717_v50  ;;  %v2937_v0 = vpop.f32.mrb[121].mxu0  ;;  %v3449_v1 = vpop.f32.mrb[121].mxu1 }
 0x1f4   : > { %v4938_v54 = vmax.f32 %v4682_v48, 0.0  ;;  %6218 = vst.msk [vmem:[%s8596_s22 + $0x2e0] sm:$0xf] %vm6033_vm4, %v7254_v52  ;;  %v4292_v4 = vld [vmem:[#allocation2 + $0x1d0] sm:$0xff]  ;;  %v2938_v6 = vpop.f32.mrb[122].mxu0  ;;  %v3450_v7 = vpop.f32.mrb[122].mxu1 }
 0x1f5   : > { %v7127_v60 = vpack.c.bf16 %v4810_v53, %v4810_v53  ;;  %v4420_v5 = vld [vmem:[#allocation2 + $0x5d0] sm:$0xff]  ;;  %v4555_v9 = vadd.f32 %v9060_v36, %v4292_v4  ;;  %4035 = vst.msk [vmem:[#allocation2 + $0x1e0] sm:$0xff] %vm272_vm3, %v3778_v62  ;;  %4163 = vst.msk [vmem:[#allocation2 + $0x5e0] sm:$0xff] %vm272_vm3, %v3906_v63  ;;  %v3779_v11 = vadd.f32 %v2938_v6, %v590_v57  ;;  %v2940_v13 = vpop.f32.mrb[123].mxu0  ;;  %v3452_v14 = vpop.f32.mrb[123].mxu1 }
 0x1f6   : > { %v7255_v61 = vpack.c.bf16 %v4938_v54, %v4938_v54  ;;  %v4683_v10 = vadd.f32 %v9060_v36, %v4420_v5  ;;  %v3907_v12 = vadd.f32 %v3450_v7, %v718_v58  ;;  %v593_v58 = vld [vmem:[#allocation2 + $0x200] sm:$0xff]  ;;  %v7741_v4 = vld [vmem:[%s7855_s28 + $0x3b0] ss:$8 sps:$4 sm:$0xff]  }
 0x1f7   : > { %6091 = vst.msk [vmem:[%s8596_s22 + $0xe4] sm:$0xf] %vm6033_vm4, %v7127_v60  ;;  %v4811_v29 = vmax.f32 %v4555_v9, 0.0  ;;  %3150 = vmatmul.mubr.bf16.gmra.mrb[228].mxu0 %v7729_v59  ;;  %3662 = vmatmul.mubr.bf16.gmra.mrb[228].mxu1 %v7730_v2  ;;  %v721_v59 = vld [vmem:[#allocation2 + $0x600] sm:$0xff]  ;;  %v594_v2 = vld [vmem:[#allocation2 + $0x208] sm:$0xff] }
 0x1f8   : > { %6219 = vst.msk [vmem:[%s8596_s22 + $0x2e4] sm:$0xf] %vm6033_vm4, %v7255_v61  ;;  %v4293_v15 = vld [vmem:[#allocation2 + $0x1d8] sm:$0xff]  ;;  %v4939_v17 = vmax.f32 %v4683_v10, 0.0  ;;  %6740 = vmatprep.mubr.msk.bf16.mxu0 %vm2269_vm0, %v7731_v3  ;;  %6804 = vmatprep.mubr.msk.bf16.mxu1 %vm2269_vm0, %v7733_v8  ;;  %v722_v3 = vld [vmem:[#allocation2 + $0x608] sm:$0xff] }
 0x1f9   : > { %v4421_v16 = vld [vmem:[#allocation2 + $0x5d8] sm:$0xff]  ;;  %v4556_v18 = vadd.f32 %v9060_v36, %v4293_v15  ;;  %4036 = vst.msk [vmem:[#allocation2 + $0x1e8] sm:$0xff] %vm272_vm3, %v3779_v11  ;;  %4164 = vst.msk [vmem:[#allocation2 + $0x5e8] sm:$0xff] %vm272_vm3, %v3907_v12  ;;  %v7128_v23 = vpack.c.bf16 %v4811_v29, %v4811_v29  ;;  %v7743_v12 = vld [vmem:[%s7855_s28 + $0x3c4] ss:$8 sps:$4 sm:$0xff]  }
 0x1fa   : > { %v4684_v19 = vadd.f32 %v9060_v36, %v4421_v16  ;;  %v7256_v24 = vpack.c.bf16 %v4939_v17, %v4939_v17  ;;  %v2943_v27 = vpop.f32.mrb[124].mxu0  ;;  %v3455_v28 = vpop.f32.mrb[124].mxu1  ;;  %v7742_v11 = vld [vmem:[%s7855_s28 + $0x7b0] ss:$8 sps:$4 sm:$0xff]   ;;  %v7745_v29 = vld [vmem:[%s7855_s28 + $0x7c4] ss:$8 sps:$4 sm:$0xff]  }
 0x1fb   : > { %v4812_v25 = vmax.f32 %v4556_v18, 0.0  ;;  %6092 = vst.msk [vmem:[%s8596_s22 + $0xe8] sm:$0xf] %vm6033_vm4, %v7128_v23  ;;  %v3780_v34 = vadd.f32 %v2943_v27, %v591_v21  ;;  %v3908_v35 = vadd.f32 %v3455_v28, %v719_v22  ;;  %v2945_v37 = vpop.f32.mrb[125].mxu0  ;;  %v3457_v38 = vpop.f32.mrb[125].mxu1 }
 0x1fc   : > { %v4940_v26 = vmax.f32 %v4684_v19, 0.0  ;;  %6220 = vst.msk [vmem:[%s8596_s22 + $0x2e8] sm:$0xf] %vm6033_vm4, %v7256_v24  ;;  %v4294_v41 = vld [vmem:[#allocation2 + $0x1e0] sm:$0xff]  ;;  %v2946_v43 = vpop.f32.mrb[126].mxu0  ;;  %v3458_v44 = vpop.f32.mrb[126].mxu1 }
 0x1fd   : > { %v7129_v32 = vpack.c.bf16 %v4812_v25, %v4812_v25  ;;  %v4422_v42 = vld [vmem:[#allocation2 + $0x5e0] sm:$0xff]  ;;  %v4557_v46 = vadd.f32 %v9060_v36, %v4294_v41  ;;  %4037 = vst.msk [vmem:[#allocation2 + $0x1f0] sm:$0xff] %vm272_vm3, %v3780_v34  ;;  %4165 = vst.msk [vmem:[#allocation2 + $0x5f0] sm:$0xff] %vm272_vm3, %v3908_v35  ;;  %v3781_v48 = vadd.f32 %v2946_v43, %v592_v30  ;;  %v2948_v50 = vpop.f32.mrb[127].mxu0  ;;  %v3460_v51 = vpop.f32.mrb[127].mxu1  ;;  %v596_v38 = vld [vmem:[#allocation2 + $0x218] sm:$0xff] }
 0x1fe   : > { %v7257_v33 = vpack.c.bf16 %v4940_v26, %v4940_v26  ;;  %v4685_v47 = vadd.f32 %v9060_v36, %v4422_v42  ;;  %v3909_v49 = vadd.f32 %v3458_v44, %v720_v20  ;;  %v595_v20 = vld [vmem:[#allocation2 + $0x210] sm:$0xff] }
 0x1ff   : > { %6093 = vst.msk [vmem:[%s8596_s22 + $0xec] sm:$0xf] %vm6033_vm4, %v7129_v32  ;;  %v4813_v54 = vmax.f32 %v4557_v46, 0.0  ;;  %3158 = vmatmul.mubr.bf16.gmra.mrb[232].mxu0 %v7735_v31  ;;  %3670 = vmatmul.mubr.bf16.gmra.mrb[232].mxu1 %v7736_v39  ;;  %v723_v31 = vld [vmem:[#allocation2 + $0x610] sm:$0xff]  ;;  %v724_v39 = vld [vmem:[#allocation2 + $0x618] sm:$0xff] }
 0x200   : > { %6221 = vst.msk [vmem:[%s8596_s22 + $0x2ec] sm:$0xf] %vm6033_vm4, %v7257_v33  ;;  %v4295_v52 = vld [vmem:[#allocation2 + $0x1e8] sm:$0xff]  ;;  %v4941_v55 = vmax.f32 %v4685_v47, 0.0  ;;  %6741 = vmatprep.mubr.msk.bf16.mxu0 %vm2269_vm0, %v7737_v40  ;;  %6805 = vmatprep.mubr.msk.bf16.mxu1 %vm2269_vm0, %v7739_v45 }
 0x201   : > { %v4423_v53 = vld [vmem:[#allocation2 + $0x5e8] sm:$0xff]  ;;  %v4558_v56 = vadd.f32 %v9060_v36, %v4295_v52  ;;  %4038 = vst.msk [vmem:[#allocation2 + $0x1f8] sm:$0xff] %vm272_vm3, %v3781_v48  ;;  %4166 = vst.msk [vmem:[#allocation2 + $0x5f8] sm:$0xff] %vm272_vm3, %v3909_v49  ;;  %v7130_v60 = vpack.c.bf16 %v4813_v54, %v4813_v54  ;;  %v7749_v48 = vld [vmem:[%s7855_s28 + $0x3d4] ss:$8 sps:$4 sm:$0xff]  }
 0x202   : > { %v4686_v57 = vadd.f32 %v9060_v36, %v4423_v53  ;;  %v7258_v61 = vpack.c.bf16 %v4941_v55, %v4941_v55  ;;  %v2951_v0 = vpop.f32.mrb[128].mxu0  ;;  %v3463_v1 = vpop.f32.mrb[128].mxu1  ;;  %v7747_v40 = vld [vmem:[%s7855_s28 + $0x3c0] ss:$8 sps:$4 sm:$0xff]   ;;  %v7751_v53 = vld [vmem:[%s7855_s28 + $0x7d4] ss:$8 sps:$4 sm:$0xff]  }
 0x203   : > { %v4814_v62 = vmax.f32 %v4558_v56, 0.0  ;;  %6094 = vst.msk [vmem:[%s8596_s22 + $0xf0] sm:$0xf] %vm6033_vm4, %v7130_v60  ;;  %v3782_v7 = vadd.f32 %v2951_v0, %v593_v58  ;;  %v3910_v8 = vadd.f32 %v3463_v1, %v721_v59  ;;  %v2953_v9 = vpop.f32.mrb[129].mxu0  ;;  %v3465_v10 = vpop.f32.mrb[129].mxu1 }
 0x204   : > { %v4942_v63 = vmax.f32 %v4686_v57, 0.0  ;;  %6222 = vst.msk [vmem:[%s8596_s22 + $0x2f0] sm:$0xf] %vm6033_vm4, %v7258_v61  ;;  %v4296_v13 = vld [vmem:[#allocation2 + $0x1f0] sm:$0xff]  ;;  %v2954_v15 = vpop.f32.mrb[130].mxu0  ;;  %v3466_v16 = vpop.f32.mrb[130].mxu1 }
 0x205   : > { %v7131_v5 = vpack.c.bf16 %v4814_v62, %v4814_v62  ;;  %v4424_v14 = vld [vmem:[#allocation2 + $0x5f0] sm:$0xff]  ;;  %v4559_v17 = vadd.f32 %v9060_v36, %v4296_v13  ;;  %4039 = vst.msk [vmem:[#allocation2 + $0x200] sm:$0xff] %vm272_vm3, %v3782_v7  ;;  %4167 = vst.msk [vmem:[#allocation2 + $0x600] sm:$0xff] %vm272_vm3, %v3910_v8  ;;  %v3783_v19 = vadd.f32 %v2954_v15, %v594_v2  ;;  %v2956_v22 = vpop.f32.mrb[131].mxu0  ;;  %v3468_v23 = vpop.f32.mrb[131].mxu1 }
 0x206   : > { %v7259_v6 = vpack.c.bf16 %v4942_v63, %v4942_v63  ;;  %v4687_v18 = vadd.f32 %v9060_v36, %v4424_v14  ;;  %v3911_v21 = vadd.f32 %v3466_v16, %v722_v3  ;;  %v7748_v47 = vld [vmem:[%s7855_s28 + $0x7c0] ss:$8 sps:$4 sm:$0xff]   ;;  %v7753_v13 = vld [vmem:[%s7855_s28 + $0x3d0] ss:$8 sps:$4 sm:$0xff]  }
 0x207   : > { %6095 = vst.msk [vmem:[%s8596_s22 + $0xf4] sm:$0xf] %vm6033_vm4, %v7131_v5  ;;  %v4815_v26 = vmax.f32 %v4559_v17, 0.0  ;;  %3166 = vmatmul.mubr.bf16.gmra.mrb[236].mxu0 %v7741_v4  ;;  %3678 = vmatmul.mubr.bf16.gmra.mrb[236].mxu1 %v7742_v11  ;;  %v9307_v54 = vld [vmem:[%s9854_s2] ss:$0 sm:$0xff]  ;;  %v598_v11 = vld [vmem:[#allocation2 + $0x228] sm:$0xff] }
 0x208   : > { %6223 = vst.msk [vmem:[%s8596_s22 + $0x2f4] sm:$0xf] %vm6033_vm4, %v7259_v6  ;;  %v4297_v24 = vld [vmem:[#allocation2 + $0x1f8] sm:$0xff]  ;;  %v4943_v27 = vmax.f32 %v4687_v18, 0.0  ;;  %6742 = vmatprep.mubr.msk.bf16.mxu0 %vm2269_vm0, %v7743_v12  ;;  %6806 = vmatprep.mubr.msk.bf16.mxu1 %vm2269_vm0, %v7745_v29  ;;  %v597_v3 = vld [vmem:[#allocation2 + $0x220] sm:$0xff]  ;;  %v726_v12 = vld [vmem:[#allocation2 + $0x628] sm:$0xff] }
 0x209   : > { %v4425_v25 = vld [vmem:[#allocation2 + $0x5f8] sm:$0xff]  ;;  %v4560_v28 = vadd.f32 %v9060_v36, %v4297_v24  ;;  %4040 = vst.msk [vmem:[#allocation2 + $0x208] sm:$0xff] %vm272_vm3, %v3783_v19  ;;  %4168 = vst.msk [vmem:[#allocation2 + $0x608] sm:$0xff] %vm272_vm3, %v3911_v21  ;;  %v7132_v32 = vpack.c.bf16 %v4815_v26, %v4815_v26  ;;  %v725_v4 = vld [vmem:[#allocation2 + $0x620] sm:$0xff] }
 0x20a   : > { %v4688_v30 = vadd.f32 %v9060_v36, %v4425_v25  ;;  %v7260_v33 = vpack.c.bf16 %v4943_v27, %v4943_v27  ;;  %v2959_v35 = vpop.f32.mrb[132].mxu0  ;;  %v3471_v37 = vpop.f32.mrb[132].mxu1  ;;  %v7754_v19 = vld [vmem:[%s7855_s28 + $0x7d0] ss:$8 sps:$4 sm:$0xff]   ;;  %v7755_v21 = vld [vmem:[%s7855_s28 + $0x3e4] ss:$8 sps:$4 sm:$0xff]  }
 0x20b   : > { %v4816_v34 = vmax.f32 %v4560_v28, 0.0  ;;  %6096 = vst.msk [vmem:[%s8596_s22 + $0xf8] sm:$0xf] %vm6033_vm4, %v7132_v32  ;;  %v3784_v43 = vadd.f32 %v2959_v35, %v595_v20  ;;  %v3912_v44 = vadd.f32 %v3471_v37, %v723_v31  ;;  %v2961_v45 = vpop.f32.mrb[133].mxu0  ;;  %v3473_v46 = vpop.f32.mrb[133].mxu1 }
 0x20c   : > { %v4944_v36 = vmax.f32 %v4688_v30, 0.0  ;;  %6224 = vst.msk [vmem:[%s8596_s22 + $0x2f8] sm:$0xf] %vm6033_vm4, %v7260_v33  ;;  %v4298_v49 = vld [vmem:[#allocation2 + $0x200] sm:$0xff]  ;;  %v2962_v51 = vpop.f32.mrb[134].mxu0  ;;  %v3474_v52 = vpop.f32.mrb[134].mxu1 }
 0x20d   : > { %v7133_v41 = vpack.c.bf16 %v4816_v34, %v4816_v34  ;;  %v4426_v50 = vld [vmem:[#allocation2 + $0x600] sm:$0xff]  ;;  %v4561_v55 = vadd.f32 %v9307_v54, %v4298_v49  ;;  %4041 = vst.msk [vmem:[#allocation2 + $0x210] sm:$0xff] %vm272_vm3, %v3784_v43  ;;  %4169 = vst.msk [vmem:[#allocation2 + $0x610] sm:$0xff] %vm272_vm3, %v3912_v44  ;;  %v3785_v57 = vadd.f32 %v2962_v51, %v596_v38  ;;  %v2964_v59 = vpop.f32.mrb[135].mxu0  ;;  %v3476_v60 = vpop.f32.mrb[135].mxu1 }
 0x20e   : > { %v7261_v42 = vpack.c.bf16 %v4944_v36, %v4944_v36  ;;  %v4689_v56 = vadd.f32 %v9307_v54, %v4426_v50  ;;  %v3913_v58 = vadd.f32 %v3474_v52, %v724_v39  ;;  %v7757_v26 = vld [vmem:[%s7855_s28 + $0x7e4] ss:$8 sps:$4 sm:$0xff]   ;;  %v599_v39 = vld [vmem:[#allocation2 + $0x230] sm:$0xff]  ;;  %v7759_v49 = vld [vmem:[%s7855_s28 + $0x3e0] ss:$8 sps:$4 sm:$0xff]  }
 0x20f   : > { %6097 = vst.msk [vmem:[%s8596_s22 + $0xfc] sm:$0xf] %vm6033_vm4, %v7133_v41  ;;  %v4817_v63 = vmax.f32 %v4561_v55, 0.0  ;;  %3174 = vmatmul.mubr.bf16.gmra.mrb[240].mxu0 %v7747_v40  ;;  %3686 = vmatmul.mubr.bf16.gmra.mrb[240].mxu1 %v7748_v47  ;;  %v727_v40 = vld [vmem:[#allocation2 + $0x630] sm:$0xff]  ;;  %v600_v47 = vld [vmem:[#allocation2 + $0x238] sm:$0xff] }
 0x210   : > { %6225 = vst.msk [vmem:[%s8596_s22 + $0x2fc] sm:$0xf] %vm6033_vm4, %v7261_v42  ;;  %v4299_v61 = vld [vmem:[#allocation2 + $0x208] sm:$0xff]  ;;  %v4945_v0 = vmax.f32 %v4689_v56, 0.0  ;;  %6743 = vmatprep.mubr.msk.bf16.mxu0 %vm2269_vm0, %v7749_v48  ;;  %6807 = vmatprep.mubr.msk.bf16.mxu1 %vm2269_vm0, %v7751_v53  ;;  %v728_v48 = vld [vmem:[#allocation2 + $0x638] sm:$0xff] }
 0x211   : > { %v4427_v62 = vld [vmem:[#allocation2 + $0x608] sm:$0xff]  ;;  %v4562_v1 = vadd.f32 %v9307_v54, %v4299_v61  ;;  %4042 = vst.msk [vmem:[#allocation2 + $0x218] sm:$0xff] %vm272_vm3, %v3785_v57  ;;  %4170 = vst.msk [vmem:[#allocation2 + $0x618] sm:$0xff] %vm272_vm3, %v3913_v58  ;;  %v7134_v5 = vpack.c.bf16 %v4817_v63, %v4817_v63  ;;  %v7761_v58 = vld [vmem:[%s7855_s28 + $0x3f4] ss:$8 sps:$4 sm:$0xff]  }
 0x212   : > { %v4690_v2 = vadd.f32 %v9307_v54, %v4427_v62  ;;  %v7262_v6 = vpack.c.bf16 %v4945_v0, %v4945_v0  ;;  %v2967_v9 = vpop.f32.mrb[136].mxu0  ;;  %v3479_v10 = vpop.f32.mrb[136].mxu1  ;;  %v7760_v57 = vld [vmem:[%s7855_s28 + $0x7e0] ss:$8 sps:$4 sm:$0xff]   ;;  %v7763_v63 = vld [vmem:[%s7855_s28 + $0x7f4] ss:$8 sps:$4 sm:$0xff]  }
 0x213   : > { %v4818_v7 = vmax.f32 %v4562_v1, 0.0  ;;  %6098 = vst.msk [vmem:[%s8596_s22 + $0x100] sm:$0xf] %vm6033_vm4, %v7134_v5  ;;  %v3786_v16 = vadd.f32 %v2967_v9, %v597_v3  ;;  %v3914_v29 = vadd.f32 %v3479_v10, %v725_v4  ;;  %v2969_v17 = vpop.f32.mrb[137].mxu0  ;;  %v3481_v18 = vpop.f32.mrb[137].mxu1 }
 0x214   : > { %v4946_v8 = vmax.f32 %v4690_v2, 0.0  ;;  %6226 = vst.msk [vmem:[%s8596_s22 + $0x300] sm:$0xf] %vm6033_vm4, %v7262_v6  ;;  %v4300_v22 = vld [vmem:[#allocation2 + $0x210] sm:$0xff]  ;;  %v2970_v24 = vpop.f32.mrb[138].mxu0  ;;  %v3482_v25 = vpop.f32.mrb[138].mxu1 }
 0x215   : > { %v7135_v14 = vpack.c.bf16 %v4818_v7, %v4818_v7  ;;  %v4428_v23 = vld [vmem:[#allocation2 + $0x610] sm:$0xff]  ;;  %v4563_v27 = vadd.f32 %v9307_v54, %v4300_v22  ;;  %4043 = vst.msk [vmem:[#allocation2 + $0x220] sm:$0xff] %vm272_vm3, %v3786_v16  ;;  %4171 = vst.msk [vmem:[#allocation2 + $0x620] sm:$0xff] %vm272_vm3, %v3914_v29  ;;  %v3787_v30 = vadd.f32 %v2970_v24, %v598_v11  ;;  %v2972_v31 = vpop.f32.mrb[139].mxu0  ;;  %v3484_v32 = vpop.f32.mrb[139].mxu1 }
 0x216   : > { %v7263_v15 = vpack.c.bf16 %v4946_v8, %v4946_v8  ;;  %v4691_v28 = vadd.f32 %v9307_v54, %v4428_v23  ;;  %v3915_v20 = vadd.f32 %v3482_v25, %v726_v12  ;;  %v601_v12 = vld [vmem:[#allocation2 + $0x240] sm:$0xff] }
 0x217   : > { %6099 = vst.msk [vmem:[%s8596_s22 + $0x104] sm:$0xf] %vm6033_vm4, %v7135_v14  ;;  %v4819_v36 = vmax.f32 %v4563_v27, 0.0  ;;  %3182 = vmatmul.mubr.bf16.gmra.mrb[244].mxu0 %v7753_v13  ;;  %3694 = vmatmul.mubr.bf16.gmra.mrb[244].mxu1 %v7754_v19  ;;  %v729_v13 = vld [vmem:[#allocation2 + $0x640] sm:$0xff]  ;;  %v602_v19 = vld [vmem:[#allocation2 + $0x248] sm:$0xff] }
 0x218   : > { %6227 = vst.msk [vmem:[%s8596_s22 + $0x304] sm:$0xf] %vm6033_vm4, %v7263_v15  ;;  %v4301_v33 = vld [vmem:[#allocation2 + $0x218] sm:$0xff]  ;;  %v4947_v35 = vmax.f32 %v4691_v28, 0.0  ;;  %6744 = vmatprep.mubr.msk.bf16.mxu0 %vm2269_vm0, %v7755_v21  ;;  %6808 = vmatprep.mubr.msk.bf16.mxu1 %vm2269_vm0, %v7757_v26  ;;  %v730_v21 = vld [vmem:[#allocation2 + $0x648] sm:$0xff] }
 0x219   : > { %v4429_v34 = vld [vmem:[#allocation2 + $0x618] sm:$0xff]  ;;  %v4564_v37 = vadd.f32 %v9307_v54, %v4301_v33  ;;  %4044 = vst.msk [vmem:[#allocation2 + $0x228] sm:$0xff] %vm272_vm3, %v3787_v30  ;;  %4172 = vst.msk [vmem:[#allocation2 + $0x628] sm:$0xff] %vm272_vm3, %v3915_v20  ;;  %v7136_v41 = vpack.c.bf16 %v4819_v36, %v4819_v36 }
 0x21a   : > { %v4692_v38 = vadd.f32 %v9307_v54, %v4429_v34  ;;  %v7264_v42 = vpack.c.bf16 %v4947_v35, %v4947_v35  ;;  %v2975_v45 = vpop.f32.mrb[140].mxu0  ;;  %v3487_v46 = vpop.f32.mrb[140].mxu1  ;;  %v7765_v28 = vld [vmem:[%s7855_s28 + $0x3f0] ss:$8 sps:$4 sm:$0xff]  }
 0x21b   : > { %v4820_v43 = vmax.f32 %v4564_v37, 0.0  ;;  %6100 = vst.msk [vmem:[%s8596_s22 + $0x108] sm:$0xf] %vm6033_vm4, %v7136_v41  ;;  %v3788_v52 = vadd.f32 %v2975_v45, %v599_v39  ;;  %v3916_v53 = vadd.f32 %v3487_v46, %v727_v40  ;;  %v2977_v55 = vpop.f32.mrb[141].mxu0  ;;  %v3489_v56 = vpop.f32.mrb[141].mxu1  ;;  %v603_v46 = vld [vmem:[#allocation2 + $0x250] sm:$0xff] }
 0x21c   : > { %v4948_v44 = vmax.f32 %v4692_v38, 0.0  ;;  %6228 = vst.msk [vmem:[%s8596_s22 + $0x308] sm:$0xf] %vm6033_vm4, %v7264_v42  ;;  %v4302_v59 = vld [vmem:[#allocation2 + $0x220] sm:$0xff]  ;;  %v2978_v61 = vpop.f32.mrb[142].mxu0  ;;  %v3490_v62 = vpop.f32.mrb[142].mxu1 }
 0x21d   : > { %v7137_v50 = vpack.c.bf16 %v4820_v43, %v4820_v43  ;;  %v4430_v60 = vld [vmem:[#allocation2 + $0x620] sm:$0xff]  ;;  %v4565_v0 = vadd.f32 %v9307_v54, %v4302_v59  ;;  %4045 = vst.msk [vmem:[#allocation2 + $0x230] sm:$0xff] %vm272_vm3, %v3788_v52  ;;  %4173 = vst.msk [vmem:[#allocation2 + $0x630] sm:$0xff] %vm272_vm3, %v3916_v53  ;;  %v3789_v2 = vadd.f32 %v2978_v61, %v600_v47  ;;  %v2980_v4 = vpop.f32.mrb[143].mxu0  ;;  %v3492_v5 = vpop.f32.mrb[143].mxu1  ;;  %v731_v47 = vld [vmem:[#allocation2 + $0x650] sm:$0xff] }
 0x21e   : > { %v7265_v51 = vpack.c.bf16 %v4948_v44, %v4948_v44  ;;  %v4693_v1 = vadd.f32 %v9307_v54, %v4430_v60  ;;  %v3917_v3 = vadd.f32 %v3490_v62, %v728_v48  ;;  %v7766_v30 = vld [vmem:[%s7855_s28 + $0x7f0] ss:$8 sps:$4 sm:$0xff]  }
 0x21f   : > { %6101 = vst.msk [vmem:[%s8596_s22 + $0x10c] sm:$0xf] %vm6033_vm4, %v7137_v50  ;;  %v4821_v8 = vmax.f32 %v4565_v0, 0.0  ;;  %3190 = vmatmul.mubr.bf16.gmra.mrb[248].mxu0 %v7759_v49  ;;  %3702 = vmatmul.mubr.bf16.gmra.mrb[248].mxu1 %v7760_v57  ;;  %v604_v55 = vld [vmem:[#allocation2 + $0x258] sm:$0xff] }
 0x220   : > { %6229 = vst.msk [vmem:[%s8596_s22 + $0x30c] sm:$0xf] %vm6033_vm4, %v7265_v51  ;;  %v4303_v6 = vld [vmem:[#allocation2 + $0x228] sm:$0xff]  ;;  %v4949_v9 = vmax.f32 %v4693_v1, 0.0  ;;  %6745 = vmatprep.mubr.msk.bf16.mxu0 %vm2269_vm0, %v7761_v58  ;;  %6809 = vmatprep.mubr.msk.bf16.mxu1 %vm2269_vm0, %v7763_v63  ;;  %v732_v56 = vld [vmem:[#allocation2 + $0x658] sm:$0xff] }
 0x221   : > { %v4431_v7 = vld [vmem:[#allocation2 + $0x628] sm:$0xff]  ;;  %v4566_v10 = vadd.f32 %v9307_v54, %v4303_v6  ;;  %4046 = vst.msk [vmem:[#allocation2 + $0x238] sm:$0xff] %vm272_vm3, %v3789_v2  ;;  %4174 = vst.msk [vmem:[#allocation2 + $0x638] sm:$0xff] %vm272_vm3, %v3917_v3  ;;  %v7138_v14 = vpack.c.bf16 %v4821_v8, %v4821_v8 }
 0x222   : > { %v4694_v11 = vadd.f32 %v9307_v54, %v4431_v7  ;;  %v7266_v15 = vpack.c.bf16 %v4949_v9, %v4949_v9  ;;  %v2983_v17 = vpop.f32.mrb[144].mxu0  ;;  %v3495_v18 = vpop.f32.mrb[144].mxu1 }
 0x223   : > { %v4822_v16 = vmax.f32 %v4566_v10, 0.0  ;;  %6102 = vst.msk [vmem:[%s8596_s22 + $0x110] sm:$0xf] %vm6033_vm4, %v7138_v14  ;;  %v3790_v24 = vadd.f32 %v2983_v17, %v601_v12  ;;  %v3918_v25 = vadd.f32 %v3495_v18, %v729_v13  ;;  %v2985_v26 = vpop.f32.mrb[145].mxu0  ;;  %v3497_v27 = vpop.f32.mrb[145].mxu1 }
 0x224   : > { %v4950_v29 = vmax.f32 %v4694_v11, 0.0  ;;  %6230 = vst.msk [vmem:[%s8596_s22 + $0x310] sm:$0xf] %vm6033_vm4, %v7266_v15  ;;  %v4304_v20 = vld [vmem:[#allocation2 + $0x230] sm:$0xff]  ;;  %v2986_v32 = vpop.f32.mrb[146].mxu0  ;;  %v3498_v33 = vpop.f32.mrb[146].mxu1 }
 0x225   : > { %v7139_v22 = vpack.c.bf16 %v4822_v16, %v4822_v16  ;;  %v4432_v31 = vld [vmem:[#allocation2 + $0x630] sm:$0xff]  ;;  %v4567_v34 = vadd.f32 %v9307_v54, %v4304_v20  ;;  %4047 = vst.msk [vmem:[#allocation2 + $0x240] sm:$0xff] %vm272_vm3, %v3790_v24  ;;  %4175 = vst.msk [vmem:[#allocation2 + $0x640] sm:$0xff] %vm272_vm3, %v3918_v25  ;;  %v3791_v35 = vadd.f32 %v2986_v32, %v602_v19  ;;  %v2988_v38 = vpop.f32.mrb[147].mxu0  ;;  %v3500_v39 = vpop.f32.mrb[147].mxu1  ;;  %v605_v15 = vld [vmem:[#allocation2 + $0x260] sm:$0xff] }
 0x226   : > { %v7267_v23 = vpack.c.bf16 %v4950_v29, %v4950_v29  ;;  %v4695_v36 = vadd.f32 %v9307_v54, %v4432_v31  ;;  %v3919_v37 = vadd.f32 %v3498_v33, %v730_v21  ;;  %v733_v16 = vld [vmem:[#allocation2 + $0x660] sm:$0xff]  ;;  %v734_v24 = vld [vmem:[#allocation2 + $0x668] sm:$0xff] }
 0x227   : > { %6103 = vst.msk [vmem:[%s8596_s22 + $0x114] sm:$0xf] %vm6033_vm4, %v7139_v22  ;;  %v4823_v42 = vmax.f32 %v4567_v34, 0.0  ;;  %3198 = vmatmul.mubr.bf16.gmra.mrb[252].mxu0 %v7765_v28  ;;  %3710 = vmatmul.mubr.bf16.gmra.mrb[252].mxu1 %v7766_v30 }
 0x228   : > { %6231 = vst.msk [vmem:[%s8596_s22 + $0x314] sm:$0xf] %vm6033_vm4, %v7267_v23  ;;  %v4305_v40 = vld [vmem:[#allocation2 + $0x238] sm:$0xff]  ;;  %v4951_v43 = vmax.f32 %v4695_v36, 0.0  ;;  %v606_v23 = vld [vmem:[#allocation2 + $0x268] sm:$0xff] }
 0x229   : > { %v4433_v41 = vld [vmem:[#allocation2 + $0x638] sm:$0xff]  ;;  %v4568_v44 = vadd.f32 %v9307_v54, %v4305_v40  ;;  %4048 = vst.msk [vmem:[#allocation2 + $0x248] sm:$0xff] %vm272_vm3, %v3791_v35  ;;  %4176 = vst.msk [vmem:[#allocation2 + $0x648] sm:$0xff] %vm272_vm3, %v3919_v37  ;;  %v7140_v48 = vpack.c.bf16 %v4823_v42, %v4823_v42 }
 0x22a   : > { %v4696_v45 = vadd.f32 %v9307_v54, %v4433_v41  ;;  %v7268_v49 = vpack.c.bf16 %v4951_v43, %v4951_v43  ;;  %v2991_v52 = vpop.f32.mrb[148].mxu0  ;;  %v3503_v53 = vpop.f32.mrb[148].mxu1 }
 0x22b   : > { %v4824_v50 = vmax.f32 %v4568_v44, 0.0  ;;  %6104 = vst.msk [vmem:[%s8596_s22 + $0x118] sm:$0xf] %vm6033_vm4, %v7140_v48  ;;  %v3792_v59 = vadd.f32 %v2991_v52, %v603_v46  ;;  %v3920_v60 = vadd.f32 %v3503_v53, %v731_v47  ;;  %v2993_v61 = vpop.f32.mrb[149].mxu0  ;;  %v3505_v62 = vpop.f32.mrb[149].mxu1  ;;  %v607_v47 = vld [vmem:[#allocation2 + $0x270] sm:$0xff] }
 0x22c   : > { %v4952_v51 = vmax.f32 %v4696_v45, 0.0  ;;  %6232 = vst.msk [vmem:[%s8596_s22 + $0x318] sm:$0xf] %vm6033_vm4, %v7268_v49  ;;  %v4306_v63 = vld [vmem:[#allocation2 + $0x240] sm:$0xff]  ;;  %v2994_v1 = vpop.f32.mrb[150].mxu0  ;;  %v3506_v2 = vpop.f32.mrb[150].mxu1 }
 0x22d   : > { %v7141_v57 = vpack.c.bf16 %v4824_v50, %v4824_v50  ;;  %v4434_v0 = vld [vmem:[#allocation2 + $0x640] sm:$0xff]  ;;  %v4569_v3 = vadd.f32 %v9307_v54, %v4306_v63  ;;  %4049 = vst.msk [vmem:[#allocation2 + $0x250] sm:$0xff] %vm272_vm3, %v3792_v59  ;;  %4177 = vst.msk [vmem:[#allocation2 + $0x650] sm:$0xff] %vm272_vm3, %v3920_v60  ;;  %v3793_v5 = vadd.f32 %v2994_v1, %v604_v55  ;;  %v2996_v7 = vpop.f32.mrb[151].mxu0  ;;  %v3508_v8 = vpop.f32.mrb[151].mxu1  ;;  %v735_v48 = vld [vmem:[#allocation2 + $0x670] sm:$0xff] }
 0x22e   : > { %v7269_v58 = vpack.c.bf16 %v4952_v51, %v4952_v51  ;;  %v4697_v4 = vadd.f32 %v9307_v54, %v4434_v0  ;;  %v3921_v6 = vadd.f32 %v3506_v2, %v732_v56  ;;  %v608_v56 = vld [vmem:[#allocation2 + $0x278] sm:$0xff] }
 0x22f   : > { %6105 = vst.msk [vmem:[%s8596_s22 + $0x11c] sm:$0xf] %vm6033_vm4, %v7141_v57  ;;  %v4825_v11 = vmax.f32 %v4569_v3, 0.0  ;;  %v736_v57 = vld [vmem:[#allocation2 + $0x678] sm:$0xff] }
 0x230   : > { %6233 = vst.msk [vmem:[%s8596_s22 + $0x31c] sm:$0xf] %vm6033_vm4, %v7269_v58  ;;  %v4307_v9 = vld [vmem:[#allocation2 + $0x248] sm:$0xff]  ;;  %v4953_v12 = vmax.f32 %v4697_v4, 0.0 }
 0x231   : > { %v4435_v10 = vld [vmem:[#allocation2 + $0x648] sm:$0xff]  ;;  %v4570_v13 = vadd.f32 %v9307_v54, %v4307_v9  ;;  %4050 = vst.msk [vmem:[#allocation2 + $0x258] sm:$0xff] %vm272_vm3, %v3793_v5  ;;  %4178 = vst.msk [vmem:[#allocation2 + $0x658] sm:$0xff] %vm272_vm3, %v3921_v6  ;;  %v7142_v29 = vpack.c.bf16 %v4825_v11, %v4825_v11 }
 0x232   : > { %v4698_v14 = vadd.f32 %v9307_v54, %v4435_v10  ;;  %v7270_v17 = vpack.c.bf16 %v4953_v12, %v4953_v12  ;;  %v2999_v21 = vpop.f32.mrb[152].mxu0  ;;  %v3511_v22 = vpop.f32.mrb[152].mxu1 }
 0x233   : > { %v4826_v18 = vmax.f32 %v4570_v13, 0.0  ;;  %6106 = vst.msk [vmem:[%s8596_s22 + $0x120] sm:$0xf] %vm6033_vm4, %v7142_v29  ;;  %v3794_v27 = vadd.f32 %v2999_v21, %v605_v15  ;;  %v3922_v28 = vadd.f32 %v3511_v22, %v733_v16  ;;  %v3001_v30 = vpop.f32.mrb[153].mxu0  ;;  %v3513_v20 = vpop.f32.mrb[153].mxu1  ;;  %v609_v16 = vld [vmem:[#allocation2 + $0x280] sm:$0xff] }
 0x234   : > { %v4954_v19 = vmax.f32 %v4698_v14, 0.0  ;;  %6234 = vst.msk [vmem:[%s8596_s22 + $0x320] sm:$0xf] %vm6033_vm4, %v7270_v17  ;;  %v4308_v31 = vld [vmem:[#allocation2 + $0x250] sm:$0xff]  ;;  %v3002_v33 = vpop.f32.mrb[154].mxu0  ;;  %v3514_v34 = vpop.f32.mrb[154].mxu1 }
 0x235   : > { %v7143_v25 = vpack.c.bf16 %v4826_v18, %v4826_v18  ;;  %v4436_v32 = vld [vmem:[#allocation2 + $0x650] sm:$0xff]  ;;  %v4571_v36 = vadd.f32 %v9307_v54, %v4308_v31  ;;  %4051 = vst.msk [vmem:[#allocation2 + $0x260] sm:$0xff] %vm272_vm3, %v3794_v27  ;;  %4179 = vst.msk [vmem:[#allocation2 + $0x660] sm:$0xff] %vm272_vm3, %v3922_v28  ;;  %v3795_v37 = vadd.f32 %v3002_v33, %v606_v23  ;;  %v3004_v39 = vpop.f32.mrb[155].mxu0  ;;  %v3516_v40 = vpop.f32.mrb[155].mxu1  ;;  %v737_v29 = vld [vmem:[#allocation2 + $0x680] sm:$0xff] }
 0x236   : > { %v7271_v26 = vpack.c.bf16 %v4954_v19, %v4954_v19  ;;  %v4699_v35 = vadd.f32 %v9307_v54, %v4436_v32  ;;  %v3923_v38 = vadd.f32 %v3514_v34, %v734_v24  ;;  %v610_v24 = vld [vmem:[#allocation2 + $0x288] sm:$0xff] }
 0x237   : > { %6107 = vst.msk [vmem:[%s8596_s22 + $0x124] sm:$0xf] %vm6033_vm4, %v7143_v25  ;;  %v4827_v43 = vmax.f32 %v4571_v36, 0.0  ;;  %v738_v25 = vld [vmem:[#allocation2 + $0x688] sm:$0xff] }
 0x238   : > { %6235 = vst.msk [vmem:[%s8596_s22 + $0x324] sm:$0xf] %vm6033_vm4, %v7271_v26  ;;  %v4309_v41 = vld [vmem:[#allocation2 + $0x258] sm:$0xff]  ;;  %v4955_v44 = vmax.f32 %v4699_v35, 0.0 }
 0x239   : > { %v4437_v42 = vld [vmem:[#allocation2 + $0x658] sm:$0xff]  ;;  %v4572_v45 = vadd.f32 %v9307_v54, %v4309_v41  ;;  %4052 = vst.msk [vmem:[#allocation2 + $0x268] sm:$0xff] %vm272_vm3, %v3795_v37  ;;  %4180 = vst.msk [vmem:[#allocation2 + $0x668] sm:$0xff] %vm272_vm3, %v3923_v38  ;;  %v7144_v49 = vpack.c.bf16 %v4827_v43, %v4827_v43 }
 0x23a   : > { %v4700_v46 = vadd.f32 %v9307_v54, %v4437_v42  ;;  %v7272_v50 = vpack.c.bf16 %v4955_v44, %v4955_v44  ;;  %v3007_v53 = vpop.f32.mrb[156].mxu0  ;;  %v3519_v55 = vpop.f32.mrb[156].mxu1 }
 0x23b   : > { %v4828_v51 = vmax.f32 %v4572_v45, 0.0  ;;  %6108 = vst.msk [vmem:[%s8596_s22 + $0x128] sm:$0xf] %vm6033_vm4, %v7144_v49  ;;  %v3796_v60 = vadd.f32 %v3007_v53, %v607_v47  ;;  %v3924_v61 = vadd.f32 %v3519_v55, %v735_v48  ;;  %v3009_v62 = vpop.f32.mrb[157].mxu0  ;;  %v3521_v63 = vpop.f32.mrb[157].mxu1  ;;  %v611_v48 = vld [vmem:[#allocation2 + $0x290] sm:$0xff] }
 0x23c   : > { %v4956_v52 = vmax.f32 %v4700_v46, 0.0  ;;  %6236 = vst.msk [vmem:[%s8596_s22 + $0x328] sm:$0xf] %vm6033_vm4, %v7272_v50  ;;  %v4310_v0 = vld [vmem:[#allocation2 + $0x260] sm:$0xff]  ;;  %v3010_v2 = vpop.f32.mrb[158].mxu0  ;;  %v3522_v3 = vpop.f32.mrb[158].mxu1 }
 0x23d   : > { %v7145_v58 = vpack.c.bf16 %v4828_v51, %v4828_v51  ;;  %v4438_v1 = vld [vmem:[#allocation2 + $0x660] sm:$0xff]  ;;  %v4573_v4 = vadd.f32 %v9307_v54, %v4310_v0  ;;  %4053 = vst.msk [vmem:[#allocation2 + $0x270] sm:$0xff] %vm272_vm3, %v3796_v60  ;;  %4181 = vst.msk [vmem:[#allocation2 + $0x670] sm:$0xff] %vm272_vm3, %v3924_v61  ;;  %v3797_v6 = vadd.f32 %v3010_v2, %v608_v56  ;;  %v3012_v8 = vpop.f32.mrb[159].mxu0  ;;  %v3524_v9 = vpop.f32.mrb[159].mxu1  ;;  %v739_v49 = vld [vmem:[#allocation2 + $0x690] sm:$0xff] }
 0x23e   : > { %v7273_v59 = vpack.c.bf16 %v4956_v52, %v4956_v52  ;;  %v4701_v5 = vadd.f32 %v9307_v54, %v4438_v1  ;;  %v3925_v7 = vadd.f32 %v3522_v3, %v736_v57  ;;  %v612_v57 = vld [vmem:[#allocation2 + $0x298] sm:$0xff] }
 0x23f   : > { %6109 = vst.msk [vmem:[%s8596_s22 + $0x12c] sm:$0xf] %vm6033_vm4, %v7145_v58  ;;  %v4829_v12 = vmax.f32 %v4573_v4, 0.0  ;;  %v740_v58 = vld [vmem:[#allocation2 + $0x698] sm:$0xff] }
 0x240   : > { %6237 = vst.msk [vmem:[%s8596_s22 + $0x32c] sm:$0xf] %vm6033_vm4, %v7273_v59  ;;  %v4311_v10 = vld [vmem:[#allocation2 + $0x268] sm:$0xff]  ;;  %v4957_v13 = vmax.f32 %v4701_v5, 0.0 }
 0x241   : > { %v4439_v11 = vld [vmem:[#allocation2 + $0x668] sm:$0xff]  ;;  %v4574_v14 = vadd.f32 %v9307_v54, %v4311_v10  ;;  %4054 = vst.msk [vmem:[#allocation2 + $0x278] sm:$0xff] %vm272_vm3, %v3797_v6  ;;  %4182 = vst.msk [vmem:[#allocation2 + $0x678] sm:$0xff] %vm272_vm3, %v3925_v7  ;;  %v7146_v17 = vpack.c.bf16 %v4829_v12, %v4829_v12 }
 0x242   : > { %v4702_v15 = vadd.f32 %v9307_v54, %v4439_v11  ;;  %v7274_v18 = vpack.c.bf16 %v4957_v13, %v4957_v13  ;;  %v3015_v22 = vpop.f32.mrb[160].mxu0  ;;  %v3527_v23 = vpop.f32.mrb[160].mxu1 }
 0x243   : > { %v4830_v19 = vmax.f32 %v4574_v14, 0.0  ;;  %6110 = vst.msk [vmem:[%s8596_s22 + $0x130] sm:$0xf] %vm6033_vm4, %v7146_v17  ;;  %v3798_v28 = vadd.f32 %v3015_v22, %v609_v16  ;;  %v3926_v30 = vadd.f32 %v3527_v23, %v737_v29  ;;  %v3017_v20 = vpop.f32.mrb[161].mxu0  ;;  %v3529_v31 = vpop.f32.mrb[161].mxu1  ;;  %v613_v29 = vld [vmem:[#allocation2 + $0x2a0] sm:$0xff] }
 0x244   : > { %v4958_v21 = vmax.f32 %v4702_v15, 0.0  ;;  %6238 = vst.msk [vmem:[%s8596_s22 + $0x330] sm:$0xf] %vm6033_vm4, %v7274_v18  ;;  %v4312_v32 = vld [vmem:[#allocation2 + $0x270] sm:$0xff]  ;;  %v3018_v34 = vpop.f32.mrb[162].mxu0  ;;  %v3530_v36 = vpop.f32.mrb[162].mxu1 }
 0x245   : > { %v7147_v26 = vpack.c.bf16 %v4830_v19, %v4830_v19  ;;  %v4440_v33 = vld [vmem:[#allocation2 + $0x670] sm:$0xff]  ;;  %v4575_v35 = vadd.f32 %v9307_v54, %v4312_v32  ;;  %4055 = vst.msk [vmem:[#allocation2 + $0x280] sm:$0xff] %vm272_vm3, %v3798_v28  ;;  %4183 = vst.msk [vmem:[#allocation2 + $0x680] sm:$0xff] %vm272_vm3, %v3926_v30  ;;  %v3799_v38 = vadd.f32 %v3018_v34, %v610_v24  ;;  %v3020_v40 = vpop.f32.mrb[163].mxu0  ;;  %v3532_v41 = vpop.f32.mrb[163].mxu1  ;;  %v741_v17 = vld [vmem:[#allocation2 + $0x6a0] sm:$0xff] }
 0x246   : > { %v7275_v27 = vpack.c.bf16 %v4958_v21, %v4958_v21  ;;  %v4703_v37 = vadd.f32 %v9307_v54, %v4440_v33  ;;  %v3927_v39 = vadd.f32 %v3530_v36, %v738_v25  ;;  %v614_v25 = vld [vmem:[#allocation2 + $0x2a8] sm:$0xff] }
 0x247   : > { %6111 = vst.msk [vmem:[%s8596_s22 + $0x134] sm:$0xf] %vm6033_vm4, %v7147_v26  ;;  %v4831_v44 = vmax.f32 %v4575_v35, 0.0  ;;  %v742_v26 = vld [vmem:[#allocation2 + $0x6a8] sm:$0xff] }
 0x248   : > { %6239 = vst.msk [vmem:[%s8596_s22 + $0x334] sm:$0xf] %vm6033_vm4, %v7275_v27  ;;  %v4313_v42 = vld [vmem:[#allocation2 + $0x278] sm:$0xff]  ;;  %v4959_v45 = vmax.f32 %v4703_v37, 0.0 }
 0x249   : > { %v4441_v43 = vld [vmem:[#allocation2 + $0x678] sm:$0xff]  ;;  %v4576_v46 = vadd.f32 %v9307_v54, %v4313_v42  ;;  %4056 = vst.msk [vmem:[#allocation2 + $0x288] sm:$0xff] %vm272_vm3, %v3799_v38  ;;  %4184 = vst.msk [vmem:[#allocation2 + $0x688] sm:$0xff] %vm272_vm3, %v3927_v39  ;;  %v7148_v50 = vpack.c.bf16 %v4831_v44, %v4831_v44 }
 0x24a   : > { %v4704_v47 = vadd.f32 %v9307_v54, %v4441_v43  ;;  %v7276_v51 = vpack.c.bf16 %v4959_v45, %v4959_v45  ;;  %v3023_v55 = vpop.f32.mrb[164].mxu0  ;;  %v3535_v56 = vpop.f32.mrb[164].mxu1 }
 0x24b   : > { %v4832_v52 = vmax.f32 %v4576_v46, 0.0  ;;  %6112 = vst.msk [vmem:[%s8596_s22 + $0x138] sm:$0xf] %vm6033_vm4, %v7148_v50  ;;  %v3800_v61 = vadd.f32 %v3023_v55, %v611_v48  ;;  %v3928_v62 = vadd.f32 %v3535_v56, %v739_v49  ;;  %v3025_v63 = vpop.f32.mrb[165].mxu0  ;;  %v3537_v0 = vpop.f32.mrb[165].mxu1  ;;  %v615_v49 = vld [vmem:[#allocation2 + $0x2b0] sm:$0xff] }
 0x24c   : > { %v4960_v53 = vmax.f32 %v4704_v47, 0.0  ;;  %6240 = vst.msk [vmem:[%s8596_s22 + $0x338] sm:$0xf] %vm6033_vm4, %v7276_v51  ;;  %v4314_v1 = vld [vmem:[#allocation2 + $0x280] sm:$0xff]  ;;  %v3026_v3 = vpop.f32.mrb[166].mxu0  ;;  %v3538_v4 = vpop.f32.mrb[166].mxu1 }
 0x24d   : > { %v7149_v59 = vpack.c.bf16 %v4832_v52, %v4832_v52  ;;  %v4442_v2 = vld [vmem:[#allocation2 + $0x680] sm:$0xff]  ;;  %v4577_v5 = vadd.f32 %v9307_v54, %v4314_v1  ;;  %4057 = vst.msk [vmem:[#allocation2 + $0x290] sm:$0xff] %vm272_vm3, %v3800_v61  ;;  %4185 = vst.msk [vmem:[#allocation2 + $0x690] sm:$0xff] %vm272_vm3, %v3928_v62  ;;  %v3801_v7 = vadd.f32 %v3026_v3, %v612_v57  ;;  %v3028_v9 = vpop.f32.mrb[167].mxu0  ;;  %v3540_v10 = vpop.f32.mrb[167].mxu1  ;;  %v743_v50 = vld [vmem:[#allocation2 + $0x6b0] sm:$0xff] }
 0x24e   : > { %v7277_v60 = vpack.c.bf16 %v4960_v53, %v4960_v53  ;;  %v4705_v6 = vadd.f32 %v9307_v54, %v4442_v2  ;;  %v3929_v8 = vadd.f32 %v3538_v4, %v740_v58  ;;  %v616_v58 = vld [vmem:[#allocation2 + $0x2b8] sm:$0xff] }
 0x24f   : > { %6113 = vst.msk [vmem:[%s8596_s22 + $0x13c] sm:$0xf] %vm6033_vm4, %v7149_v59  ;;  %v4833_v13 = vmax.f32 %v4577_v5, 0.0  ;;  %v744_v59 = vld [vmem:[#allocation2 + $0x6b8] sm:$0xff] }
 0x250   : > { %6241 = vst.msk [vmem:[%s8596_s22 + $0x33c] sm:$0xf] %vm6033_vm4, %v7277_v60  ;;  %v4315_v11 = vld [vmem:[#allocation2 + $0x288] sm:$0xff]  ;;  %v4961_v14 = vmax.f32 %v4705_v6, 0.0 }
 0x251   : > { %v4443_v12 = vld [vmem:[#allocation2 + $0x688] sm:$0xff]  ;;  %v4578_v15 = vadd.f32 %v9307_v54, %v4315_v11  ;;  %4058 = vst.msk [vmem:[#allocation2 + $0x298] sm:$0xff] %vm272_vm3, %v3801_v7  ;;  %4186 = vst.msk [vmem:[#allocation2 + $0x698] sm:$0xff] %vm272_vm3, %v3929_v8  ;;  %v7150_v18 = vpack.c.bf16 %v4833_v13, %v4833_v13 }
 0x252   : > { %v4706_v16 = vadd.f32 %v9307_v54, %v4443_v12  ;;  %v7278_v19 = vpack.c.bf16 %v4961_v14, %v4961_v14  ;;  %v3031_v23 = vpop.f32.mrb[168].mxu0  ;;  %v3543_v24 = vpop.f32.mrb[168].mxu1 }
 0x253   : > { %v4834_v21 = vmax.f32 %v4578_v15, 0.0  ;;  %6114 = vst.msk [vmem:[%s8596_s22 + $0x140] sm:$0xf] %vm6033_vm4, %v7150_v18  ;;  %v3802_v30 = vadd.f32 %v3031_v23, %v613_v29  ;;  %v3930_v20 = vadd.f32 %v3543_v24, %v741_v17  ;;  %v3033_v31 = vpop.f32.mrb[169].mxu0  ;;  %v3545_v32 = vpop.f32.mrb[169].mxu1  ;;  %v617_v17 = vld [vmem:[#allocation2 + $0x2c0] sm:$0xff] }
 0x254   : > { %v4962_v22 = vmax.f32 %v4706_v16, 0.0  ;;  %6242 = vst.msk [vmem:[%s8596_s22 + $0x340] sm:$0xf] %vm6033_vm4, %v7278_v19  ;;  %v4316_v33 = vld [vmem:[#allocation2 + $0x290] sm:$0xff]  ;;  %v3034_v36 = vpop.f32.mrb[170].mxu0  ;;  %v3546_v35 = vpop.f32.mrb[170].mxu1 }
 0x255   : > { %v7151_v27 = vpack.c.bf16 %v4834_v21, %v4834_v21  ;;  %v4444_v34 = vld [vmem:[#allocation2 + $0x690] sm:$0xff]  ;;  %v4579_v37 = vadd.f32 %v9307_v54, %v4316_v33  ;;  %4059 = vst.msk [vmem:[#allocation2 + $0x2a0] sm:$0xff] %vm272_vm3, %v3802_v30  ;;  %4187 = vst.msk [vmem:[#allocation2 + $0x6a0] sm:$0xff] %vm272_vm3, %v3930_v20  ;;  %v3803_v39 = vadd.f32 %v3034_v36, %v614_v25  ;;  %v3036_v41 = vpop.f32.mrb[171].mxu0  ;;  %v3548_v42 = vpop.f32.mrb[171].mxu1  ;;  %v745_v18 = vld [vmem:[#allocation2 + $0x6c0] sm:$0xff] }
 0x256   : > { %v7279_v28 = vpack.c.bf16 %v4962_v22, %v4962_v22  ;;  %v4707_v38 = vadd.f32 %v9307_v54, %v4444_v34  ;;  %v3931_v40 = vadd.f32 %v3546_v35, %v742_v26  ;;  %v618_v26 = vld [vmem:[#allocation2 + $0x2c8] sm:$0xff] }
 0x257   : > { %6115 = vst.msk [vmem:[%s8596_s22 + $0x144] sm:$0xf] %vm6033_vm4, %v7151_v27  ;;  %v4835_v45 = vmax.f32 %v4579_v37, 0.0  ;;  %v746_v27 = vld [vmem:[#allocation2 + $0x6c8] sm:$0xff] }
 0x258   : > { %6243 = vst.msk [vmem:[%s8596_s22 + $0x344] sm:$0xf] %vm6033_vm4, %v7279_v28  ;;  %v4317_v43 = vld [vmem:[#allocation2 + $0x298] sm:$0xff]  ;;  %v4963_v46 = vmax.f32 %v4707_v38, 0.0 }
 0x259   : > { %v4445_v44 = vld [vmem:[#allocation2 + $0x698] sm:$0xff]  ;;  %v4580_v47 = vadd.f32 %v9307_v54, %v4317_v43  ;;  %4060 = vst.msk [vmem:[#allocation2 + $0x2a8] sm:$0xff] %vm272_vm3, %v3803_v39  ;;  %4188 = vst.msk [vmem:[#allocation2 + $0x6a8] sm:$0xff] %vm272_vm3, %v3931_v40  ;;  %v7152_v51 = vpack.c.bf16 %v4835_v45, %v4835_v45 }
 0x25a   : > { %v4708_v48 = vadd.f32 %v9307_v54, %v4445_v44  ;;  %v7280_v52 = vpack.c.bf16 %v4963_v46, %v4963_v46  ;;  %v3039_v56 = vpop.f32.mrb[172].mxu0  ;;  %v3551_v57 = vpop.f32.mrb[172].mxu1 }
 0x25b   : > { %v4836_v53 = vmax.f32 %v4580_v47, 0.0  ;;  %6116 = vst.msk [vmem:[%s8596_s22 + $0x148] sm:$0xf] %vm6033_vm4, %v7152_v51  ;;  %v3804_v62 = vadd.f32 %v3039_v56, %v615_v49  ;;  %v3932_v63 = vadd.f32 %v3551_v57, %v743_v50  ;;  %v3041_v0 = vpop.f32.mrb[173].mxu0  ;;  %v3553_v1 = vpop.f32.mrb[173].mxu1  ;;  %v619_v50 = vld [vmem:[#allocation2 + $0x2d0] sm:$0xff] }
 0x25c   : > { %v4964_v55 = vmax.f32 %v4708_v48, 0.0  ;;  %6244 = vst.msk [vmem:[%s8596_s22 + $0x348] sm:$0xf] %vm6033_vm4, %v7280_v52  ;;  %v4318_v2 = vld [vmem:[#allocation2 + $0x2a0] sm:$0xff]  ;;  %v3042_v4 = vpop.f32.mrb[174].mxu0  ;;  %v3554_v5 = vpop.f32.mrb[174].mxu1 }
 0x25d   : > { %v7153_v60 = vpack.c.bf16 %v4836_v53, %v4836_v53  ;;  %v4446_v3 = vld [vmem:[#allocation2 + $0x6a0] sm:$0xff]  ;;  %v4581_v6 = vadd.f32 %v9307_v54, %v4318_v2  ;;  %4061 = vst.msk [vmem:[#allocation2 + $0x2b0] sm:$0xff] %vm272_vm3, %v3804_v62  ;;  %4189 = vst.msk [vmem:[#allocation2 + $0x6b0] sm:$0xff] %vm272_vm3, %v3932_v63  ;;  %v3805_v8 = vadd.f32 %v3042_v4, %v616_v58  ;;  %v3044_v10 = vpop.f32.mrb[175].mxu0  ;;  %v3556_v11 = vpop.f32.mrb[175].mxu1  ;;  %v747_v51 = vld [vmem:[#allocation2 + $0x6d0] sm:$0xff] }
 0x25e   : > { %v7281_v61 = vpack.c.bf16 %v4964_v55, %v4964_v55  ;;  %v4709_v7 = vadd.f32 %v9307_v54, %v4446_v3  ;;  %v3933_v9 = vadd.f32 %v3554_v5, %v744_v59  ;;  %v620_v59 = vld [vmem:[#allocation2 + $0x2d8] sm:$0xff] }
 0x25f   : > { %6117 = vst.msk [vmem:[%s8596_s22 + $0x14c] sm:$0xf] %vm6033_vm4, %v7153_v60  ;;  %v4837_v14 = vmax.f32 %v4581_v6, 0.0  ;;  %v748_v60 = vld [vmem:[#allocation2 + $0x6d8] sm:$0xff] }
 0x260   : > { %6245 = vst.msk [vmem:[%s8596_s22 + $0x34c] sm:$0xf] %vm6033_vm4, %v7281_v61  ;;  %v4319_v12 = vld [vmem:[#allocation2 + $0x2a8] sm:$0xff]  ;;  %v4965_v15 = vmax.f32 %v4709_v7, 0.0 }
 0x261   : > { %v4447_v13 = vld [vmem:[#allocation2 + $0x6a8] sm:$0xff]  ;;  %v4582_v16 = vadd.f32 %v9307_v54, %v4319_v12  ;;  %4062 = vst.msk [vmem:[#allocation2 + $0x2b8] sm:$0xff] %vm272_vm3, %v3805_v8  ;;  %4190 = vst.msk [vmem:[#allocation2 + $0x6b8] sm:$0xff] %vm272_vm3, %v3933_v9  ;;  %v7154_v19 = vpack.c.bf16 %v4837_v14, %v4837_v14 }
 0x262   : > { %v4710_v29 = vadd.f32 %v9307_v54, %v4447_v13  ;;  %v7282_v21 = vpack.c.bf16 %v4965_v15, %v4965_v15  ;;  %v3047_v24 = vpop.f32.mrb[176].mxu0  ;;  %v3559_v25 = vpop.f32.mrb[176].mxu1 }
 0x263   : > { %v4838_v22 = vmax.f32 %v4582_v16, 0.0  ;;  %6118 = vst.msk [vmem:[%s8596_s22 + $0x150] sm:$0xf] %vm6033_vm4, %v7154_v19  ;;  %v3806_v20 = vadd.f32 %v3047_v24, %v617_v17  ;;  %v3934_v31 = vadd.f32 %v3559_v25, %v745_v18  ;;  %v3049_v32 = vpop.f32.mrb[177].mxu0  ;;  %v3561_v33 = vpop.f32.mrb[177].mxu1  ;;  %v621_v18 = vld [vmem:[#allocation2 + $0x2e0] sm:$0xff] }
 0x264   : > { %v4966_v23 = vmax.f32 %v4710_v29, 0.0  ;;  %6246 = vst.msk [vmem:[%s8596_s22 + $0x350] sm:$0xf] %vm6033_vm4, %v7282_v21  ;;  %v4320_v34 = vld [vmem:[#allocation2 + $0x2b0] sm:$0xff]  ;;  %v3050_v35 = vpop.f32.mrb[178].mxu0  ;;  %v3562_v37 = vpop.f32.mrb[178].mxu1 }
 0x265   : > { %v7155_v28 = vpack.c.bf16 %v4838_v22, %v4838_v22  ;;  %v4448_v36 = vld [vmem:[#allocation2 + $0x6b0] sm:$0xff]  ;;  %v4583_v38 = vadd.f32 %v9307_v54, %v4320_v34  ;;  %4063 = vst.msk [vmem:[#allocation2 + $0x2c0] sm:$0xff] %vm272_vm3, %v3806_v20  ;;  %4191 = vst.msk [vmem:[#allocation2 + $0x6c0] sm:$0xff] %vm272_vm3, %v3934_v31  ;;  %v3807_v40 = vadd.f32 %v3050_v35, %v618_v26  ;;  %v3052_v42 = vpop.f32.mrb[179].mxu0  ;;  %v3564_v43 = vpop.f32.mrb[179].mxu1  ;;  %v749_v19 = vld [vmem:[#allocation2 + $0x6e0] sm:$0xff] }
 0x266   : > { %v7283_v30 = vpack.c.bf16 %v4966_v23, %v4966_v23  ;;  %v4711_v39 = vadd.f32 %v9307_v54, %v4448_v36  ;;  %v3935_v41 = vadd.f32 %v3562_v37, %v746_v27  ;;  %v9524_v29 = vld [vmem:[%s9854_s2] ss:$0 sm:$0xff]  ;;  %v622_v27 = vld [vmem:[#allocation2 + $0x2e8] sm:$0xff] }
 0x267   : > { %6119 = vst.msk [vmem:[%s8596_s22 + $0x154] sm:$0xf] %vm6033_vm4, %v7155_v28  ;;  %v4839_v46 = vmax.f32 %v4583_v38, 0.0  ;;  %v750_v28 = vld [vmem:[#allocation2 + $0x6e8] sm:$0xff] }
 0x268   : > { %6247 = vst.msk [vmem:[%s8596_s22 + $0x354] sm:$0xf] %vm6033_vm4, %v7283_v30  ;;  %v4321_v44 = vld [vmem:[#allocation2 + $0x2b8] sm:$0xff]  ;;  %v4967_v47 = vmax.f32 %v4711_v39, 0.0 }
 0x269   : > { %v4449_v45 = vld [vmem:[#allocation2 + $0x6b8] sm:$0xff]  ;;  %v4584_v48 = vadd.f32 %v9307_v54, %v4321_v44  ;;  %4064 = vst.msk [vmem:[#allocation2 + $0x2c8] sm:$0xff] %vm272_vm3, %v3807_v40  ;;  %4192 = vst.msk [vmem:[#allocation2 + $0x6c8] sm:$0xff] %vm272_vm3, %v3935_v41  ;;  %v7156_v52 = vpack.c.bf16 %v4839_v46, %v4839_v46 }
 0x26a   : > { %v4712_v49 = vadd.f32 %v9307_v54, %v4449_v45  ;;  %v7284_v53 = vpack.c.bf16 %v4967_v47, %v4967_v47  ;;  %v3055_v57 = vpop.f32.mrb[180].mxu0  ;;  %v3567_v58 = vpop.f32.mrb[180].mxu1 }
 0x26b   : > { %v4840_v55 = vmax.f32 %v4584_v48, 0.0  ;;  %6120 = vst.msk [vmem:[%s8596_s22 + $0x158] sm:$0xf] %vm6033_vm4, %v7156_v52  ;;  %v3808_v63 = vadd.f32 %v3055_v57, %v619_v50  ;;  %v3936_v0 = vadd.f32 %v3567_v58, %v747_v51  ;;  %v3057_v1 = vpop.f32.mrb[181].mxu0  ;;  %v3569_v2 = vpop.f32.mrb[181].mxu1  ;;  %v623_v51 = vld [vmem:[#allocation2 + $0x2f0] sm:$0xff] }
 0x26c   : > { %v4968_v56 = vmax.f32 %v4712_v49, 0.0  ;;  %6248 = vst.msk [vmem:[%s8596_s22 + $0x358] sm:$0xf] %vm6033_vm4, %v7284_v53  ;;  %v4322_v3 = vld [vmem:[#allocation2 + $0x2c0] sm:$0xff]  ;;  %v3058_v5 = vpop.f32.mrb[182].mxu0  ;;  %v3570_v6 = vpop.f32.mrb[182].mxu1 }
 0x26d   : > { %v7157_v61 = vpack.c.bf16 %v4840_v55, %v4840_v55  ;;  %v4450_v4 = vld [vmem:[#allocation2 + $0x6c0] sm:$0xff]  ;;  %v4585_v7 = vadd.f32 %v9307_v54, %v4322_v3  ;;  %4065 = vst.msk [vmem:[#allocation2 + $0x2d0] sm:$0xff] %vm272_vm3, %v3808_v63  ;;  %4193 = vst.msk [vmem:[#allocation2 + $0x6d0] sm:$0xff] %vm272_vm3, %v3936_v0  ;;  %v3809_v9 = vadd.f32 %v3058_v5, %v620_v59  ;;  %v3060_v11 = vpop.f32.mrb[183].mxu0  ;;  %v3572_v12 = vpop.f32.mrb[183].mxu1  ;;  %v751_v52 = vld [vmem:[#allocation2 + $0x6f0] sm:$0xff] }
 0x26e   : > { %v7285_v62 = vpack.c.bf16 %v4968_v56, %v4968_v56  ;;  %v4713_v8 = vadd.f32 %v9307_v54, %v4450_v4  ;;  %v3937_v10 = vadd.f32 %v3570_v6, %v748_v60  ;;  %v624_v60 = vld [vmem:[#allocation2 + $0x2f8] sm:$0xff] }
 0x26f   : > { %6121 = vst.msk [vmem:[%s8596_s22 + $0x15c] sm:$0xf] %vm6033_vm4, %v7157_v61  ;;  %v4841_v15 = vmax.f32 %v4585_v7, 0.0  ;;  %v752_v61 = vld [vmem:[#allocation2 + $0x6f8] sm:$0xff] }
 0x270   : > { %6249 = vst.msk [vmem:[%s8596_s22 + $0x35c] sm:$0xf] %vm6033_vm4, %v7285_v62  ;;  %v4323_v13 = vld [vmem:[#allocation2 + $0x2c8] sm:$0xff]  ;;  %v4969_v16 = vmax.f32 %v4713_v8, 0.0 }
 0x271   : > { %v4451_v14 = vld [vmem:[#allocation2 + $0x6c8] sm:$0xff]  ;;  %v4586_v54 = vadd.f32 %v9524_v29, %v4323_v13  ;;  %4066 = vst.msk [vmem:[#allocation2 + $0x2d8] sm:$0xff] %vm272_vm3, %v3809_v9  ;;  %4194 = vst.msk [vmem:[#allocation2 + $0x6d8] sm:$0xff] %vm272_vm3, %v3937_v10  ;;  %v7158_v21 = vpack.c.bf16 %v4841_v15, %v4841_v15 }
 0x272   : > { %v4714_v17 = vadd.f32 %v9524_v29, %v4451_v14  ;;  %v7286_v22 = vpack.c.bf16 %v4969_v16, %v4969_v16  ;;  %v3063_v25 = vpop.f32.mrb[184].mxu0  ;;  %v3575_v26 = vpop.f32.mrb[184].mxu1 }
 0x273   : > { %v4842_v23 = vmax.f32 %v4586_v54, 0.0  ;;  %6122 = vst.msk [vmem:[%s8596_s22 + $0x160] sm:$0xf] %vm6033_vm4, %v7158_v21  ;;  %v3810_v31 = vadd.f32 %v3063_v25, %v621_v18  ;;  %v3938_v32 = vadd.f32 %v3575_v26, %v749_v19  ;;  %v3065_v33 = vpop.f32.mrb[185].mxu0  ;;  %v3577_v34 = vpop.f32.mrb[185].mxu1  ;;  %v625_v19 = vld [vmem:[#allocation2 + $0x300] sm:$0xff] }
 0x274   : > { %v4970_v24 = vmax.f32 %v4714_v17, 0.0  ;;  %6250 = vst.msk [vmem:[%s8596_s22 + $0x360] sm:$0xf] %vm6033_vm4, %v7286_v22  ;;  %v4324_v36 = vld [vmem:[#allocation2 + $0x2d0] sm:$0xff]  ;;  %v3066_v37 = vpop.f32.mrb[186].mxu0  ;;  %v3578_v38 = vpop.f32.mrb[186].mxu1 }
 0x275   : > { %v7159_v30 = vpack.c.bf16 %v4842_v23, %v4842_v23  ;;  %v4452_v35 = vld [vmem:[#allocation2 + $0x6d0] sm:$0xff]  ;;  %v4587_v39 = vadd.f32 %v9524_v29, %v4324_v36  ;;  %4067 = vst.msk [vmem:[#allocation2 + $0x2e0] sm:$0xff] %vm272_vm3, %v3810_v31  ;;  %4195 = vst.msk [vmem:[#allocation2 + $0x6e0] sm:$0xff] %vm272_vm3, %v3938_v32  ;;  %v3811_v41 = vadd.f32 %v3066_v37, %v622_v27  ;;  %v3068_v43 = vpop.f32.mrb[187].mxu0  ;;  %v3580_v44 = vpop.f32.mrb[187].mxu1  ;;  %v753_v21 = vld [vmem:[#allocation2 + $0x700] sm:$0xff] }
 0x276   : > { %v7287_v20 = vpack.c.bf16 %v4970_v24, %v4970_v24  ;;  %v4715_v40 = vadd.f32 %v9524_v29, %v4452_v35  ;;  %v3939_v42 = vadd.f32 %v3578_v38, %v750_v28  ;;  %v626_v28 = vld [vmem:[#allocation2 + $0x308] sm:$0xff] }
 0x277   : > { %6123 = vst.msk [vmem:[%s8596_s22 + $0x164] sm:$0xf] %vm6033_vm4, %v7159_v30  ;;  %v4843_v47 = vmax.f32 %v4587_v39, 0.0  ;;  %v754_v30 = vld [vmem:[#allocation2 + $0x708] sm:$0xff] }
 0x278   : > { %6251 = vst.msk [vmem:[%s8596_s22 + $0x364] sm:$0xf] %vm6033_vm4, %v7287_v20  ;;  %v4325_v45 = vld [vmem:[#allocation2 + $0x2d8] sm:$0xff]  ;;  %v4971_v48 = vmax.f32 %v4715_v40, 0.0 }
 0x279   : > { %v4453_v46 = vld [vmem:[#allocation2 + $0x6d8] sm:$0xff]  ;;  %v4588_v49 = vadd.f32 %v9524_v29, %v4325_v45  ;;  %4068 = vst.msk [vmem:[#allocation2 + $0x2e8] sm:$0xff] %vm272_vm3, %v3811_v41  ;;  %4196 = vst.msk [vmem:[#allocation2 + $0x6e8] sm:$0xff] %vm272_vm3, %v3939_v42  ;;  %v7160_v53 = vpack.c.bf16 %v4843_v47, %v4843_v47 }
 0x27a   : > { %v4716_v50 = vadd.f32 %v9524_v29, %v4453_v46  ;;  %v7288_v55 = vpack.c.bf16 %v4971_v48, %v4971_v48  ;;  %v3071_v58 = vpop.f32.mrb[188].mxu0  ;;  %v3583_v59 = vpop.f32.mrb[188].mxu1 }
 0x27b   : > { %v4844_v56 = vmax.f32 %v4588_v49, 0.0  ;;  %6124 = vst.msk [vmem:[%s8596_s22 + $0x168] sm:$0xf] %vm6033_vm4, %v7160_v53  ;;  %v3812_v0 = vadd.f32 %v3071_v58, %v623_v51  ;;  %v3940_v1 = vadd.f32 %v3583_v59, %v751_v52  ;;  %v3073_v2 = vpop.f32.mrb[189].mxu0  ;;  %v3585_v3 = vpop.f32.mrb[189].mxu1  ;;  %v627_v52 = vld [vmem:[#allocation2 + $0x310] sm:$0xff] }
 0x27c   : > { %v4972_v57 = vmax.f32 %v4716_v50, 0.0  ;;  %6252 = vst.msk [vmem:[%s8596_s22 + $0x368] sm:$0xf] %vm6033_vm4, %v7288_v55  ;;  %v4326_v4 = vld [vmem:[#allocation2 + $0x2e0] sm:$0xff]  ;;  %v3074_v6 = vpop.f32.mrb[190].mxu0  ;;  %v3586_v7 = vpop.f32.mrb[190].mxu1 }
 0x27d   : > { %v7161_v62 = vpack.c.bf16 %v4844_v56, %v4844_v56  ;;  %v4454_v5 = vld [vmem:[#allocation2 + $0x6e0] sm:$0xff]  ;;  %v4589_v8 = vadd.f32 %v9524_v29, %v4326_v4  ;;  %4069 = vst.msk [vmem:[#allocation2 + $0x2f0] sm:$0xff] %vm272_vm3, %v3812_v0  ;;  %4197 = vst.msk [vmem:[#allocation2 + $0x6f0] sm:$0xff] %vm272_vm3, %v3940_v1  ;;  %v3813_v10 = vadd.f32 %v3074_v6, %v624_v60  ;;  %v3076_v12 = vpop.f32.mrb[191].mxu0  ;;  %v3588_v13 = vpop.f32.mrb[191].mxu1  ;;  %v755_v53 = vld [vmem:[#allocation2 + $0x710] sm:$0xff] }
 0x27e   : > { %v7289_v63 = vpack.c.bf16 %v4972_v57, %v4972_v57  ;;  %v4717_v9 = vadd.f32 %v9524_v29, %v4454_v5  ;;  %v3941_v11 = vadd.f32 %v3586_v7, %v752_v61  ;;  %v628_v61 = vld [vmem:[#allocation2 + $0x318] sm:$0xff] }
 0x27f   : > { %6125 = vst.msk [vmem:[%s8596_s22 + $0x16c] sm:$0xf] %vm6033_vm4, %v7161_v62  ;;  %v4845_v16 = vmax.f32 %v4589_v8, 0.0  ;;  %v756_v62 = vld [vmem:[#allocation2 + $0x718] sm:$0xff] }
 0x280   : > { %6253 = vst.msk [vmem:[%s8596_s22 + $0x36c] sm:$0xf] %vm6033_vm4, %v7289_v63  ;;  %v4327_v14 = vld [vmem:[#allocation2 + $0x2e8] sm:$0xff]  ;;  %v4973_v54 = vmax.f32 %v4717_v9, 0.0 }
 0x281   : > { %v4455_v15 = vld [vmem:[#allocation2 + $0x6e8] sm:$0xff]  ;;  %v4590_v17 = vadd.f32 %v9524_v29, %v4327_v14  ;;  %4070 = vst.msk [vmem:[#allocation2 + $0x2f8] sm:$0xff] %vm272_vm3, %v3813_v10  ;;  %4198 = vst.msk [vmem:[#allocation2 + $0x6f8] sm:$0xff] %vm272_vm3, %v3941_v11  ;;  %v7162_v22 = vpack.c.bf16 %v4845_v16, %v4845_v16 }
 0x282   : > { %v4718_v18 = vadd.f32 %v9524_v29, %v4455_v15  ;;  %v7290_v23 = vpack.c.bf16 %v4973_v54, %v4973_v54  ;;  %v3079_v26 = vpop.f32.mrb[192].mxu0  ;;  %v3591_v27 = vpop.f32.mrb[192].mxu1 }
 0x283   : > { %v4846_v24 = vmax.f32 %v4590_v17, 0.0  ;;  %6126 = vst.msk [vmem:[%s8596_s22 + $0x170] sm:$0xf] %vm6033_vm4, %v7162_v22  ;;  %v3814_v32 = vadd.f32 %v3079_v26, %v625_v19  ;;  %v3942_v33 = vadd.f32 %v3591_v27, %v753_v21  ;;  %v3081_v34 = vpop.f32.mrb[193].mxu0  ;;  %v3593_v36 = vpop.f32.mrb[193].mxu1  ;;  %v629_v21 = vld [vmem:[#allocation2 + $0x320] sm:$0xff] }
 0x284   : > { %v4974_v25 = vmax.f32 %v4718_v18, 0.0  ;;  %6254 = vst.msk [vmem:[%s8596_s22 + $0x370] sm:$0xf] %vm6033_vm4, %v7290_v23  ;;  %v4328_v35 = vld [vmem:[#allocation2 + $0x2f0] sm:$0xff]  ;;  %v3082_v38 = vpop.f32.mrb[194].mxu0  ;;  %v3594_v39 = vpop.f32.mrb[194].mxu1 }
 0x285   : > { %v7163_v20 = vpack.c.bf16 %v4846_v24, %v4846_v24  ;;  %v4456_v37 = vld [vmem:[#allocation2 + $0x6f0] sm:$0xff]  ;;  %v4591_v40 = vadd.f32 %v9524_v29, %v4328_v35  ;;  %4071 = vst.msk [vmem:[#allocation2 + $0x300] sm:$0xff] %vm272_vm3, %v3814_v32  ;;  %4199 = vst.msk [vmem:[#allocation2 + $0x700] sm:$0xff] %vm272_vm3, %v3942_v33  ;;  %v3815_v42 = vadd.f32 %v3082_v38, %v626_v28  ;;  %v3084_v44 = vpop.f32.mrb[195].mxu0  ;;  %v3596_v45 = vpop.f32.mrb[195].mxu1  ;;  %v757_v22 = vld [vmem:[#allocation2 + $0x720] sm:$0xff] }
 0x286   : > { %v7291_v31 = vpack.c.bf16 %v4974_v25, %v4974_v25  ;;  %v4719_v41 = vadd.f32 %v9524_v29, %v4456_v37  ;;  %v3943_v43 = vadd.f32 %v3594_v39, %v754_v30  ;;  %v630_v30 = vld [vmem:[#allocation2 + $0x328] sm:$0xff] }
 0x287   : > { %6127 = vst.msk [vmem:[%s8596_s22 + $0x174] sm:$0xf] %vm6033_vm4, %v7163_v20  ;;  %v4847_v48 = vmax.f32 %v4591_v40, 0.0  ;;  %v758_v20 = vld [vmem:[#allocation2 + $0x728] sm:$0xff] }
 0x288   : > { %6255 = vst.msk [vmem:[%s8596_s22 + $0x374] sm:$0xf] %vm6033_vm4, %v7291_v31  ;;  %v4329_v46 = vld [vmem:[#allocation2 + $0x2f8] sm:$0xff]  ;;  %v4975_v49 = vmax.f32 %v4719_v41, 0.0 }
 0x289   : > { %v4457_v47 = vld [vmem:[#allocation2 + $0x6f8] sm:$0xff]  ;;  %v4592_v50 = vadd.f32 %v9524_v29, %v4329_v46  ;;  %4072 = vst.msk [vmem:[#allocation2 + $0x308] sm:$0xff] %vm272_vm3, %v3815_v42  ;;  %4200 = vst.msk [vmem:[#allocation2 + $0x708] sm:$0xff] %vm272_vm3, %v3943_v43  ;;  %v7164_v55 = vpack.c.bf16 %v4847_v48, %v4847_v48 }
 0x28a   : > { %v4720_v51 = vadd.f32 %v9524_v29, %v4457_v47  ;;  %v7292_v56 = vpack.c.bf16 %v4975_v49, %v4975_v49  ;;  %v3087_v59 = vpop.f32.mrb[196].mxu0  ;;  %v3599_v60 = vpop.f32.mrb[196].mxu1 }
 0x28b   : > { %v4848_v57 = vmax.f32 %v4592_v50, 0.0  ;;  %6128 = vst.msk [vmem:[%s8596_s22 + $0x178] sm:$0xf] %vm6033_vm4, %v7164_v55  ;;  %v3816_v1 = vadd.f32 %v3087_v59, %v627_v52  ;;  %v3944_v2 = vadd.f32 %v3599_v60, %v755_v53  ;;  %v3089_v3 = vpop.f32.mrb[197].mxu0  ;;  %v3601_v4 = vpop.f32.mrb[197].mxu1  ;;  %v631_v53 = vld [vmem:[#allocation2 + $0x330] sm:$0xff] }
 0x28c   : > { %v4976_v58 = vmax.f32 %v4720_v51, 0.0  ;;  %6256 = vst.msk [vmem:[%s8596_s22 + $0x378] sm:$0xf] %vm6033_vm4, %v7292_v56  ;;  %v4330_v5 = vld [vmem:[#allocation2 + $0x300] sm:$0xff]  ;;  %v3090_v7 = vpop.f32.mrb[198].mxu0  ;;  %v3602_v8 = vpop.f32.mrb[198].mxu1 }
 0x28d   : > { %v7165_v63 = vpack.c.bf16 %v4848_v57, %v4848_v57  ;;  %v4458_v6 = vld [vmem:[#allocation2 + $0x700] sm:$0xff]  ;;  %v4593_v9 = vadd.f32 %v9524_v29, %v4330_v5  ;;  %4073 = vst.msk [vmem:[#allocation2 + $0x310] sm:$0xff] %vm272_vm3, %v3816_v1  ;;  %4201 = vst.msk [vmem:[#allocation2 + $0x710] sm:$0xff] %vm272_vm3, %v3944_v2  ;;  %v3817_v11 = vadd.f32 %v3090_v7, %v628_v61  ;;  %v3092_v13 = vpop.f32.mrb[199].mxu0  ;;  %v3604_v14 = vpop.f32.mrb[199].mxu1  ;;  %v759_v55 = vld [vmem:[#allocation2 + $0x730] sm:$0xff] }
 0x28e   : > { %v7293_v0 = vpack.c.bf16 %v4976_v58, %v4976_v58  ;;  %v4721_v10 = vadd.f32 %v9524_v29, %v4458_v6  ;;  %v3945_v12 = vadd.f32 %v3602_v8, %v756_v62  ;;  %v632_v62 = vld [vmem:[#allocation2 + $0x338] sm:$0xff] }
 0x28f   : > { %6129 = vst.msk [vmem:[%s8596_s22 + $0x17c] sm:$0xf] %vm6033_vm4, %v7165_v63  ;;  %v4849_v54 = vmax.f32 %v4593_v9, 0.0  ;;  %v760_v63 = vld [vmem:[#allocation2 + $0x738] sm:$0xff] }
 0x290   : > { %6257 = vst.msk [vmem:[%s8596_s22 + $0x37c] sm:$0xf] %vm6033_vm4, %v7293_v0  ;;  %v4331_v15 = vld [vmem:[#allocation2 + $0x308] sm:$0xff]  ;;  %v4977_v17 = vmax.f32 %v4721_v10, 0.0 }
 0x291   : > { %v4459_v16 = vld [vmem:[#allocation2 + $0x708] sm:$0xff]  ;;  %v4594_v18 = vadd.f32 %v9524_v29, %v4331_v15  ;;  %4074 = vst.msk [vmem:[#allocation2 + $0x318] sm:$0xff] %vm272_vm3, %v3817_v11  ;;  %4202 = vst.msk [vmem:[#allocation2 + $0x718] sm:$0xff] %vm272_vm3, %v3945_v12  ;;  %v7166_v23 = vpack.c.bf16 %v4849_v54, %v4849_v54 }
 0x292   : > { %v4722_v19 = vadd.f32 %v9524_v29, %v4459_v16  ;;  %v7294_v24 = vpack.c.bf16 %v4977_v17, %v4977_v17  ;;  %v3095_v27 = vpop.f32.mrb[200].mxu0  ;;  %v3607_v28 = vpop.f32.mrb[200].mxu1 }
 0x293   : > { %v4850_v25 = vmax.f32 %v4594_v18, 0.0  ;;  %6130 = vst.msk [vmem:[%s8596_s22 + $0x180] sm:$0xf] %vm6033_vm4, %v7166_v23  ;;  %v3818_v33 = vadd.f32 %v3095_v27, %v629_v21  ;;  %v3946_v34 = vadd.f32 %v3607_v28, %v757_v22  ;;  %v3097_v36 = vpop.f32.mrb[201].mxu0  ;;  %v3609_v35 = vpop.f32.mrb[201].mxu1  ;;  %v633_v22 = vld [vmem:[#allocation2 + $0x340] sm:$0xff] }
 0x294   : > { %v4978_v26 = vmax.f32 %v4722_v19, 0.0  ;;  %6258 = vst.msk [vmem:[%s8596_s22 + $0x380] sm:$0xf] %vm6033_vm4, %v7294_v24  ;;  %v4332_v37 = vld [vmem:[#allocation2 + $0x310] sm:$0xff]  ;;  %v3098_v39 = vpop.f32.mrb[202].mxu0  ;;  %v3610_v40 = vpop.f32.mrb[202].mxu1 }
 0x295   : > { %v7167_v31 = vpack.c.bf16 %v4850_v25, %v4850_v25  ;;  %v4460_v38 = vld [vmem:[#allocation2 + $0x710] sm:$0xff]  ;;  %v4595_v41 = vadd.f32 %v9524_v29, %v4332_v37  ;;  %4075 = vst.msk [vmem:[#allocation2 + $0x320] sm:$0xff] %vm272_vm3, %v3818_v33  ;;  %4203 = vst.msk [vmem:[#allocation2 + $0x720] sm:$0xff] %vm272_vm3, %v3946_v34  ;;  %v3819_v43 = vadd.f32 %v3098_v39, %v630_v30  ;;  %v3100_v45 = vpop.f32.mrb[203].mxu0  ;;  %v3612_v46 = vpop.f32.mrb[203].mxu1  ;;  %v761_v23 = vld [vmem:[#allocation2 + $0x740] sm:$0xff] }
 0x296   : > { %v7295_v32 = vpack.c.bf16 %v4978_v26, %v4978_v26  ;;  %v4723_v42 = vadd.f32 %v9524_v29, %v4460_v38  ;;  %v3947_v44 = vadd.f32 %v3610_v40, %v758_v20  ;;  %v634_v20 = vld [vmem:[#allocation2 + $0x348] sm:$0xff] }
 0x297   : > { %6131 = vst.msk [vmem:[%s8596_s22 + $0x184] sm:$0xf] %vm6033_vm4, %v7167_v31  ;;  %v4851_v49 = vmax.f32 %v4595_v41, 0.0  ;;  %v762_v31 = vld [vmem:[#allocation2 + $0x748] sm:$0xff] }
 0x298   : > { %6259 = vst.msk [vmem:[%s8596_s22 + $0x384] sm:$0xf] %vm6033_vm4, %v7295_v32  ;;  %v4333_v47 = vld [vmem:[#allocation2 + $0x318] sm:$0xff]  ;;  %v4979_v50 = vmax.f32 %v4723_v42, 0.0 }
 0x299   : > { %v4461_v48 = vld [vmem:[#allocation2 + $0x718] sm:$0xff]  ;;  %v4596_v51 = vadd.f32 %v9524_v29, %v4333_v47  ;;  %4076 = vst.msk [vmem:[#allocation2 + $0x328] sm:$0xff] %vm272_vm3, %v3819_v43  ;;  %4204 = vst.msk [vmem:[#allocation2 + $0x728] sm:$0xff] %vm272_vm3, %v3947_v44  ;;  %v7168_v56 = vpack.c.bf16 %v4851_v49, %v4851_v49 }
 0x29a   : > { %v4724_v52 = vadd.f32 %v9524_v29, %v4461_v48  ;;  %v7296_v57 = vpack.c.bf16 %v4979_v50, %v4979_v50  ;;  %v3103_v60 = vpop.f32.mrb[204].mxu0  ;;  %v3615_v61 = vpop.f32.mrb[204].mxu1 }
 0x29b   : > { %v4852_v58 = vmax.f32 %v4596_v51, 0.0  ;;  %6132 = vst.msk [vmem:[%s8596_s22 + $0x188] sm:$0xf] %vm6033_vm4, %v7168_v56  ;;  %v3820_v2 = vadd.f32 %v3103_v60, %v631_v53  ;;  %v3948_v3 = vadd.f32 %v3615_v61, %v759_v55  ;;  %v3105_v4 = vpop.f32.mrb[205].mxu0  ;;  %v3617_v5 = vpop.f32.mrb[205].mxu1  ;;  %v635_v55 = vld [vmem:[#allocation2 + $0x350] sm:$0xff] }
 0x29c   : > { %v4980_v59 = vmax.f32 %v4724_v52, 0.0  ;;  %6260 = vst.msk [vmem:[%s8596_s22 + $0x388] sm:$0xf] %vm6033_vm4, %v7296_v57  ;;  %v4334_v6 = vld [vmem:[#allocation2 + $0x320] sm:$0xff]  ;;  %v3106_v8 = vpop.f32.mrb[206].mxu0  ;;  %v3618_v9 = vpop.f32.mrb[206].mxu1 }
 0x29d   : > { %v7169_v0 = vpack.c.bf16 %v4852_v58, %v4852_v58  ;;  %v4462_v7 = vld [vmem:[#allocation2 + $0x720] sm:$0xff]  ;;  %v4597_v10 = vadd.f32 %v9524_v29, %v4334_v6  ;;  %4077 = vst.msk [vmem:[#allocation2 + $0x330] sm:$0xff] %vm272_vm3, %v3820_v2  ;;  %4205 = vst.msk [vmem:[#allocation2 + $0x730] sm:$0xff] %vm272_vm3, %v3948_v3  ;;  %v3821_v12 = vadd.f32 %v3106_v8, %v632_v62  ;;  %v3108_v14 = vpop.f32.mrb[207].mxu0  ;;  %v3620_v15 = vpop.f32.mrb[207].mxu1  ;;  %v763_v56 = vld [vmem:[#allocation2 + $0x750] sm:$0xff] }
 0x29e   : > { %v7297_v1 = vpack.c.bf16 %v4980_v59, %v4980_v59  ;;  %v4725_v11 = vadd.f32 %v9524_v29, %v4462_v7  ;;  %v3949_v13 = vadd.f32 %v3618_v9, %v760_v63  ;;  %v636_v63 = vld [vmem:[#allocation2 + $0x358] sm:$0xff] }
 0x29f   : > { %6133 = vst.msk [vmem:[%s8596_s22 + $0x18c] sm:$0xf] %vm6033_vm4, %v7169_v0  ;;  %v4853_v17 = vmax.f32 %v4597_v10, 0.0  ;;  %v764_v0 = vld [vmem:[#allocation2 + $0x758] sm:$0xff] }
 0x2a0   : > { %6261 = vst.msk [vmem:[%s8596_s22 + $0x38c] sm:$0xf] %vm6033_vm4, %v7297_v1  ;;  %v4335_v16 = vld [vmem:[#allocation2 + $0x328] sm:$0xff]  ;;  %v4981_v18 = vmax.f32 %v4725_v11, 0.0 }
 0x2a1   : > { %v4463_v54 = vld [vmem:[#allocation2 + $0x728] sm:$0xff]  ;;  %v4598_v19 = vadd.f32 %v9524_v29, %v4335_v16  ;;  %4078 = vst.msk [vmem:[#allocation2 + $0x338] sm:$0xff] %vm272_vm3, %v3821_v12  ;;  %4206 = vst.msk [vmem:[#allocation2 + $0x738] sm:$0xff] %vm272_vm3, %v3949_v13  ;;  %v7170_v24 = vpack.c.bf16 %v4853_v17, %v4853_v17 }
 0x2a2   : > { %v4726_v21 = vadd.f32 %v9524_v29, %v4463_v54  ;;  %v7298_v25 = vpack.c.bf16 %v4981_v18, %v4981_v18  ;;  %v3111_v28 = vpop.f32.mrb[208].mxu0  ;;  %v3623_v30 = vpop.f32.mrb[208].mxu1 }
 0x2a3   : > { %v4854_v26 = vmax.f32 %v4598_v19, 0.0  ;;  %6134 = vst.msk [vmem:[%s8596_s22 + $0x190] sm:$0xf] %vm6033_vm4, %v7170_v24  ;;  %v3822_v34 = vadd.f32 %v3111_v28, %v633_v22  ;;  %v3950_v36 = vadd.f32 %v3623_v30, %v761_v23  ;;  %v3113_v35 = vpop.f32.mrb[209].mxu0  ;;  %v3625_v37 = vpop.f32.mrb[209].mxu1  ;;  %v637_v23 = vld [vmem:[#allocation2 + $0x360] sm:$0xff] }
 0x2a4   : > { %v4982_v27 = vmax.f32 %v4726_v21, 0.0  ;;  %6262 = vst.msk [vmem:[%s8596_s22 + $0x390] sm:$0xf] %vm6033_vm4, %v7298_v25  ;;  %v4336_v38 = vld [vmem:[#allocation2 + $0x330] sm:$0xff]  ;;  %v3114_v40 = vpop.f32.mrb[210].mxu0  ;;  %v3626_v41 = vpop.f32.mrb[210].mxu1 }
 0x2a5   : > { %v7171_v32 = vpack.c.bf16 %v4854_v26, %v4854_v26  ;;  %v4464_v39 = vld [vmem:[#allocation2 + $0x730] sm:$0xff]  ;;  %v4599_v42 = vadd.f32 %v9524_v29, %v4336_v38  ;;  %4079 = vst.msk [vmem:[#allocation2 + $0x340] sm:$0xff] %vm272_vm3, %v3822_v34  ;;  %4207 = vst.msk [vmem:[#allocation2 + $0x740] sm:$0xff] %vm272_vm3, %v3950_v36  ;;  %v3823_v44 = vadd.f32 %v3114_v40, %v634_v20  ;;  %v3116_v46 = vpop.f32.mrb[211].mxu0  ;;  %v3628_v47 = vpop.f32.mrb[211].mxu1  ;;  %v765_v24 = vld [vmem:[#allocation2 + $0x760] sm:$0xff] }
 0x2a6   : > { %v7299_v33 = vpack.c.bf16 %v4982_v27, %v4982_v27  ;;  %v4727_v43 = vadd.f32 %v9524_v29, %v4464_v39  ;;  %v3951_v45 = vadd.f32 %v3626_v41, %v762_v31  ;;  %v638_v31 = vld [vmem:[#allocation2 + $0x368] sm:$0xff] }
 0x2a7   : > { %6135 = vst.msk [vmem:[%s8596_s22 + $0x194] sm:$0xf] %vm6033_vm4, %v7171_v32  ;;  %v4855_v50 = vmax.f32 %v4599_v42, 0.0  ;;  %v766_v32 = vld [vmem:[#allocation2 + $0x768] sm:$0xff] }
 0x2a8   : > { %6263 = vst.msk [vmem:[%s8596_s22 + $0x394] sm:$0xf] %vm6033_vm4, %v7299_v33  ;;  %v4337_v48 = vld [vmem:[#allocation2 + $0x338] sm:$0xff]  ;;  %v4983_v51 = vmax.f32 %v4727_v43, 0.0 }
 0x2a9   : > { %v4465_v49 = vld [vmem:[#allocation2 + $0x738] sm:$0xff]  ;;  %v4600_v52 = vadd.f32 %v9524_v29, %v4337_v48  ;;  %4080 = vst.msk [vmem:[#allocation2 + $0x348] sm:$0xff] %vm272_vm3, %v3823_v44  ;;  %4208 = vst.msk [vmem:[#allocation2 + $0x748] sm:$0xff] %vm272_vm3, %v3951_v45  ;;  %v7172_v57 = vpack.c.bf16 %v4855_v50, %v4855_v50 }
 0x2aa   : > { %v4728_v53 = vadd.f32 %v9524_v29, %v4465_v49  ;;  %v7300_v58 = vpack.c.bf16 %v4983_v51, %v4983_v51  ;;  %v3119_v61 = vpop.f32.mrb[212].mxu0  ;;  %v3631_v62 = vpop.f32.mrb[212].mxu1 }
 0x2ab   : > { %v4856_v59 = vmax.f32 %v4600_v52, 0.0  ;;  %6136 = vst.msk [vmem:[%s8596_s22 + $0x198] sm:$0xf] %vm6033_vm4, %v7172_v57  ;;  %v3824_v3 = vadd.f32 %v3119_v61, %v635_v55  ;;  %v3952_v4 = vadd.f32 %v3631_v62, %v763_v56  ;;  %v3121_v5 = vpop.f32.mrb[213].mxu0  ;;  %v3633_v6 = vpop.f32.mrb[213].mxu1  ;;  %v639_v56 = vld [vmem:[#allocation2 + $0x370] sm:$0xff] }
 0x2ac   : > { %v4984_v60 = vmax.f32 %v4728_v53, 0.0  ;;  %6264 = vst.msk [vmem:[%s8596_s22 + $0x398] sm:$0xf] %vm6033_vm4, %v7300_v58  ;;  %v4338_v7 = vld [vmem:[#allocation2 + $0x340] sm:$0xff]  ;;  %v3122_v9 = vpop.f32.mrb[214].mxu0  ;;  %v3634_v10 = vpop.f32.mrb[214].mxu1 }
 0x2ad   : > { %v7173_v1 = vpack.c.bf16 %v4856_v59, %v4856_v59  ;;  %v4466_v8 = vld [vmem:[#allocation2 + $0x740] sm:$0xff]  ;;  %v4601_v11 = vadd.f32 %v9524_v29, %v4338_v7  ;;  %4081 = vst.msk [vmem:[#allocation2 + $0x350] sm:$0xff] %vm272_vm3, %v3824_v3  ;;  %4209 = vst.msk [vmem:[#allocation2 + $0x750] sm:$0xff] %vm272_vm3, %v3952_v4  ;;  %v3825_v13 = vadd.f32 %v3122_v9, %v636_v63  ;;  %v3124_v15 = vpop.f32.mrb[215].mxu0  ;;  %v3636_v16 = vpop.f32.mrb[215].mxu1  ;;  %v767_v57 = vld [vmem:[#allocation2 + $0x770] sm:$0xff] }
 0x2ae   : > { %v7301_v2 = vpack.c.bf16 %v4984_v60, %v4984_v60  ;;  %v4729_v12 = vadd.f32 %v9524_v29, %v4466_v8  ;;  %v3953_v14 = vadd.f32 %v3634_v10, %v764_v0  ;;  %v640_v0 = vld [vmem:[#allocation2 + $0x378] sm:$0xff] }
 0x2af   : > { %6137 = vst.msk [vmem:[%s8596_s22 + $0x19c] sm:$0xf] %vm6033_vm4, %v7173_v1  ;;  %v4857_v18 = vmax.f32 %v4601_v11, 0.0  ;;  %v768_v1 = vld [vmem:[#allocation2 + $0x778] sm:$0xff] }
 0x2b0   : > { %6265 = vst.msk [vmem:[%s8596_s22 + $0x39c] sm:$0xf] %vm6033_vm4, %v7301_v2  ;;  %v4339_v54 = vld [vmem:[#allocation2 + $0x348] sm:$0xff]  ;;  %v4985_v19 = vmax.f32 %v4729_v12, 0.0 }
 0x2b1   : > { %v4467_v17 = vld [vmem:[#allocation2 + $0x748] sm:$0xff]  ;;  %v4602_v21 = vadd.f32 %v9524_v29, %v4339_v54  ;;  %4082 = vst.msk [vmem:[#allocation2 + $0x358] sm:$0xff] %vm272_vm3, %v3825_v13  ;;  %4210 = vst.msk [vmem:[#allocation2 + $0x758] sm:$0xff] %vm272_vm3, %v3953_v14  ;;  %v7174_v25 = vpack.c.bf16 %v4857_v18, %v4857_v18 }
 0x2b2   : > { %v4730_v22 = vadd.f32 %v9524_v29, %v4467_v17  ;;  %v7302_v26 = vpack.c.bf16 %v4985_v19, %v4985_v19  ;;  %v3127_v30 = vpop.f32.mrb[216].mxu0  ;;  %v3639_v20 = vpop.f32.mrb[216].mxu1 }
 0x2b3   : > { %v4858_v27 = vmax.f32 %v4602_v21, 0.0  ;;  %6138 = vst.msk [vmem:[%s8596_s22 + $0x1a0] sm:$0xf] %vm6033_vm4, %v7174_v25  ;;  %v3826_v36 = vadd.f32 %v3127_v30, %v637_v23  ;;  %v3954_v35 = vadd.f32 %v3639_v20, %v765_v24  ;;  %v3129_v37 = vpop.f32.mrb[217].mxu0  ;;  %v3641_v38 = vpop.f32.mrb[217].mxu1  ;;  %v641_v24 = vld [vmem:[#allocation2 + $0x380] sm:$0xff] }
 0x2b4   : > { %v4986_v28 = vmax.f32 %v4730_v22, 0.0  ;;  %6266 = vst.msk [vmem:[%s8596_s22 + $0x3a0] sm:$0xf] %vm6033_vm4, %v7302_v26  ;;  %v4340_v39 = vld [vmem:[#allocation2 + $0x350] sm:$0xff]  ;;  %v3130_v41 = vpop.f32.mrb[218].mxu0  ;;  %v3642_v42 = vpop.f32.mrb[218].mxu1 }
 0x2b5   : > { %v7175_v33 = vpack.c.bf16 %v4858_v27, %v4858_v27  ;;  %v4468_v40 = vld [vmem:[#allocation2 + $0x750] sm:$0xff]  ;;  %v4603_v43 = vadd.f32 %v9524_v29, %v4340_v39  ;;  %4083 = vst.msk [vmem:[#allocation2 + $0x360] sm:$0xff] %vm272_vm3, %v3826_v36  ;;  %4211 = vst.msk [vmem:[#allocation2 + $0x760] sm:$0xff] %vm272_vm3, %v3954_v35  ;;  %v3827_v45 = vadd.f32 %v3130_v41, %v638_v31  ;;  %v3132_v47 = vpop.f32.mrb[219].mxu0  ;;  %v3644_v48 = vpop.f32.mrb[219].mxu1  ;;  %v769_v25 = vld [vmem:[#allocation2 + $0x780] sm:$0xff] }
 0x2b6   : > { %v7303_v34 = vpack.c.bf16 %v4986_v28, %v4986_v28  ;;  %v4731_v44 = vadd.f32 %v9524_v29, %v4468_v40  ;;  %v3955_v46 = vadd.f32 %v3642_v42, %v766_v32  ;;  %v642_v32 = vld [vmem:[#allocation2 + $0x388] sm:$0xff] }
 0x2b7   : > { %6139 = vst.msk [vmem:[%s8596_s22 + $0x1a4] sm:$0xf] %vm6033_vm4, %v7175_v33  ;;  %v4859_v51 = vmax.f32 %v4603_v43, 0.0  ;;  %v770_v33 = vld [vmem:[#allocation2 + $0x788] sm:$0xff] }
 0x2b8   : > { %6267 = vst.msk [vmem:[%s8596_s22 + $0x3a4] sm:$0xf] %vm6033_vm4, %v7303_v34  ;;  %v4341_v49 = vld [vmem:[#allocation2 + $0x358] sm:$0xff]  ;;  %v4987_v52 = vmax.f32 %v4731_v44, 0.0 }
 0x2b9   : > { %v4469_v50 = vld [vmem:[#allocation2 + $0x758] sm:$0xff]  ;;  %v4604_v53 = vadd.f32 %v9524_v29, %v4341_v49  ;;  %4084 = vst.msk [vmem:[#allocation2 + $0x368] sm:$0xff] %vm272_vm3, %v3827_v45  ;;  %4212 = vst.msk [vmem:[#allocation2 + $0x768] sm:$0xff] %vm272_vm3, %v3955_v46  ;;  %v7176_v58 = vpack.c.bf16 %v4859_v51, %v4859_v51 }
 0x2ba   : > { %v4732_v55 = vadd.f32 %v9524_v29, %v4469_v50  ;;  %v7304_v59 = vpack.c.bf16 %v4987_v52, %v4987_v52  ;;  %v3135_v62 = vpop.f32.mrb[220].mxu0  ;;  %v3647_v63 = vpop.f32.mrb[220].mxu1 }
 0x2bb   : > { %v4860_v60 = vmax.f32 %v4604_v53, 0.0  ;;  %6140 = vst.msk [vmem:[%s8596_s22 + $0x1a8] sm:$0xf] %vm6033_vm4, %v7176_v58  ;;  %v3828_v4 = vadd.f32 %v3135_v62, %v639_v56  ;;  %v3956_v5 = vadd.f32 %v3647_v63, %v767_v57  ;;  %v3137_v6 = vpop.f32.mrb[221].mxu0  ;;  %v3649_v7 = vpop.f32.mrb[221].mxu1  ;;  %v643_v57 = vld [vmem:[#allocation2 + $0x390] sm:$0xff] }
 0x2bc   : > { %v4988_v61 = vmax.f32 %v4732_v55, 0.0  ;;  %6268 = vst.msk [vmem:[%s8596_s22 + $0x3a8] sm:$0xf] %vm6033_vm4, %v7304_v59  ;;  %v4342_v8 = vld [vmem:[#allocation2 + $0x360] sm:$0xff]  ;;  %v3138_v10 = vpop.f32.mrb[222].mxu0  ;;  %v3650_v11 = vpop.f32.mrb[222].mxu1 }
 0x2bd   : > { %v7177_v2 = vpack.c.bf16 %v4860_v60, %v4860_v60  ;;  %v4470_v9 = vld [vmem:[#allocation2 + $0x760] sm:$0xff]  ;;  %v4605_v12 = vadd.f32 %v9524_v29, %v4342_v8  ;;  %4085 = vst.msk [vmem:[#allocation2 + $0x370] sm:$0xff] %vm272_vm3, %v3828_v4  ;;  %4213 = vst.msk [vmem:[#allocation2 + $0x770] sm:$0xff] %vm272_vm3, %v3956_v5  ;;  %v3829_v14 = vadd.f32 %v3138_v10, %v640_v0  ;;  %v3140_v16 = vpop.f32.mrb[223].mxu0  ;;  %v3652_v54 = vpop.f32.mrb[223].mxu1  ;;  %v771_v58 = vld [vmem:[#allocation2 + $0x790] sm:$0xff] }
 0x2be   : > { %v7305_v3 = vpack.c.bf16 %v4988_v61, %v4988_v61  ;;  %v4733_v13 = vadd.f32 %v9524_v29, %v4470_v9  ;;  %v3957_v15 = vadd.f32 %v3650_v11, %v768_v1  ;;  %v644_v1 = vld [vmem:[#allocation2 + $0x398] sm:$0xff] }
 0x2bf   : > { %6141 = vst.msk [vmem:[%s8596_s22 + $0x1ac] sm:$0xf] %vm6033_vm4, %v7177_v2  ;;  %v4861_v19 = vmax.f32 %v4605_v12, 0.0  ;;  %v772_v2 = vld [vmem:[#allocation2 + $0x798] sm:$0xff] }
 0x2c0   : > { %6269 = vst.msk [vmem:[%s8596_s22 + $0x3ac] sm:$0xf] %vm6033_vm4, %v7305_v3  ;;  %v4343_v17 = vld [vmem:[#allocation2 + $0x368] sm:$0xff]  ;;  %v4989_v21 = vmax.f32 %v4733_v13, 0.0 }
 0x2c1   : > { %v4471_v18 = vld [vmem:[#allocation2 + $0x768] sm:$0xff]  ;;  %v4606_v22 = vadd.f32 %v9524_v29, %v4343_v17  ;;  %4086 = vst.msk [vmem:[#allocation2 + $0x378] sm:$0xff] %vm272_vm3, %v3829_v14  ;;  %4214 = vst.msk [vmem:[#allocation2 + $0x778] sm:$0xff] %vm272_vm3, %v3957_v15  ;;  %v7178_v26 = vpack.c.bf16 %v4861_v19, %v4861_v19 }
 0x2c2   : > { %v4734_v23 = vadd.f32 %v9524_v29, %v4471_v18  ;;  %v7306_v27 = vpack.c.bf16 %v4989_v21, %v4989_v21  ;;  %v3143_v20 = vpop.f32.mrb[224].mxu0  ;;  %v3655_v31 = vpop.f32.mrb[224].mxu1 }
 0x2c3   : > { %v4862_v28 = vmax.f32 %v4606_v22, 0.0  ;;  %6142 = vst.msk [vmem:[%s8596_s22 + $0x1b0] sm:$0xf] %vm6033_vm4, %v7178_v26  ;;  %v3830_v35 = vadd.f32 %v3143_v20, %v641_v24  ;;  %v3958_v37 = vadd.f32 %v3655_v31, %v769_v25  ;;  %v3145_v38 = vpop.f32.mrb[225].mxu0  ;;  %v3657_v39 = vpop.f32.mrb[225].mxu1  ;;  %v645_v25 = vld [vmem:[#allocation2 + $0x3a0] sm:$0xff] }
 0x2c4   : > { %v4990_v30 = vmax.f32 %v4734_v23, 0.0  ;;  %6270 = vst.msk [vmem:[%s8596_s22 + $0x3b0] sm:$0xf] %vm6033_vm4, %v7306_v27  ;;  %v4344_v40 = vld [vmem:[#allocation2 + $0x370] sm:$0xff]  ;;  %v3146_v42 = vpop.f32.mrb[226].mxu0  ;;  %v3658_v43 = vpop.f32.mrb[226].mxu1 }
 0x2c5   : > { %v7179_v34 = vpack.c.bf16 %v4862_v28, %v4862_v28  ;;  %v4472_v41 = vld [vmem:[#allocation2 + $0x770] sm:$0xff]  ;;  %v4607_v44 = vadd.f32 %v9524_v29, %v4344_v40  ;;  %4087 = vst.msk [vmem:[#allocation2 + $0x380] sm:$0xff] %vm272_vm3, %v3830_v35  ;;  %4215 = vst.msk [vmem:[#allocation2 + $0x780] sm:$0xff] %vm272_vm3, %v3958_v37  ;;  %v3831_v46 = vadd.f32 %v3146_v42, %v642_v32  ;;  %v3148_v48 = vpop.f32.mrb[227].mxu0  ;;  %v3660_v49 = vpop.f32.mrb[227].mxu1  ;;  %v773_v26 = vld [vmem:[#allocation2 + $0x7a0] sm:$0xff] }
 0x2c6   : > { %v7307_v36 = vpack.c.bf16 %v4990_v30, %v4990_v30  ;;  %v4735_v45 = vadd.f32 %v9524_v29, %v4472_v41  ;;  %v3959_v47 = vadd.f32 %v3658_v43, %v770_v33  ;;  %v646_v33 = vld [vmem:[#allocation2 + $0x3a8] sm:$0xff] }
 0x2c7   : > { %6143 = vst.msk [vmem:[%s8596_s22 + $0x1b4] sm:$0xf] %vm6033_vm4, %v7179_v34  ;;  %v4863_v52 = vmax.f32 %v4607_v44, 0.0  ;;  %v774_v34 = vld [vmem:[#allocation2 + $0x7a8] sm:$0xff] }
 0x2c8   : > { %6271 = vst.msk [vmem:[%s8596_s22 + $0x3b4] sm:$0xf] %vm6033_vm4, %v7307_v36  ;;  %v4345_v50 = vld [vmem:[#allocation2 + $0x378] sm:$0xff]  ;;  %v4991_v53 = vmax.f32 %v4735_v45, 0.0 }
 0x2c9   : > { %v4473_v51 = vld [vmem:[#allocation2 + $0x778] sm:$0xff]  ;;  %v4608_v55 = vadd.f32 %v9524_v29, %v4345_v50  ;;  %4088 = vst.msk [vmem:[#allocation2 + $0x388] sm:$0xff] %vm272_vm3, %v3831_v46  ;;  %4216 = vst.msk [vmem:[#allocation2 + $0x788] sm:$0xff] %vm272_vm3, %v3959_v47  ;;  %v7180_v59 = vpack.c.bf16 %v4863_v52, %v4863_v52 }
 0x2ca   : > { %v4736_v56 = vadd.f32 %v9524_v29, %v4473_v51  ;;  %v7308_v60 = vpack.c.bf16 %v4991_v53, %v4991_v53  ;;  %v3151_v63 = vpop.f32.mrb[228].mxu0  ;;  %v3663_v0 = vpop.f32.mrb[228].mxu1 }
 0x2cb   : > { %v4864_v61 = vmax.f32 %v4608_v55, 0.0  ;;  %6144 = vst.msk [vmem:[%s8596_s22 + $0x1b8] sm:$0xf] %vm6033_vm4, %v7180_v59  ;;  %v3832_v5 = vadd.f32 %v3151_v63, %v643_v57  ;;  %v3960_v6 = vadd.f32 %v3663_v0, %v771_v58  ;;  %v3153_v7 = vpop.f32.mrb[229].mxu0  ;;  %v3665_v8 = vpop.f32.mrb[229].mxu1  ;;  %v647_v58 = vld [vmem:[#allocation2 + $0x3b0] sm:$0xff] }
 0x2cc   : > { %v4992_v62 = vmax.f32 %v4736_v56, 0.0  ;;  %6272 = vst.msk [vmem:[%s8596_s22 + $0x3b8] sm:$0xf] %vm6033_vm4, %v7308_v60  ;;  %v4346_v9 = vld [vmem:[#allocation2 + $0x380] sm:$0xff]  ;;  %v3154_v11 = vpop.f32.mrb[230].mxu0  ;;  %v3666_v12 = vpop.f32.mrb[230].mxu1 }
 0x2cd   : > { %v7181_v3 = vpack.c.bf16 %v4864_v61, %v4864_v61  ;;  %v4474_v10 = vld [vmem:[#allocation2 + $0x780] sm:$0xff]  ;;  %v4609_v13 = vadd.f32 %v9524_v29, %v4346_v9  ;;  %4089 = vst.msk [vmem:[#allocation2 + $0x390] sm:$0xff] %vm272_vm3, %v3832_v5  ;;  %4217 = vst.msk [vmem:[#allocation2 + $0x790] sm:$0xff] %vm272_vm3, %v3960_v6  ;;  %v3833_v15 = vadd.f32 %v3154_v11, %v644_v1  ;;  %v3156_v54 = vpop.f32.mrb[231].mxu0  ;;  %v3668_v17 = vpop.f32.mrb[231].mxu1  ;;  %v775_v59 = vld [vmem:[#allocation2 + $0x7b0] sm:$0xff] }
 0x2ce   : > { %v7309_v4 = vpack.c.bf16 %v4992_v62, %v4992_v62  ;;  %v4737_v14 = vadd.f32 %v9524_v29, %v4474_v10  ;;  %v3961_v16 = vadd.f32 %v3666_v12, %v772_v2  ;;  %v9737_v56 = vld [vmem:[%s9854_s2] ss:$0 sm:$0xff]  ;;  %v648_v2 = vld [vmem:[#allocation2 + $0x3b8] sm:$0xff] }
 0x2cf   : > { %6145 = vst.msk [vmem:[%s8596_s22 + $0x1bc] sm:$0xf] %vm6033_vm4, %v7181_v3  ;;  %v4865_v21 = vmax.f32 %v4609_v13, 0.0  ;;  %v776_v3 = vld [vmem:[#allocation2 + $0x7b8] sm:$0xff] }
 0x2d0   : > { %6273 = vst.msk [vmem:[%s8596_s22 + $0x3bc] sm:$0xf] %vm6033_vm4, %v7309_v4  ;;  %v4347_v18 = vld [vmem:[#allocation2 + $0x388] sm:$0xff]  ;;  %v4993_v22 = vmax.f32 %v4737_v14, 0.0 }
 0x2d1   : > { %v4475_v19 = vld [vmem:[#allocation2 + $0x788] sm:$0xff]  ;;  %v4610_v23 = vadd.f32 %v9524_v29, %v4347_v18  ;;  %4090 = vst.msk [vmem:[#allocation2 + $0x398] sm:$0xff] %vm272_vm3, %v3833_v15  ;;  %4218 = vst.msk [vmem:[#allocation2 + $0x798] sm:$0xff] %vm272_vm3, %v3961_v16  ;;  %v7182_v27 = vpack.c.bf16 %v4865_v21, %v4865_v21 }
 0x2d2   : > { %v4738_v24 = vadd.f32 %v9524_v29, %v4475_v19  ;;  %v7310_v28 = vpack.c.bf16 %v4993_v22, %v4993_v22  ;;  %v3159_v31 = vpop.f32.mrb[232].mxu0  ;;  %v3671_v32 = vpop.f32.mrb[232].mxu1 }
 0x2d3   : > { %v4866_v30 = vmax.f32 %v4610_v23, 0.0  ;;  %6146 = vst.msk [vmem:[%s8596_s22 + $0x1c0] sm:$0xf] %vm6033_vm4, %v7182_v27  ;;  %v3834_v37 = vadd.f32 %v3159_v31, %v645_v25  ;;  %v3962_v38 = vadd.f32 %v3671_v32, %v773_v26  ;;  %v3161_v39 = vpop.f32.mrb[233].mxu0  ;;  %v3673_v40 = vpop.f32.mrb[233].mxu1  ;;  %v649_v26 = vld [vmem:[#allocation2 + $0x3c0] sm:$0xff] }
 0x2d4   : > { %v4994_v20 = vmax.f32 %v4738_v24, 0.0  ;;  %6274 = vst.msk [vmem:[%s8596_s22 + $0x3c0] sm:$0xf] %vm6033_vm4, %v7310_v28  ;;  %v4348_v41 = vld [vmem:[#allocation2 + $0x390] sm:$0xff]  ;;  %v3162_v43 = vpop.f32.mrb[234].mxu0  ;;  %v3674_v44 = vpop.f32.mrb[234].mxu1 }
 0x2d5   : > { %v7183_v36 = vpack.c.bf16 %v4866_v30, %v4866_v30  ;;  %v4476_v42 = vld [vmem:[#allocation2 + $0x790] sm:$0xff]  ;;  %v4611_v45 = vadd.f32 %v9524_v29, %v4348_v41  ;;  %4091 = vst.msk [vmem:[#allocation2 + $0x3a0] sm:$0xff] %vm272_vm3, %v3834_v37  ;;  %4219 = vst.msk [vmem:[#allocation2 + $0x7a0] sm:$0xff] %vm272_vm3, %v3962_v38  ;;  %v3835_v47 = vadd.f32 %v3162_v43, %v646_v33  ;;  %v3164_v49 = vpop.f32.mrb[235].mxu0  ;;  %v3676_v50 = vpop.f32.mrb[235].mxu1  ;;  %v777_v27 = vld [vmem:[#allocation2 + $0x7c0] sm:$0xff] }
 0x2d6   : > { %v7311_v35 = vpack.c.bf16 %v4994_v20, %v4994_v20  ;;  %v4739_v46 = vadd.f32 %v9524_v29, %v4476_v42  ;;  %v3963_v48 = vadd.f32 %v3674_v44, %v774_v34  ;;  %v650_v34 = vld [vmem:[#allocation2 + $0x3c8] sm:$0xff] }
 0x2d7   : > { %6147 = vst.msk [vmem:[%s8596_s22 + $0x1c4] sm:$0xf] %vm6033_vm4, %v7183_v36  ;;  %v4867_v53 = vmax.f32 %v4611_v45, 0.0  ;;  %v778_v36 = vld [vmem:[#allocation2 + $0x7c8] sm:$0xff] }
 0x2d8   : > { %6275 = vst.msk [vmem:[%s8596_s22 + $0x3c4] sm:$0xf] %vm6033_vm4, %v7311_v35  ;;  %v4349_v51 = vld [vmem:[#allocation2 + $0x398] sm:$0xff]  ;;  %v4995_v55 = vmax.f32 %v4739_v46, 0.0 }
 0x2d9   : > { %v4477_v52 = vld [vmem:[#allocation2 + $0x798] sm:$0xff]  ;;  %v4612_v29 = vadd.f32 %v9737_v56, %v4349_v51  ;;  %4092 = vst.msk [vmem:[#allocation2 + $0x3a8] sm:$0xff] %vm272_vm3, %v3835_v47  ;;  %4220 = vst.msk [vmem:[#allocation2 + $0x7a8] sm:$0xff] %vm272_vm3, %v3963_v48  ;;  %v7184_v60 = vpack.c.bf16 %v4867_v53, %v4867_v53 }
 0x2da   : > { %v4740_v57 = vadd.f32 %v9737_v56, %v4477_v52  ;;  %v7312_v61 = vpack.c.bf16 %v4995_v55, %v4995_v55  ;;  %v3167_v0 = vpop.f32.mrb[236].mxu0  ;;  %v3679_v1 = vpop.f32.mrb[236].mxu1 }
 0x2db   : > { %v4868_v62 = vmax.f32 %v4612_v29, 0.0  ;;  %6148 = vst.msk [vmem:[%s8596_s22 + $0x1c8] sm:$0xf] %vm6033_vm4, %v7184_v60  ;;  %v3836_v6 = vadd.f32 %v3167_v0, %v647_v58  ;;  %v3964_v7 = vadd.f32 %v3679_v1, %v775_v59  ;;  %v3169_v8 = vpop.f32.mrb[237].mxu0  ;;  %v3681_v9 = vpop.f32.mrb[237].mxu1  ;;  %v651_v59 = vld [vmem:[#allocation2 + $0x3d0] sm:$0xff] }
 0x2dc   : > { %v4996_v63 = vmax.f32 %v4740_v57, 0.0  ;;  %6276 = vst.msk [vmem:[%s8596_s22 + $0x3c8] sm:$0xf] %vm6033_vm4, %v7312_v61  ;;  %v4350_v10 = vld [vmem:[#allocation2 + $0x3a0] sm:$0xff]  ;;  %v3170_v12 = vpop.f32.mrb[238].mxu0  ;;  %v3682_v13 = vpop.f32.mrb[238].mxu1 }
 0x2dd   : > { %v7185_v4 = vpack.c.bf16 %v4868_v62, %v4868_v62  ;;  %v4478_v11 = vld [vmem:[#allocation2 + $0x7a0] sm:$0xff]  ;;  %v4613_v14 = vadd.f32 %v9737_v56, %v4350_v10  ;;  %4093 = vst.msk [vmem:[#allocation2 + $0x3b0] sm:$0xff] %vm272_vm3, %v3836_v6  ;;  %4221 = vst.msk [vmem:[#allocation2 + $0x7b0] sm:$0xff] %vm272_vm3, %v3964_v7  ;;  %v3837_v16 = vadd.f32 %v3170_v12, %v648_v2  ;;  %v3172_v17 = vpop.f32.mrb[239].mxu0  ;;  %v3684_v18 = vpop.f32.mrb[239].mxu1  ;;  %v779_v60 = vld [vmem:[#allocation2 + $0x7d0] sm:$0xff] }
 0x2de   : > { %v7313_v5 = vpack.c.bf16 %v4996_v63, %v4996_v63  ;;  %v4741_v15 = vadd.f32 %v9737_v56, %v4478_v11  ;;  %v3965_v54 = vadd.f32 %v3682_v13, %v776_v3  ;;  %v652_v3 = vld [vmem:[#allocation2 + $0x3d8] sm:$0xff] }
 0x2df   : > { %6149 = vst.msk [vmem:[%s8596_s22 + $0x1cc] sm:$0xf] %vm6033_vm4, %v7185_v4  ;;  %v4869_v22 = vmax.f32 %v4613_v14, 0.0  ;;  %v780_v4 = vld [vmem:[#allocation2 + $0x7d8] sm:$0xff] }
 0x2e0   : > { %6277 = vst.msk [vmem:[%s8596_s22 + $0x3cc] sm:$0xf] %vm6033_vm4, %v7313_v5  ;;  %v4351_v19 = vld [vmem:[#allocation2 + $0x3a8] sm:$0xff]  ;;  %v4997_v23 = vmax.f32 %v4741_v15, 0.0 }
 0x2e1   : > { %v4479_v21 = vld [vmem:[#allocation2 + $0x7a8] sm:$0xff]  ;;  %v4614_v24 = vadd.f32 %v9737_v56, %v4351_v19  ;;  %4094 = vst.msk [vmem:[#allocation2 + $0x3b8] sm:$0xff] %vm272_vm3, %v3837_v16  ;;  %4222 = vst.msk [vmem:[#allocation2 + $0x7b8] sm:$0xff] %vm272_vm3, %v3965_v54  ;;  %v7186_v28 = vpack.c.bf16 %v4869_v22, %v4869_v22 }
 0x2e2   : > { %v4742_v25 = vadd.f32 %v9737_v56, %v4479_v21  ;;  %v7314_v30 = vpack.c.bf16 %v4997_v23, %v4997_v23  ;;  %v3175_v32 = vpop.f32.mrb[240].mxu0  ;;  %v3687_v33 = vpop.f32.mrb[240].mxu1 }
 0x2e3   : > { %v4870_v20 = vmax.f32 %v4614_v24, 0.0  ;;  %6150 = vst.msk [vmem:[%s8596_s22 + $0x1d0] sm:$0xf] %vm6033_vm4, %v7186_v28  ;;  %v3838_v38 = vadd.f32 %v3175_v32, %v649_v26  ;;  %v3966_v39 = vadd.f32 %v3687_v33, %v777_v27  ;;  %v3177_v40 = vpop.f32.mrb[241].mxu0  ;;  %v3689_v41 = vpop.f32.mrb[241].mxu1  ;;  %v653_v27 = vld [vmem:[#allocation2 + $0x3e0] sm:$0xff] }
 0x2e4   : > { %v4998_v31 = vmax.f32 %v4742_v25, 0.0  ;;  %6278 = vst.msk [vmem:[%s8596_s22 + $0x3d0] sm:$0xf] %vm6033_vm4, %v7314_v30  ;;  %v4352_v42 = vld [vmem:[#allocation2 + $0x3b0] sm:$0xff]  ;;  %v3178_v44 = vpop.f32.mrb[242].mxu0  ;;  %v3690_v45 = vpop.f32.mrb[242].mxu1 }
 0x2e5   : > { %v7187_v35 = vpack.c.bf16 %v4870_v20, %v4870_v20  ;;  %v4480_v43 = vld [vmem:[#allocation2 + $0x7b0] sm:$0xff]  ;;  %v4615_v46 = vadd.f32 %v9737_v56, %v4352_v42  ;;  %4095 = vst.msk [vmem:[#allocation2 + $0x3c0] sm:$0xff] %vm272_vm3, %v3838_v38  ;;  %4223 = vst.msk [vmem:[#allocation2 + $0x7c0] sm:$0xff] %vm272_vm3, %v3966_v39  ;;  %v3839_v48 = vadd.f32 %v3178_v44, %v650_v34  ;;  %v3180_v50 = vpop.f32.mrb[243].mxu0  ;;  %v3692_v51 = vpop.f32.mrb[243].mxu1  ;;  %v781_v28 = vld [vmem:[#allocation2 + $0x7e0] sm:$0xff] }
 0x2e6   : > { %v7315_v37 = vpack.c.bf16 %v4998_v31, %v4998_v31  ;;  %v4743_v47 = vadd.f32 %v9737_v56, %v4480_v43  ;;  %v3967_v49 = vadd.f32 %v3690_v45, %v778_v36  ;;  %v654_v36 = vld [vmem:[#allocation2 + $0x3e8] sm:$0xff] }
 0x2e7   : > { %6151 = vst.msk [vmem:[%s8596_s22 + $0x1d4] sm:$0xf] %vm6033_vm4, %v7187_v35  ;;  %v4871_v55 = vmax.f32 %v4615_v46, 0.0  ;;  %v782_v35 = vld [vmem:[#allocation2 + $0x7e8] sm:$0xff] }
 0x2e8   : > { %6279 = vst.msk [vmem:[%s8596_s22 + $0x3d4] sm:$0xf] %vm6033_vm4, %v7315_v37  ;;  %v4353_v52 = vld [vmem:[#allocation2 + $0x3b8] sm:$0xff]  ;;  %v4999_v29 = vmax.f32 %v4743_v47, 0.0 }
 0x2e9   : > { %v4481_v53 = vld [vmem:[#allocation2 + $0x7b8] sm:$0xff]  ;;  %v4616_v57 = vadd.f32 %v9737_v56, %v4353_v52  ;;  %4096 = vst.msk [vmem:[#allocation2 + $0x3c8] sm:$0xff] %vm272_vm3, %v3839_v48  ;;  %4224 = vst.msk [vmem:[#allocation2 + $0x7c8] sm:$0xff] %vm272_vm3, %v3967_v49  ;;  %v7188_v61 = vpack.c.bf16 %v4871_v55, %v4871_v55 }
 0x2ea   : > { %v4744_v58 = vadd.f32 %v9737_v56, %v4481_v53  ;;  %v7316_v62 = vpack.c.bf16 %v4999_v29, %v4999_v29  ;;  %v3183_v1 = vpop.f32.mrb[244].mxu0  ;;  %v3695_v2 = vpop.f32.mrb[244].mxu1 }
 0x2eb   : > { %v4872_v63 = vmax.f32 %v4616_v57, 0.0  ;;  %6152 = vst.msk [vmem:[%s8596_s22 + $0x1d8] sm:$0xf] %vm6033_vm4, %v7188_v61  ;;  %v3840_v7 = vadd.f32 %v3183_v1, %v651_v59  ;;  %v3968_v8 = vadd.f32 %v3695_v2, %v779_v60  ;;  %v3185_v9 = vpop.f32.mrb[245].mxu0  ;;  %v3697_v10 = vpop.f32.mrb[245].mxu1  ;;  %v655_v60 = vld [vmem:[#allocation2 + $0x3f0] sm:$0xff] }
 0x2ec   : > { %v5000_v0 = vmax.f32 %v4744_v58, 0.0  ;;  %6280 = vst.msk [vmem:[%s8596_s22 + $0x3d8] sm:$0xf] %vm6033_vm4, %v7316_v62  ;;  %v4354_v11 = vld [vmem:[#allocation2 + $0x3c0] sm:$0xff]  ;;  %v3186_v13 = vpop.f32.mrb[246].mxu0  ;;  %v3698_v14 = vpop.f32.mrb[246].mxu1 }
 0x2ed   : > { %v7189_v5 = vpack.c.bf16 %v4872_v63, %v4872_v63  ;;  %v4482_v12 = vld [vmem:[#allocation2 + $0x7c0] sm:$0xff]  ;;  %v4617_v15 = vadd.f32 %v9737_v56, %v4354_v11  ;;  %4097 = vst.msk [vmem:[#allocation2 + $0x3d0] sm:$0xff] %vm272_vm3, %v3840_v7  ;;  %4225 = vst.msk [vmem:[#allocation2 + $0x7d0] sm:$0xff] %vm272_vm3, %v3968_v8  ;;  %v3841_v54 = vadd.f32 %v3186_v13, %v652_v3  ;;  %v3188_v18 = vpop.f32.mrb[247].mxu0  ;;  %v3700_v19 = vpop.f32.mrb[247].mxu1  ;;  %v783_v61 = vld [vmem:[#allocation2 + $0x7f0] sm:$0xff] }
 0x2ee   : > { %v7317_v6 = vpack.c.bf16 %v5000_v0, %v5000_v0  ;;  %v4745_v16 = vadd.f32 %v9737_v56, %v4482_v12  ;;  %v3969_v17 = vadd.f32 %v3698_v14, %v780_v4  ;;  %v656_v4 = vld [vmem:[#allocation2 + $0x3f8] sm:$0xff] }
 0x2ef   : > { %6153 = vst.msk [vmem:[%s8596_s22 + $0x1dc] sm:$0xf] %vm6033_vm4, %v7189_v5  ;;  %v4873_v23 = vmax.f32 %v4617_v15, 0.0  ;;  %v784_v5 = vld [vmem:[#allocation2 + $0x7f8] sm:$0xff] }
 0x2f0   : > { %6281 = vst.msk [vmem:[%s8596_s22 + $0x3dc] sm:$0xf] %vm6033_vm4, %v7317_v6  ;;  %v4355_v21 = vld [vmem:[#allocation2 + $0x3c8] sm:$0xff]  ;;  %v5001_v24 = vmax.f32 %v4745_v16, 0.0 }
 0x2f1   : > { %v4483_v22 = vld [vmem:[#allocation2 + $0x7c8] sm:$0xff]  ;;  %v4618_v25 = vadd.f32 %v9737_v56, %v4355_v21  ;;  %4098 = vst.msk [vmem:[#allocation2 + $0x3d8] sm:$0xff] %vm272_vm3, %v3841_v54  ;;  %4226 = vst.msk [vmem:[#allocation2 + $0x7d8] sm:$0xff] %vm272_vm3, %v3969_v17  ;;  %v7190_v30 = vpack.c.bf16 %v4873_v23, %v4873_v23 }
 0x2f2   : > { %v4746_v26 = vadd.f32 %v9737_v56, %v4483_v22  ;;  %v7318_v20 = vpack.c.bf16 %v5001_v24, %v5001_v24  ;;  %v3191_v33 = vpop.f32.mrb[248].mxu0  ;;  %v3703_v34 = vpop.f32.mrb[248].mxu1 }
 0x2f3   : > { %v4874_v31 = vmax.f32 %v4618_v25, 0.0  ;;  %6154 = vst.msk [vmem:[%s8596_s22 + $0x1e0] sm:$0xf] %vm6033_vm4, %v7190_v30  ;;  %v3842_v39 = vadd.f32 %v3191_v33, %v653_v27  ;;  %v3970_v40 = vadd.f32 %v3703_v34, %v781_v28  ;;  %v3193_v41 = vpop.f32.mrb[249].mxu0  ;;  %v3705_v42 = vpop.f32.mrb[249].mxu1 }
 0x2f4   : > { %v5002_v32 = vmax.f32 %v4746_v26, 0.0  ;;  %6282 = vst.msk [vmem:[%s8596_s22 + $0x3e0] sm:$0xf] %vm6033_vm4, %v7318_v20  ;;  %v4356_v43 = vld [vmem:[#allocation2 + $0x3d0] sm:$0xff]  ;;  %v3194_v45 = vpop.f32.mrb[250].mxu0  ;;  %v3706_v46 = vpop.f32.mrb[250].mxu1 }
 0x2f5   : > { %v7191_v37 = vpack.c.bf16 %v4874_v31, %v4874_v31  ;;  %v4484_v44 = vld [vmem:[#allocation2 + $0x7d0] sm:$0xff]  ;;  %v4619_v47 = vadd.f32 %v9737_v56, %v4356_v43  ;;  %4099 = vst.msk [vmem:[#allocation2 + $0x3e0] sm:$0xff] %vm272_vm3, %v3842_v39  ;;  %4227 = vst.msk [vmem:[#allocation2 + $0x7e0] sm:$0xff] %vm272_vm3, %v3970_v40  ;;  %v3843_v49 = vadd.f32 %v3194_v45, %v654_v36  ;;  %v3196_v51 = vpop.f32.mrb[251].mxu0  ;;  %v3708_v52 = vpop.f32.mrb[251].mxu1 }
 0x2f6   : > { %v7319_v38 = vpack.c.bf16 %v5002_v32, %v5002_v32  ;;  %v4747_v48 = vadd.f32 %v9737_v56, %v4484_v44  ;;  %v3971_v50 = vadd.f32 %v3706_v46, %v782_v35 }
 0x2f7   : > { %6155 = vst.msk [vmem:[%s8596_s22 + $0x1e4] sm:$0xf] %vm6033_vm4, %v7191_v37  ;;  %v4875_v29 = vmax.f32 %v4619_v47, 0.0 }
 0x2f8   : > { %6283 = vst.msk [vmem:[%s8596_s22 + $0x3e4] sm:$0xf] %vm6033_vm4, %v7319_v38  ;;  %v4357_v53 = vld [vmem:[#allocation2 + $0x3d8] sm:$0xff]  ;;  %v5003_v57 = vmax.f32 %v4747_v48, 0.0 }
 0x2f9   : > { %v4485_v55 = vld [vmem:[#allocation2 + $0x7d8] sm:$0xff]  ;;  %v4620_v58 = vadd.f32 %v9737_v56, %v4357_v53  ;;  %4100 = vst.msk [vmem:[#allocation2 + $0x3e8] sm:$0xff] %vm272_vm3, %v3843_v49  ;;  %4228 = vst.msk [vmem:[#allocation2 + $0x7e8] sm:$0xff] %vm272_vm3, %v3971_v50  ;;  %v7192_v62 = vpack.c.bf16 %v4875_v29, %v4875_v29 }
 0x2fa   : > { %v4748_v59 = vadd.f32 %v9737_v56, %v4485_v55  ;;  %v7320_v63 = vpack.c.bf16 %v5003_v57, %v5003_v57  ;;  %v3199_v2 = vpop.f32.mrb[252].mxu0  ;;  %v3711_v3 = vpop.f32.mrb[252].mxu1 }
 0x2fb   : > { %v4876_v0 = vmax.f32 %v4620_v58, 0.0  ;;  %6156 = vst.msk [vmem:[%s8596_s22 + $0x1e8] sm:$0xf] %vm6033_vm4, %v7192_v62  ;;  %v3844_v8 = vadd.f32 %v3199_v2, %v655_v60  ;;  %v3972_v9 = vadd.f32 %v3711_v3, %v783_v61  ;;  %v3201_v10 = vpop.f32.mrb[253].mxu0  ;;  %v3713_v11 = vpop.f32.mrb[253].mxu1 }
 0x2fc   : > { %v5004_v1 = vmax.f32 %v4748_v59, 0.0  ;;  %6284 = vst.msk [vmem:[%s8596_s22 + $0x3e8] sm:$0xf] %vm6033_vm4, %v7320_v63  ;;  %v4358_v12 = vld [vmem:[#allocation2 + $0x3e0] sm:$0xff]  ;;  %v3202_v14 = vpop.f32.mrb[254].mxu0  ;;  %v3714_v15 = vpop.f32.mrb[254].mxu1 }
 0x2fd   : > { %v7193_v6 = vpack.c.bf16 %v4876_v0, %v4876_v0  ;;  %v4486_v13 = vld [vmem:[#allocation2 + $0x7e0] sm:$0xff]  ;;  %v4621_v16 = vadd.f32 %v9737_v56, %v4358_v12  ;;  %4101 = vst.msk [vmem:[#allocation2 + $0x3f0] sm:$0xff] %vm272_vm3, %v3844_v8  ;;  %4229 = vst.msk [vmem:[#allocation2 + $0x7f0] sm:$0xff] %vm272_vm3, %v3972_v9  ;;  %v3845_v17 = vadd.f32 %v3202_v14, %v656_v4  ;;  %v3204_v19 = vpop.f32.mrb[255].mxu0  ;;  %v3716_v21 = vpop.f32.mrb[255].mxu1 }
 0x2fe   : > { %v7321_v7 = vpack.c.bf16 %v5004_v1, %v5004_v1  ;;  %v4749_v54 = vadd.f32 %v9737_v56, %v4486_v13  ;;  %v3973_v18 = vadd.f32 %v3714_v15, %v784_v5 }
 0x2ff   : > { %6157 = vst.msk [vmem:[%s8596_s22 + $0x1ec] sm:$0xf] %vm6033_vm4, %v7193_v6  ;;  %v4877_v24 = vmax.f32 %v4621_v16, 0.0 }
 0x300   : > { %6285 = vst.msk [vmem:[%s8596_s22 + $0x3ec] sm:$0xf] %vm6033_vm4, %v7321_v7  ;;  %v4359_v22 = vld [vmem:[#allocation2 + $0x3e8] sm:$0xff]  ;;  %v5005_v25 = vmax.f32 %v4749_v54, 0.0 }
 0x301   : > { %v4487_v23 = vld [vmem:[#allocation2 + $0x7e8] sm:$0xff]  ;;  %v4622_v26 = vadd.f32 %v9737_v56, %v4359_v22  ;;  %4102 = vst.msk [vmem:[#allocation2 + $0x3f8] sm:$0xff] %vm272_vm3, %v3845_v17  ;;  %4230 = vst.msk [vmem:[#allocation2 + $0x7f8] sm:$0xff] %vm272_vm3, %v3973_v18  ;;  %v7194_v28 = vpack.c.bf16 %v4877_v24, %v4877_v24 }
 0x302   : > { %v4750_v27 = vadd.f32 %v9737_v56, %v4487_v23  ;;  %v7322_v30 = vpack.c.bf16 %v5005_v25, %v5005_v25 }
 0x303   : > { %v4878_v20 = vmax.f32 %v4622_v26, 0.0  ;;  %6158 = vst.msk [vmem:[%s8596_s22 + $0x1f0] sm:$0xf] %vm6033_vm4, %v7194_v28 }
 0x304   : > { %v5006_v31 = vmax.f32 %v4750_v27, 0.0  ;;  %6286 = vst.msk [vmem:[%s8596_s22 + $0x3f0] sm:$0xf] %vm6033_vm4, %v7322_v30  ;;  %v4360_v34 = vld [vmem:[#allocation2 + $0x3f0] sm:$0xff] }
 0x305   : > { %v7195_v32 = vpack.c.bf16 %v4878_v20, %v4878_v20  ;;  %v4488_v36 = vld [vmem:[#allocation2 + $0x7f0] sm:$0xff]  ;;  %v4623_v35 = vadd.f32 %v9737_v56, %v4360_v34 }
 0x306   : > { %v7323_v33 = vpack.c.bf16 %v5006_v31, %v5006_v31  ;;  %v4751_v37 = vadd.f32 %v9737_v56, %v4488_v36 }
 0x307   : > { %6159 = vst.msk [vmem:[%s8596_s22 + $0x1f4] sm:$0xf] %vm6033_vm4, %v7195_v32  ;;  %v4879_v40 = vmax.f32 %v4623_v35, 0.0 }
 0x308   : > { %6287 = vst.msk [vmem:[%s8596_s22 + $0x3f4] sm:$0xf] %vm6033_vm4, %v7323_v33  ;;  %v4361_v38 = vld [vmem:[#allocation2 + $0x3f8] sm:$0xff]  ;;  %v5007_v41 = vmax.f32 %v4751_v37, 0.0 }
 0x309   : > { %v4489_v39 = vld [vmem:[#allocation2 + $0x7f8] sm:$0xff]  ;;  %v4624_v42 = vadd.f32 %v9737_v56, %v4361_v38  ;;  %v7196_v44 = vpack.c.bf16 %v4879_v40, %v4879_v40 }
 0x30a   : > { %v4752_v43 = vadd.f32 %v9737_v56, %v4489_v39  ;;  %v7324_v45 = vpack.c.bf16 %v5007_v41, %v5007_v41 }
 0x30b   : > { %v4880_v46 = vmax.f32 %v4624_v42, 0.0  ;;  %6160 = vst.msk [vmem:[%s8596_s22 + $0x1f8] sm:$0xf] %vm6033_vm4, %v7196_v44 }
 0x30c   : > { %v5008_v47 = vmax.f32 %v4752_v43, 0.0  ;;  %6288 = vst.msk [vmem:[%s8596_s22 + $0x3f8] sm:$0xf] %vm6033_vm4, %v7324_v45 }
 0x30d   : > { %v7197_v48 = vpack.c.bf16 %v4880_v46, %v4880_v46 }
 0x30e   : > { %v7325_v49 = vpack.c.bf16 %v5008_v47, %v5008_v47 }
 0x30f   : > { %6161 = vst.msk [vmem:[%s8596_s22 + $0x1fc] sm:$0xf] %vm6033_vm4, %v7197_v48 }
 0x310   : > { %6289 = vst.msk [vmem:[%s8596_s22 + $0x3fc] sm:$0xf] %vm6033_vm4, %v7325_v49 }
 0x311 PF: > { %s13_s14 = sadd.s32 1, %s7794_s14   ;;  %s9856_s12 = smov %s7790_s13 }
 0x312   : > { %p10_p5 = scmp.ge.s32.totalorder %s13_s14, 6   ;;  %s9857_s13 = smov %s9859_s15 }
 0x314   :  { %12 = sbr.rel (!%p10_p5) target bundleno = 2 (0x2), region = 76 }

</bundles_post_ra>
